<compile_context>
chip_gen: v6e
topology: v6e:2x2x1
jax: 0.10.0
libtpu: 0.0.40
codegen_flags: <defaults>
</compile_context>

<pallas_src>
import functools

import jax
import jax.numpy as jnp
from jax.experimental import pallas as pl
from jax.experimental.pallas import tpu as pltpu

INPUT_SIZE = 19163
HIDDEN_SIZE = 100
NUM_CLASSES = 2

TK = 9600  # rows of W1 streamed per grid step (75 * 128 -> lane-aligned x block)


def _round_up(x, m):
    return (x + m - 1) // m * m


# ---------------------------------------------------------------------------
# Fused kernel.  grid = (nk,), reduction axis only ("arbitrary").
#   k == 0      : init resident f32 accumulator with broadcast b1
#   every step  : acc += x_tile(bf16) @ W1_tile(bf16)   (f32 MXU accumulation)
#   k == nk - 1 : ReLU, tiny fc2 matmul, + b2, write output
# ---------------------------------------------------------------------------
def net_kernel(x_ref, w1_ref, b1_ref, w2_ref, b2_ref, o_ref, acc_ref):
    k = pl.program_id(0)

    @pl.when(k == 0)
    def _():
        acc_ref[...] = jnp.broadcast_to(b1_ref[...], acc_ref.shape)

    acc_ref[...] += jnp.dot(
        x_ref[...].astype(jnp.bfloat16),
        w1_ref[...],
        preferred_element_type=jnp.float32,
    )

    @pl.when(k == pl.num_programs(0) - 1)
    def _():
        h = jnp.maximum(acc_ref[...], 0.0)
        o_ref[...] = (
            jnp.dot(h, w2_ref[...], preferred_element_type=jnp.float32)
            + b2_ref[...]
        ).astype(o_ref.dtype)


def prepare_params(w1, b1, w2, b2, *, tk=TK):
    """One-time pad + cast of the weights (hoisted out of the forward pass).

    Weights are stored pre-transposed as (in_features, out_features).
    W1 is stored bf16 (streamed weight); the small fc2 weights stay f32.
    """
    K, H = w1.shape
    C = w2.shape[1]
    Kp = _round_up(K, tk)
    Hp = _round_up(H, 128)
    Cp = _round_up(C, 128)
    w1_p = jnp.zeros((Kp, Hp), jnp.bfloat16).at[:K, :H].set(
        w1.astype(jnp.bfloat16))
    b1_p = jnp.zeros((1, Hp), jnp.float32).at[0, :H].set(b1.astype(jnp.float32))
    w2_p = jnp.zeros((Hp, Cp), jnp.float32).at[:H, :C].set(
        w2.astype(jnp.float32))
    b2_p = jnp.zeros((1, Cp), jnp.float32).at[0, :C].set(b2.astype(jnp.float32))
    return w1_p, b1_p, w2_p, b2_p


@functools.partial(jax.jit, static_argnames=("num_classes", "tk"))
def net_forward(x, w1_p, b1_p, w2_p, b2_p, *, num_classes, tk=TK):
    """Forward pass of Net: fc2(relu(fc1(x)))."""
    B, K = x.shape
    Kp, Hp = w1_p.shape
    Cp = w2_p.shape[1]

    assert Kp % tk == 0, "params not prepared for this tk"
    nk = Kp // tk  # reduction steps (2 with the default tk)

    # Pad only the K axis; keep f32 (bf16 cast happens inside the kernel).
    x_p = jnp.zeros((B, Kp), x.dtype).at[:, :K].set(x)

    out_p = pl.pallas_call(
        net_kernel,
        out_shape=jax.ShapeDtypeStruct((B, Cp), jnp.float32),
        grid_spec=pltpu.PrefetchScalarGridSpec(
            num_scalar_prefetch=0,
            grid=(nk,),
            in_specs=[
                pl.BlockSpec((B, tk), lambda k: (0, k)),    # x (f32)
                pl.BlockSpec((tk, Hp), lambda k: (k, 0)),   # W1 (bf16)
                pl.BlockSpec((1, Hp), lambda k: (0, 0)),    # b1
                pl.BlockSpec((Hp, Cp), lambda k: (0, 0)),   # W2
                pl.BlockSpec((1, Cp), lambda k: (0, 0)),    # b2
            ],
            out_specs=pl.BlockSpec((B, Cp), lambda k: (0, 0)),
            scratch_shapes=[pltpu.VMEM((B, Hp), jnp.float32)],
        ),
        compiler_params=pltpu.CompilerParams(
            dimension_semantics=("arbitrary",),
        ),
    )(x_p, w1_p, b1_p, w2_p, b2_p)

    return out_p[:, :num_classes]


def init_params(key, input_size, hidden_size, num_classes):
    """Deterministic init matching nn.Linear default: U(-1/sqrt(fan_in), 1/sqrt(fan_in))."""
    k1, k2, k3, k4 = jax.random.split(key, 4)
    bound1 = 1.0 / jnp.sqrt(jnp.float32(input_size))
    bound2 = 1.0 / jnp.sqrt(jnp.float32(hidden_size))
    # stored as (in_features, out_features), i.e. transpose of torch's weight
    w1 = jax.random.uniform(k1, (input_size, hidden_size), jnp.float32,
                            -bound1, bound1)
    b1 = jax.random.uniform(k2, (hidden_size,), jnp.float32, -bound1, bound1)
    w2 = jax.random.uniform(k3, (hidden_size, num_classes), jnp.float32,
                            -bound2, bound2)
    b2 = jax.random.uniform(k4, (num_classes,), jnp.float32, -bound2, bound2)
    return w1, b1, w2, b2


if __name__ == "__main__":
    key = jax.random.PRNGKey(0)
    pkey, xkey = jax.random.split(key)

    batch = 2
    w1, b1, w2, b2 = init_params(pkey, INPUT_SIZE, HIDDEN_SIZE, NUM_CLASSES)
    x = jax.random.normal(xkey, (batch, INPUT_SIZE), jnp.float32)

    # One-time weight preparation (pad + bf16 cast), hoisted out of the forward.
    params = prepare_params(w1, b1, w2, b2)

    out = net_forward(x, *params, num_classes=NUM_CLASSES)
    out = jax.block_until_ready(out)

    # Reference with matched bf16 input precision for fc1, f32 accumulation.
    xb = x.astype(jnp.bfloat16).astype(jnp.float32)
    w1b = w1.astype(jnp.bfloat16).astype(jnp.float32)
    h_ref = jnp.maximum(
        jnp.dot(xb, w1b, precision=jax.lax.Precision.HIGHEST) + b1, 0.0)
    ref = jnp.dot(h_ref, w2, precision=jax.lax.Precision.HIGHEST) + b2

    assert out.shape == (batch, NUM_CLASSES)
    assert jnp.allclose(out, ref, atol=1e-2, rtol=1e-2), "mismatch vs reference"

    print("KERNEL_OK")
</pallas_src>

<mosaic_0001>
module attributes {stable_mosaic.version = 11 : i64} {
  func.func @net_kernel(%arg0: i32, %arg1: memref<2x9600xf32, #tpu.memory_space<vmem>>, %arg2: memref<9600x128xbf16, #tpu.memory_space<vmem>>, %arg3: memref<1x128xf32, #tpu.memory_space<vmem>>, %arg4: memref<128x128xf32, #tpu.memory_space<vmem>>, %arg5: memref<1x128xf32, #tpu.memory_space<vmem>>, %arg6: memref<2x128xf32, #tpu.memory_space<vmem>>, %arg7: memref<2x128xf32, #tpu.memory_space<vmem>>) attributes {dimension_semantics = [#tpu.dimension_semantics<arbitrary>], iteration_bounds = array<i64: 2>, scalar_prefetch = 0 : i64, scratch_operands = 1 : i64, tpu.core_type = #tpu.core_type<tc>, window_params = [{transform_indices = @transform_0, window_bounds = array<i64: 2, 9600>}, {transform_indices = @transform_1, window_bounds = array<i64: 9600, 128>}, {pipeline_mode = #tpu.pipeline_mode<synchronous>, transform_indices = @transform_2, window_bounds = array<i64: 1, 128>}, {pipeline_mode = #tpu.pipeline_mode<synchronous>, transform_indices = @transform_3, window_bounds = array<i64: 128, 128>}, {pipeline_mode = #tpu.pipeline_mode<synchronous>, transform_indices = @transform_4, window_bounds = array<i64: 1, 128>}, {pipeline_mode = #tpu.pipeline_mode<synchronous>, transform_indices = @transform_5, window_bounds = array<i64: 2, 128>}]} {
    %c0_i32 = arith.constant 0 : i32
    %0 = arith.cmpi eq, %arg0, %c0_i32 : i32
    %1 = arith.extui %0 : i1 to i32
    %c0_i32_0 = arith.constant 0 : i32
    %2 = arith.cmpi ne, %1, %c0_i32_0 : i32
    scf.if %2 {
      %c0_9 = arith.constant 0 : index
      %c0_10 = arith.constant 0 : index
      %13 = vector.load %arg3[%c0_9, %c0_10] : memref<1x128xf32, #tpu.memory_space<vmem>>, vector<1x128xf32>
      %14 = vector.shape_cast %13 : vector<1x128xf32> to vector<1x128xf32>
      %15 = vector.broadcast %14 : vector<1x128xf32> to vector<2x128xf32>
      %c0_11 = arith.constant 0 : index
      %c0_12 = arith.constant 0 : index
      %16 = vector.load %arg7[%c0_11, %c0_12] : memref<2x128xf32, #tpu.memory_space<vmem>>, vector<2x128xf32>
      tpu.vector_store %arg7[%c0_11, %c0_12], %15 {strides = array<i32>} : memref<2x128xf32, #tpu.memory_space<vmem>>, vector<2x128xf32>,
    } else {
    }
    %c0 = arith.constant 0 : index
    %c0_1 = arith.constant 0 : index
    %3 = vector.load %arg7[%c0, %c0_1] : memref<2x128xf32, #tpu.memory_space<vmem>>, vector<2x128xf32>
    %c0_2 = arith.constant 0 : index
    %c0_3 = arith.constant 0 : index
    %4 = vector.load %arg1[%c0_2, %c0_3] : memref<2x9600xf32, #tpu.memory_space<vmem>>, vector<2x9600xf32>
    %5 = arith.truncf %4 : vector<2x9600xf32> to vector<2x9600xbf16>
    %c0_4 = arith.constant 0 : index
    %c0_5 = arith.constant 0 : index
    %6 = vector.load %arg2[%c0_4, %c0_5] : memref<9600x128xbf16, #tpu.memory_space<vmem>>, vector<9600x128xbf16>
    %cst = arith.constant dense<0.000000e+00> : vector<2x128xf32>
    %7 = tpu.matmul %5, %6, %cst {dimension_numbers = #tpu.dot_dimension_numbers<[1], [0], [0], [1], [0, 0, 1, 1], [], []>} : vector<2x9600xbf16>, vector<9600x128xbf16>, vector<2x128xf32> -> vector<2x128xf32>
    %8 = arith.addf %3, %7 : vector<2x128xf32>
    %c0_6 = arith.constant 0 : index
    %c0_7 = arith.constant 0 : index
    %9 = vector.load %arg7[%c0_6, %c0_7] : memref<2x128xf32, #tpu.memory_space<vmem>>, vector<2x128xf32>
    tpu.vector_store %arg7[%c0_6, %c0_7], %8 {strides = array<i32>} : memref<2x128xf32, #tpu.memory_space<vmem>>, vector<2x128xf32>,
    %c1_i32 = arith.constant 1 : i32
    %10 = arith.cmpi eq, %arg0, %c1_i32 : i32
    %11 = arith.extui %10 : i1 to i32
    %c0_i32_8 = arith.constant 0 : i32
    %12 = arith.cmpi ne, %11, %c0_i32_8 : i32
    scf.if %12 {
      %c0_9 = arith.constant 0 : index
      %c0_10 = arith.constant 0 : index
      %13 = vector.load %arg7[%c0_9, %c0_10] : memref<2x128xf32, #tpu.memory_space<vmem>>, vector<2x128xf32>
      %cst_11 = arith.constant 0.000000e+00 : f32
      %14 = vector.broadcast %cst_11 : f32 to vector<2x128xf32>
      %15 = arith.maximumf %13, %14 : vector<2x128xf32>
      %c0_12 = arith.constant 0 : index
      %c0_13 = arith.constant 0 : index
      %16 = vector.load %arg4[%c0_12, %c0_13] : memref<128x128xf32, #tpu.memory_space<vmem>>, vector<128x128xf32>
      %cst_14 = arith.constant dense<0.000000e+00> : vector<2x128xf32>
      %17 = tpu.matmul %15, %16, %cst_14 {dimension_numbers = #tpu.dot_dimension_numbers<[1], [0], [0], [1], [0, 0, 1, 1], [], []>} : vector<2x128xf32>, vector<128x128xf32>, vector<2x128xf32> -> vector<2x128xf32>
      %c0_15 = arith.constant 0 : index
      %c0_16 = arith.constant 0 : index
      %18 = vector.load %arg5[%c0_15, %c0_16] : memref<1x128xf32, #tpu.memory_space<vmem>>, vector<1x128xf32>
      %19 = vector.broadcast %18 : vector<1x128xf32> to vector<2x128xf32>
      %20 = arith.addf %17, %19 : vector<2x128xf32>
      %c0_17 = arith.constant 0 : index
      %c0_18 = arith.constant 0 : index
      %21 = vector.load %arg6[%c0_17, %c0_18] : memref<2x128xf32, #tpu.memory_space<vmem>>, vector<2x128xf32>
      tpu.vector_store %arg6[%c0_17, %c0_18], %20 {strides = array<i32>} : memref<2x128xf32, #tpu.memory_space<vmem>>, vector<2x128xf32>,
    } else {
    }
    return
  }
  func.func @transform_0(%arg0: i32) -> (i32, i32) {
    %c0_i32 = arith.constant 0 : i32
    %c0_i32_0 = arith.constant 0 : i32
    return %c0_i32, %arg0 : i32, i32
  }
  func.func @transform_1(%arg0: i32) -> (i32, i32) {
    %c0_i32 = arith.constant 0 : i32
    %c0_i32_0 = arith.constant 0 : i32
    return %arg0, %c0_i32 : i32, i32
  }
  func.func @transform_2(%arg0: i32) -> (i32, i32) {
    %c0_i32 = arith.constant 0 : i32
    %c0_i32_0 = arith.constant 0 : i32
    %c0_i32_1 = arith.constant 0 : i32
    return %c0_i32, %c0_i32_0 : i32, i32
  }
  func.func @transform_3(%arg0: i32) -> (i32, i32) {
    %c0_i32 = arith.constant 0 : i32
    %c0_i32_0 = arith.constant 0 : i32
    %c0_i32_1 = arith.constant 0 : i32
    return %c0_i32, %c0_i32_0 : i32, i32
  }
  func.func @transform_4(%arg0: i32) -> (i32, i32) {
    %c0_i32 = arith.constant 0 : i32
    %c0_i32_0 = arith.constant 0 : i32
    %c0_i32_1 = arith.constant 0 : i32
    return %c0_i32, %c0_i32_0 : i32, i32
  }
  func.func @transform_5(%arg0: i32) -> (i32, i32) {
    %c0_i32 = arith.constant 0 : i32
    %c0_i32_0 = arith.constant 0 : i32
    %c0_i32_1 = arith.constant 0 : i32
    return %c0_i32, %c0_i32_0 : i32, i32
  }
}

</mosaic_0001>

<bundles_post_ra>
// kernel: net_forward.1
= control target key start
LH: loop header
LB: loop body
LE: loop exit
PB: predicated region body
PF: predicated region fallthrough
CT: control target
= control target key end

     0   :  { %10 = vsyncpa [#allocation4], 0  ;;  %s10659_s0 = inlined_call_operand.vmem [shape: f32[2,19200], index: 0, kind: input, shape index: {}]   ;;  %s10660_s1 = inlined_call_operand.hbm [shape: bf16[19200,128], index: 1, kind: input, shape index: {}]   ;;  %s10661_s2 = inlined_call_operand.hbm [shape: f32[1,128], index: 2, kind: input, shape index: {}]   ;;  %s10662_s3 = inlined_call_operand.hbm [shape: f32[128,128], index: 3, kind: input, shape index: {}]   ;;  %s10663_s4 = inlined_call_operand.hbm [shape: f32[1,128], index: 4, kind: input, shape index: {}]   ;;  %s10664_s5 = inlined_call_operand.hbm [shape: f32[2,128], index: 5, kind: output, shape index: {}]  }
   0x1   :  { %12 = vsyncpa [#allocation4 + $0x1], 0 }
   0x2   :  { %13 = vsyncpa [#allocation7], 0 }
   0x3   :  { %14 = vsyncpa [#allocation10], 0 }
   0x4   :  { %15 = vsyncpa [#allocation5], 0  ;;  %s9783_s18 = smov 0   ;;  %s9785_s19 = smov 0  }
   0x5   :  { %s9787_s20 = smov 0   ;;  %s9789_s21 = smov 0  }
   0x6 LB: > { %s9802_s22 = sadd.s32 4294967295, %s9737_s21   ;;  %p67_p0 = scmp.ne.s32.totalorder %s9729_s19, %s9725_s18  ;;  %s9737_s21 = sphi %s9789_s21, %s10682_s21   ;;  %s9733_s20 = sphi %s9787_s20, %s10681_s20   ;;  %s9729_s19 = sphi %s9785_s19, %s10680_s19   ;;  %s9725_s18 = sphi %s9783_s18, %s10679_s18  }
   0x7   : > { %p10665_p1 = scmp.eq.s32.totalorder %s9802_s22, 0  ;;  %p7339_p2 = scmp.ge.s32.totalorder %s9737_s21, 1 }
   0x8   : > { %p162_p3 = scmp.lt.s32.totalorder %s9737_s21, 3  ;;  %s9739_s25 = smov [#allocation6]  }
   0x9   : > { %p9811_p5 = por %p10665_p1, %p67_p0  ;;  %s175_s26 = sshll.u32 %s9739_s25, 4  ;;  %s176_s26 = int_to_ptr.vmem [resolvable:$true] %s175_s26 }
   0xa   : > { %p9815_p6 = pnand %p7339_p2, %p162_p3  ;;  %s9740_s27 = smov [#allocation8]  }
   0xb   : > { %s10668_s23 = scalar_select %p9811_p5, 1, 0 }
   0xc   : > { %s10669_s24 = scalar_select %p9815_p6, 1, 0 }
   0xd   : > { %p8874_p7 = pneg %p9815_p6  ;;  %s185_s28 = sshll.u32 %s9740_s27, 4  ;;  %s9827_s28 = int_to_ptr.vmem [resolvable:$true] %s185_s28 }
   0xe   : > { %s9741_s30 = smov [#allocation9]   ;;  %s9572_s7 = scalar_lea.vmem %s176_s26, 16 }
   0xf   : > { %p9823_p8 = pnand %p8874_p7, %p10665_p1  ;;  %s199_s6 = sshll.u32 %s9741_s30, 4  ;;  %s200_s6 = int_to_ptr.vmem [resolvable:$true] %s199_s6 }
  0x10   : > { %p9573_p10 = scmp.ne.s32.totalorder %s176_s26, %s9572_s7  ;;  %s9579_s8 = scalar_lea.vmem %s176_s26, 32 }
  0x11   : > { %p9563_p9 = pneg %p9823_p8  ;;  %p9580_p13 = scmp.lt.s32.totalorder %s176_s26, %s176_s26 }
  0x12   : > { %p9581_p0 = scmp.lt.s32.totalorder %s9579_s8, %s9572_s7 }
  0x13   : > { %p9575_p11 = pnand %p9573_p10, %p9563_p9 }
  0x14   : > { %p9582_p2 = por %p9581_p0, %p9580_p13 }
  0x15   : > { %p9576_p12 = pneg %p9575_p11 }
  0x17   : > { %p9583_p3 = pnand %p9582_p2, %p9576_p12 }
  0x19   : > { %9586 = shalt.err (!%p9583_p3)
}
  0x1a   : > { %8877 = dma.hbm_to_vmem [thread:$0]  (!%p9823_p8), %s10661_s2, 16, %s176_s26, [#allocation7]  }
  0x1b   : > { %s9598_s11 = scalar_lea.vmem %s9827_s28, 2048  ;;  %p9606_p13 = scmp.lt.s32.totalorder %s9827_s28, %s9827_s28 }
  0x1c   : > { %p9599_p7 = scmp.ne.s32.totalorder %s9827_s28, %s9598_s11  ;;  %p9607_p12 = scmp.lt.s32.totalorder %s9598_s11, %s9598_s11 }
  0x1e   : > { %p9601_p10 = pnand %p9599_p7, %p9563_p9  ;;  %p9608_p0 = por %p9607_p12, %p9606_p13 }
  0x20   : > { %p9602_p11 = pneg %p9601_p10 }
  0x22   : > { %p9609_p2 = pnand %p9608_p0, %p9602_p11 }
  0x24   : > { %9612 = shalt.err (!%p9609_p2)
}
  0x25   : > { %s9742_s12 = smov 128   ;;  %s9743_s13 = smov 8  }
  0x26   : > { %8880 = dma.hbm_to_vmem [thread:$0]  (!%p9823_p8), %s10662_s3, 2048, %s9827_s28, [#allocation7], %s9742_s12, %s9742_s12, %s9743_s13  }
  0x27   : > { %s9624_s16 = scalar_lea.vmem %s200_s6, 16  ;;  %s9631_s17 = scalar_lea.vmem %s200_s6, 32 }
  0x28   : > { %p9625_p3 = scmp.ne.s32.totalorder %s200_s6, %s9624_s16  ;;  %p9632_p11 = scmp.lt.s32.totalorder %s200_s6, %s200_s6 }
  0x29   : > { %p9633_p13 = scmp.lt.s32.totalorder %s9631_s17, %s9624_s16 }
  0x2a   : > { %p9627_p7 = pnand %p9625_p3, %p9563_p9 }
  0x2b   : > { %p9634_p12 = por %p9633_p13, %p9632_p11 }
  0x2c   : > { %p9628_p10 = pneg %p9627_p7 }
  0x2e   : > { %p9635_p0 = pnand %p9634_p12, %p9628_p10 }
  0x30   : > { %9638 = shalt.err (!%p9635_p0)
}
  0x31   : > { %8883 = dma.hbm_to_vmem [thread:$0]  (!%p9823_p8), %s10663_s4, 16, %s200_s6, [#allocation10]  }
  0x32   : > { %s9861_s26 = sadd.s32 1, %s9737_s21   ;;  %s54_s28 = sadd.s32 1, %s9733_s20 }
  0x33   : > { %s51_s27 = ssub.s32 %s9737_s21, %s9861_s26  ;;  %p61_p2 = scmp.ne.s32.totalorder %s9733_s20, %s9729_s19 }
  0x34   : > { %p52_p9 = scmp.eq.s32.totalorder %s51_s27, 0  ;;  %p62_p3 = scmp.eq.s32.totalorder %s9737_s21, 0 }
  0x35   : > { %p8891_p7 = scmp.lt.s32.totalorder %s9737_s21, 2  ;;  %s219_s30 = sand.u32 1, %s9733_s20  }
  0x36   : > { %s9871_s29 = scalar_select %p52_p9, %s9733_s20, %s54_s28  }
  0x37   : > { %p63_p10 = por %p62_p3, %p61_p2  ;;  %s8854_s7 = smul.u32 4800, %s219_s30 }
  0x38   : > { %s7958_s8 = smul.u32 76800, %s9737_s21  ;;  %s9886_s14 = scalar_lea.sflag [#allocation4], %s219_s30 }
  0x39   : > { %p9875_p11 = pnand %p8891_p7, %p63_p10  ;;  %s223_s12 = scalar_lea.vmem [#allocation3], %s8854_s7 }
  0x3a   : > { %s9882_s11 = scalar_lea.hbm %s10660_s1, %s7958_s8  ;;  %s230_s13 = sshll.u32 %s223_s12, 4  ;;  %s9884_s13 = int_to_ptr.vmem [resolvable:$true] %s230_s13 }
  0x3b   : > { %s9639_s21 = scalar_lea.hbm %s9882_s11, 76800  ;;  %p9641_p13 = pneg %p9875_p11 }
  0x3c   : > { %p9640_p8 = scmp.ne.s32.totalorder %s9882_s11, %s9639_s21  ;;  %s9644_s17 = scalar_lea.hbm %s10660_s1, 153600 }
  0x3d   : > { %p9645_p9 = scmp.lt.s32.totalorder %s9882_s11, %s10660_s1  ;;  %p9646_p2 = scmp.lt.s32.totalorder %s9644_s17, %s9639_s21 }
  0x3e   : > { %p9642_p12 = pnand %p9641_p13, %p9640_p8 }
  0x3f   : > { %p9647_p3 = por %p9646_p2, %p9645_p9 }
  0x40   : > { %p9643_p0 = pneg %p9642_p12 }
  0x42   : > { %p9648_p7 = pnand %p9647_p3, %p9643_p0 }
  0x44   : > { %9651 = shalt.err (!%p9648_p7)
}
  0x45   : > { %s9652_s27 = scalar_lea.vmem %s9884_s13, 76800  ;;  %s9744_s28 = smov [#allocation3]  }
  0x46   : > { %p9653_p10 = scmp.ne.s32.totalorder %s9884_s13, %s9652_s27  ;;  %s9657_s30 = sshll.u32 %s9744_s28, 4  ;;  %s9658_s30 = int_to_ptr.vmem [resolvable:$false] %s9657_s30 }
  0x47   : > { %s9659_s7 = scalar_lea.vmem %s9658_s30, 153600  ;;  %p9660_p12 = scmp.lt.s32.totalorder %s9884_s13, %s9658_s30 }
  0x48   : > { %p9655_p4 = pnand %p9653_p10, %p9641_p13  ;;  %p9661_p1 = scmp.lt.s32.totalorder %s9659_s7, %s9652_s27 }
  0x4a   : > { %p9656_p8 = pneg %p9655_p4  ;;  %p9662_p5 = por %p9661_p1, %p9660_p12 }
  0x4c   : > { %p9663_p6 = pnand %p9662_p5, %p9656_p8 }
  0x4e   : > { %9666 = shalt.err (!%p9663_p6)
}
  0x4f   : > { %s9745_s8 = smov 64   ;;  %s9746_s6 = smov 4  }
  0x50   : > { %8887 = dma.hbm_to_vmem [thread:$0]  (!%p9875_p11), %s9882_s11, 76800, %s9884_s13, %s9886_s14, %s9745_s8, %s9745_s8, %s9746_s6  }
  0x51   : > { %p10672_p13 = scmp.ne.s32.totalorder %s10669_s24, 0 }
  0x52   : > { %s244_s10 = sand.u32 (!%p10672_p13), 1, %s9729_s19   ;;  %p10673_p1 = scmp.ne.s32.totalorder (!%p10672_p13), %s10668_s23, 0 }
  0x53   : > { %242 = sbr.rel (%p10672_p13) target bundleno = 1162 (0x48a), region = 40  ;;  %s245_s21 = scalar_lea.sflag (!%p10672_p13), [#allocation4], %s244_s10 }
  0x54   : > { %s8855_s12 = smul.u32 (!%p10672_p13), 4800, %s244_s10 }
  0x56   : > { %s9910_s15 = scalar_lea.vmem (!%p10672_p13), [#allocation3], %s8855_s12 }
  0x58   : > { %9708 = dma.done.wait (%p10673_p1), %s245_s21, 76800  }
  0x59   : > { %9710 = vsyncadd (%p10673_p1), %s245_s21, 4294890496  ;;  %p10674_p4 = scmp.eq.s32.totalorder %s9802_s22, 0 }
  0x5b   : > { %9712 = dma.done.wait (%p10674_p4), [#allocation7], 2064   ;;  %p10675_p5 = pmov %p10674_p4 }
  0x5c   : > { %p10676_p6 = pmov %p10674_p4 }
  0x5d   : > { %9714 = vsyncadd (%p10675_p5), [#allocation7], 4294965232 }
  0x5e   : > { %9716 = dma.done.wait (%p10676_p6), [#allocation10], 16   ;;  %p10677_p11 = pmov %p10674_p4 }
  0x5f   : > { %s287_s24 = smul.u32 75, %s9802_s22  ;;  %p10678_p9 = scmp.ne.s32.totalorder %s9802_s22, 0 }
  0x60   : > { %9718 = vsyncadd (%p10677_p11), [#allocation10], 4294967280 }
  0x61   : > { %p288_p0 = scmp.lt.s32.totalorder %s287_s24, 149  ;;  %298 = sbr.rel (%p10678_p9) target bundleno = 104 (0x68), region = 60 }
  0x63   : > { %s10684_s24 = smov (!%p288_p0, %s287_s24), 149 }
  0x64   : > { %s7349_s9 = sshll.u32 %s10684_s24, 1 }
  0x65   : > { %s9928_s13 = scalar_lea.vmem %s10659_s0, %s7349_s9 }
  0x66   : > { %v7351_v0 = vld [vmem:[#allocation6] ss:$0 sm:$0xff] }
  0x67   : > { %306 = vst [vmem:[#allocation2] sm:$0x3] %v7351_v0 }
  0x68 PF: > { %v8942_v1 = vld [vmem:[%s9910_s15 + $0x78] sm:$0xff]   ;;  %v8946_v5 = vld [vmem:[%s9910_s15 + $0x70] sm:$0xff]   ;;  %v8950_v9 = vld [vmem:[%s9910_s15 + $0x68] sm:$0xff]   ;;  %v350_v29 = vlaneseq  ;;  %v9747_v37 = vmov 1983009808   ;;  %vm9749_vm0 = vmmov 0  }
  0x69   : > { %v8943_v2 = vld [vmem:[%s9910_s15 + $0xf8] sm:$0xff]   ;;  %7959 = vmatprep.subr.bf16.mxu0 %v8942_v1  ;;  %v8947_v6 = vld [vmem:[%s9910_s15 + $0xf0] sm:$0xff]   ;;  %v8951_v10 = vld [vmem:[%s9910_s15 + $0xe8] sm:$0xff]   ;;  %v348_v38 = vunpack.c.l.s4 %v9747_v37  ;;  %p7952_p2 = scmp.ne.s32.totalorder %s9802_s22, 1 }
  0x6a   : > { %v8944_v3 = vld [vmem:[%s9910_s15 + $0x38] sm:$0xff]   ;;  %7981 = vmatprep.subr.bf16.mxu1 %v8943_v2  ;;  %v8948_v7 = vld [vmem:[%s9910_s15 + $0x30] sm:$0xff]   ;;  %v8952_v11 = vld [vmem:[%s9910_s15 + $0x28] sm:$0xff]   ;;  %v351_v34 = vshrl.u32 %v350_v29, 7 }
  0x6b   : > { %v8945_v4 = vld [vmem:[%s9910_s15 + $0xb8] sm:$0xff]   ;;  %7960 = vmatpush3.bf16.msra.mxu0 %v8944_v3  ;;  %v8949_v8 = vld [vmem:[%s9910_s15 + $0xb0] sm:$0xff]   ;;  %v8953_v12 = vld [vmem:[%s9910_s15 + $0xa8] sm:$0xff]   ;;  %v349_v40 = vunpack.c.0.s8 %v348_v38 }
  0x6c   : > { %7982 = vmatpush3.bf16.msra.mxu1 %v8945_v4  ;;  %7961 = vmatprep.subr.bf16.mxu0 %v8946_v5  ;;  %v8954_v13 = vld [vmem:[%s9910_s15 + $0x60] sm:$0xff]   ;;  %v8958_v17 = vld [vmem:[%s9910_s15 + $0x58] sm:$0xff]   ;;  %v8962_v21 = vld [vmem:[%s9910_s15 + $0x50] sm:$0xff]  }
  0x6d   : > { %7983 = vmatprep.subr.bf16.mxu1 %v8947_v6  ;;  %v8955_v14 = vld [vmem:[%s9910_s15 + $0xe0] sm:$0xff]   ;;  %v8959_v18 = vld [vmem:[%s9910_s15 + $0xd8] sm:$0xff]   ;;  %v8963_v22 = vld [vmem:[%s9910_s15 + $0xd0] sm:$0xff]   ;;  %v9967_v42 = vsub.s32 %v349_v40, %v351_v34 }
  0x6e   : > { %v8956_v15 = vld [vmem:[%s9910_s15 + $0x20] sm:$0xff]   ;;  %v8960_v19 = vld [vmem:[%s9910_s15 + $0x18] sm:$0xff]   ;;  %v8964_v23 = vld [vmem:[%s9910_s15 + $0x10] sm:$0xff]  }
  0x6f   : > { %7962 = vmatpush3.bf16.msra.mxu0 %v8948_v7  ;;  %v8957_v16 = vld [vmem:[%s9910_s15 + $0xa0] sm:$0xff]   ;;  %v8961_v20 = vld [vmem:[%s9910_s15 + $0x98] sm:$0xff]   ;;  %v8965_v24 = vld [vmem:[%s9910_s15 + $0x90] sm:$0xff]  }
  0x70   : > { %7984 = vmatpush3.bf16.msra.mxu1 %v8949_v8  ;;  %7963 = vmatprep.subr.bf16.mxu0 %v8950_v9  ;;  %v8966_v25 = vld [vmem:[%s9910_s15 + $0x48] sm:$0xff]   ;;  %v8970_v30 = vld [vmem:[%s9910_s15 + $0x40] sm:$0xff]   ;;  %v8975_v36 = vld [vmem:[%s9910_s15 + $0x178] sm:$0xff]  }
  0x71   : > { %7985 = vmatprep.subr.bf16.mxu1 %v8951_v10  ;;  %v8967_v26 = vld [vmem:[%s9910_s15 + $0xc8] sm:$0xff]   ;;  %v8971_v31 = vld [vmem:[%s9910_s15 + $0xc0] sm:$0xff]   ;;  %v8976_v39 = vld [vmem:[%s9910_s15 + $0x1f8] sm:$0xff]  }
  0x72   : > { %v8968_v27 = vld [vmem:[%s9910_s15 + $0x8] sm:$0xff]   ;;  %v8972_v32 = vld [vmem:[%s9910_s15] sm:$0xff]   ;;  %v8977_v47 = vld [vmem:[%s9910_s15 + $0x138] sm:$0xff]  }
  0x73   : > { %7964 = vmatpush3.bf16.msra.mxu0 %v8952_v11  ;;  %v8969_v28 = vld [vmem:[%s9910_s15 + $0x88] sm:$0xff]   ;;  %v8973_v33 = vld [vmem:[%s9910_s15 + $0x80] sm:$0xff]   ;;  %v8978_v50 = vld [vmem:[%s9910_s15 + $0x1b8] sm:$0xff]  }
  0x74   : > { %7986 = vmatpush3.bf16.msra.mxu1 %v8953_v12  ;;  %7965 = vmatprep.subr.bf16.mxu0 %v8954_v13  ;;  %v308_v35 = vld [vmem:[%s9928_s13] sm:$0xff]  ;;  %v8979_v53 = vld [vmem:[%s9910_s15 + $0x170] sm:$0xff]   ;;  %v8983_v57 = vld [vmem:[%s9910_s15 + $0x168] sm:$0xff]  }
  0x75   : > { %7987 = vmatprep.subr.bf16.mxu1 %v8955_v14  ;;  %v346_v41 = vcombine.high %v308_v35, %v308_v35  ;;  %v353_v43 = vrot.slane %v308_v35, %v9967_v42  ;;  %v8980_v54 = vld [vmem:[%s9910_s15 + $0x1f0] sm:$0xff]   ;;  %v8984_v58 = vld [vmem:[%s9910_s15 + $0x1e8] sm:$0xff]   ;;  %v8987_v61 = vld [vmem:[%s9910_s15 + $0x160] sm:$0xff]  }
  0x76   : > { %v8981_v55 = vld [vmem:[%s9910_s15 + $0x130] sm:$0xff]   ;;  %v8985_v59 = vld [vmem:[%s9910_s15 + $0x128] sm:$0xff]   ;;  %v8988_v62 = vld [vmem:[%s9910_s15 + $0x1e0] sm:$0xff]  }
  0x77   : > { %7966 = vmatpush3.bf16.msra.mxu0 %v8956_v15  ;;  %v360_v44 = vrot.slane %v346_v41, %v9967_v42  ;;  %v361_v45 = vcombine.high %v353_v43, %v353_v43  ;;  %v743_v48 = vpack.c.bf16 %v353_v43, %v353_v43  ;;  %v8982_v56 = vld [vmem:[%s9910_s15 + $0x1b0] sm:$0xff]   ;;  %v8986_v60 = vld [vmem:[%s9910_s15 + $0x1a8] sm:$0xff]   ;;  %v8989_v63 = vld [vmem:[%s9910_s15 + $0x120] sm:$0xff]  }
  0x78   : > { %7988 = vmatpush3.bf16.msra.mxu1 %v8957_v16  ;;  %7967 = vmatprep.subr.bf16.mxu0 %v8958_v17  ;;  %v8990_v0 = vld [vmem:[%s9910_s15 + $0x1a0] sm:$0xff]   ;;  %v8991_v1 = vld [vmem:[%s9910_s15 + $0x158] sm:$0xff]   ;;  %v8995_v5 = vld [vmem:[%s9910_s15 + $0x150] sm:$0xff]  }
  0x79   : > { %7989 = vmatprep.subr.bf16.mxu1 %v8959_v18  ;;  %v362_v46 = vcombine.high %v360_v44, %v360_v44  ;;  %v745_v49 = vpack.c.bf16 %v360_v44, %v360_v44  ;;  %v744_v51 = vpack.c.bf16 %v361_v45, %v361_v45  ;;  %v8992_v2 = vld [vmem:[%s9910_s15 + $0x1d8] sm:$0xff]   ;;  %v8996_v6 = vld [vmem:[%s9910_s15 + $0x1d0] sm:$0xff]   ;;  %v8999_v9 = vld [vmem:[%s9910_s15 + $0x148] sm:$0xff]  }
  0x7a   : > { %v8993_v3 = vld [vmem:[%s9910_s15 + $0x118] sm:$0xff]   ;;  %v8997_v7 = vld [vmem:[%s9910_s15 + $0x110] sm:$0xff]   ;;  %v9000_v10 = vld [vmem:[%s9910_s15 + $0x1c8] sm:$0xff]  }
  0x7b   : > { %7968 = vmatpush3.bf16.msra.mxu0 %v8960_v19  ;;  %v746_v52 = vpack.c.bf16 %v362_v46, %v362_v46  ;;  %5650 = vmatprep.mubr.bf16.mxu0 %v744_v51  ;;  %v8994_v4 = vld [vmem:[%s9910_s15 + $0x198] sm:$0xff]   ;;  %v8998_v8 = vld [vmem:[%s9910_s15 + $0x190] sm:$0xff]   ;;  %v309_v11 = vld [vmem:[%s9928_s13 + $0x8] sm:$0xff] }
  0x7c   : > { %7990 = vmatpush3.bf16.msra.mxu1 %v8961_v20  ;;  %7969 = vmatprep.subr.bf16.mxu0 %v8962_v21  ;;  %v9001_v12 = vld [vmem:[%s9910_s15 + $0x108] sm:$0xff]   ;;  %v370_v13 = vrot.slane %v309_v11, %v9967_v42  ;;  %v363_v14 = vcombine.high %v309_v11, %v309_v11  ;;  %v9003_v16 = vld [vmem:[%s9910_s15 + $0x140] sm:$0xff]   ;;  %v9015_v34 = vld [vmem:[%s9910_s15 + $0x2b0] sm:$0xff]  }
  0x7d   : > { %7991 = vmatprep.subr.bf16.mxu1 %v8963_v22  ;;  %5690 = vmatprep.mubr.bf16.mxu1 %v746_v52  ;;  %v9002_v15 = vld [vmem:[%s9910_s15 + $0x188] sm:$0xff]   ;;  %v9004_v19 = vld [vmem:[%s9910_s15 + $0x1c0] sm:$0xff]   ;;  %v9024_v44 = vld [vmem:[%s9910_s15 + $0x258] sm:$0xff]  }
  0x7e   : > { %v378_v17 = vcombine.high %v370_v13, %v370_v13  ;;  %v377_v18 = vrot.slane %v363_v14, %v9967_v42  ;;  %v9005_v20 = vld [vmem:[%s9910_s15 + $0x100] sm:$0xff]   ;;  %v9016_v35 = vld [vmem:[%s9910_s15 + $0x268] sm:$0xff]   ;;  %v9025_v45 = vld [vmem:[%s9910_s15 + $0x2d8] sm:$0xff]  }
  0x7f   : > { %7970 = vmatpush3.bf16.msra.mxu0 %v8964_v23  ;;  %v9006_v23 = vld [vmem:[%s9910_s15 + $0x180] sm:$0xff]   ;;  %v9018_v37 = vld [vmem:[%s9910_s15 + $0x228] sm:$0xff]   ;;  %v9026_v46 = vld [vmem:[%s9910_s15 + $0x218] sm:$0xff]  }
  0x80   : > { %7992 = vmatpush3.bf16.msra.mxu1 %v8965_v24  ;;  %7971 = vmatprep.subr.bf16.mxu0 %v8966_v25  ;;  %v748_v21 = vpack.c.bf16 %v378_v17, %v378_v17  ;;  %v379_v22 = vcombine.high %v377_v18, %v377_v18  ;;  %v9008_v25 = vld [vmem:[%s9910_s15 + $0x278] sm:$0xff]   ;;  %v749_v29 = vpack.c.bf16 %v377_v18, %v377_v18  ;;  %v9019_v38 = vld [vmem:[%s9910_s15 + $0x2a8] sm:$0xff]   ;;  %v9021_v40 = vld [vmem:[%s9910_s15 + $0x2e0] sm:$0xff]  }
  0x81   : > { %7993 = vmatprep.subr.bf16.mxu1 %v8967_v26  ;;  %v9009_v26 = vld [vmem:[%s9910_s15 + $0x2f8] sm:$0xff]   ;;  %v9022_v41 = vld [vmem:[%s9910_s15 + $0x220] sm:$0xff]   ;;  %v9031_v51 = vld [vmem:[%s9910_s15 + $0x290] sm:$0xff]  }
  0x82   : > { %v750_v24 = vpack.c.bf16 %v379_v22, %v379_v22  ;;  %v9023_v43 = vld [vmem:[%s9910_s15 + $0x2a0] sm:$0xff]   ;;  %v9032_v52 = vld [vmem:[%s9910_s15 + $0x248] sm:$0xff]   ;;  %v9046_v11 = vld [vmem:[%s9910_s15 + $0x3f0] sm:$0xff]  }
  0x83   : > { %7972 = vmatpush3.bf16.msra.mxu0 %v8968_v27  ;;  %v9010_v27 = vld [vmem:[%s9910_s15 + $0x238] sm:$0xff]   ;;  %v9049_v14 = vld [vmem:[%s9910_s15 + $0x368] sm:$0xff]   ;;  %v9053_v18 = vld [vmem:[%s9910_s15 + $0x360] sm:$0xff]  }
  0x84   : > { %7994 = vmatpush3.bf16.msra.mxu1 %v8969_v28  ;;  %7973 = vmatprep.subr.bf16.mxu0 %v8970_v30  ;;  %v747_v28 = vpack.c.bf16 %v370_v13, %v370_v13  ;;  %v9011_v30 = vld [vmem:[%s9910_s15 + $0x2b8] sm:$0xff]   ;;  %v9048_v13 = vld [vmem:[%s9910_s15 + $0x3b0] sm:$0xff]   ;;  %v9052_v17 = vld [vmem:[%s9910_s15 + $0x3a8] sm:$0xff]  }
  0x85   : > { %7995 = vmatprep.subr.bf16.mxu1 %v8971_v31  ;;  %v9012_v31 = vld [vmem:[%s9910_s15 + $0x270] sm:$0xff]   ;;  %v9057_v22 = vld [vmem:[%s9910_s15 + $0x358] sm:$0xff]  }
  0x87   : > { %7974 = vmatpush3.bf16.msra.mxu0 %v8972_v32  ;;  %v9013_v32 = vld [vmem:[%s9910_s15 + $0x2f0] sm:$0xff]  }
  0x88   : > { %7996 = vmatpush3.bf16.msra.mxu1 %v8973_v33  ;;  %8003 = vmatprep.subr.bf16.mxu0 %v8975_v36  ;;  %v9014_v33 = vld [vmem:[%s9910_s15 + $0x230] sm:$0xff]   ;;  %v9017_v36 = vld [vmem:[%s9910_s15 + $0x2e8] sm:$0xff]  }
  0x89   : > { %8025 = vmatprep.subr.bf16.mxu1 %v8976_v39  ;;  %v9020_v39 = vld [vmem:[%s9910_s15 + $0x260] sm:$0xff]  }
  0x8a   : > { %5651 = vmatmul.mubr.bf16.vlgmr.msra.gmra.mxu0 %v743_v48  ;;  %v9028_v48 = vld [vmem:[%s9910_s15 + $0x250] sm:$0xff]  }
  0x8b   : > { %5691 = vmatmul.mubr.bf16.vlgmr.msra.gmra.mxu1 %v745_v49  ;;  %8004 = vmatpush3.bf16.msra.mxu0 %v8977_v47  ;;  %v9027_v47 = vld [vmem:[%s9910_s15 + $0x298] sm:$0xff]   ;;  %v9029_v49 = vld [vmem:[%s9910_s15 + $0x2d0] sm:$0xff]  }
  0x8c   : > { %8026 = vmatpush3.bf16.msra.mxu1 %v8978_v50  ;;  %8005 = vmatprep.subr.bf16.mxu0 %v8979_v53  ;;  %v9030_v50 = vld [vmem:[%s9910_s15 + $0x210] sm:$0xff]   ;;  %v9033_v53 = vld [vmem:[%s9910_s15 + $0x2c8] sm:$0xff]  }
  0x8d   : > { %8027 = vmatprep.subr.bf16.mxu1 %v8980_v54  ;;  %5730 = vmatprep.mubr.bf16.mxu0 %v748_v21  ;;  %v310_v54 = vld [vmem:[%s9928_s13 + $0x10] sm:$0xff]  ;;  %v9056_v21 = vld [vmem:[%s9910_s15 + $0x3a0] sm:$0xff]  }
  0x8e   : > { %5770 = vmatprep.mubr.bf16.mxu1 %v750_v24  ;;  %v9059_v24 = vld [vmem:[%s9910_s15 + $0x318] sm:$0xff]  }
  0x8f   : > { %8006 = vmatpush3.bf16.msra.mxu0 %v8981_v55  ;;  %v9034_v55 = vld [vmem:[%s9910_s15 + $0x208] sm:$0xff]  }
  0x90   : > { %8028 = vmatpush3.bf16.msra.mxu1 %v8982_v56  ;;  %8007 = vmatprep.subr.bf16.mxu0 %v8983_v57  ;;  %v387_v56 = vrot.slane %v310_v54, %v9967_v42  ;;  %v380_v57 = vcombine.high %v310_v54, %v310_v54  ;;  %v9079_v54 = vld [vmem:[%s9910_s15 + $0x4f0] sm:$0xff]  }
  0x91   : > { %8029 = vmatprep.subr.bf16.mxu1 %v8984_v58  ;;  %v9035_v58 = vld [vmem:[%s9910_s15 + $0x288] sm:$0xff]  }
  0x93   : > { %8008 = vmatpush3.bf16.msra.mxu0 %v8985_v59  ;;  %v9036_v59 = vld [vmem:[%s9910_s15 + $0x240] sm:$0xff]  }
  0x94   : > { %8030 = vmatpush3.bf16.msra.mxu1 %v8986_v60  ;;  %8009 = vmatprep.subr.bf16.mxu0 %v8987_v61  ;;  %v395_v60 = vcombine.high %v387_v56, %v387_v56  ;;  %v394_v61 = vrot.slane %v380_v57, %v9967_v42  ;;  %v9082_v57 = vld [vmem:[%s9910_s15 + $0x468] sm:$0xff]  }
  0x95   : > { %8031 = vmatprep.subr.bf16.mxu1 %v8988_v62  ;;  %v9037_v62 = vld [vmem:[%s9910_s15 + $0x2c0] sm:$0xff]  }
  0x97   : > { %8010 = vmatpush3.bf16.msra.mxu0 %v8989_v63  ;;  %v9038_v63 = vld [vmem:[%s9910_s15 + $0x200] sm:$0xff]  }
  0x98   : > { %8032 = vmatpush3.bf16.msra.mxu1 %v8990_v0  ;;  %8011 = vmatprep.subr.bf16.mxu0 %v8991_v1  ;;  %v752_v0 = vpack.c.bf16 %v395_v60, %v395_v60  ;;  %v396_v1 = vcombine.high %v394_v61, %v394_v61  ;;  %v9085_v60 = vld [vmem:[%s9910_s15 + $0x4a8] sm:$0xff]  }
  0x99   : > { %8033 = vmatprep.subr.bf16.mxu1 %v8992_v2  ;;  %v9039_v2 = vld [vmem:[%s9910_s15 + $0x280] sm:$0xff]  }
  0x9b   : > { %8012 = vmatpush3.bf16.msra.mxu0 %v8993_v3  ;;  %v754_v3 = vpack.c.bf16 %v396_v1, %v396_v1  ;;  %v9090_v1 = vld [vmem:[%s9910_s15 + $0x458] sm:$0xff]  }
  0x9c   : > { %8034 = vmatpush3.bf16.msra.mxu1 %v8994_v4  ;;  %8013 = vmatprep.subr.bf16.mxu0 %v8995_v5  ;;  %v9041_v4 = vld [vmem:[%s9910_s15 + $0x378] sm:$0xff]  }
  0x9d   : > { %8035 = vmatprep.subr.bf16.mxu1 %v8996_v6  ;;  %v9042_v5 = vld [vmem:[%s9910_s15 + $0x3f8] sm:$0xff]  }
  0x9e   : > { %v9043_v6 = vld [vmem:[%s9910_s15 + $0x338] sm:$0xff]  }
  0x9f   : > { %8014 = vmatpush3.bf16.msra.mxu0 %v8997_v7  ;;  %v751_v7 = vpack.c.bf16 %v387_v56, %v387_v56  ;;  %v9081_v56 = vld [vmem:[%s9910_s15 + $0x4b0] sm:$0xff]  }
  0xa0   : > { %8036 = vmatpush3.bf16.msra.mxu1 %v8998_v8  ;;  %8015 = vmatprep.subr.bf16.mxu0 %v8999_v9  ;;  %v753_v8 = vpack.c.bf16 %v394_v61, %v394_v61  ;;  %v9044_v9 = vld [vmem:[%s9910_s15 + $0x3b8] sm:$0xff]   ;;  %v9086_v61 = vld [vmem:[%s9910_s15 + $0x460] sm:$0xff]  }
  0xa1   : > { %8037 = vmatprep.subr.bf16.mxu1 %v9000_v10  ;;  %v9045_v10 = vld [vmem:[%s9910_s15 + $0x370] sm:$0xff]  }
  0xa3   : > { %8016 = vmatpush3.bf16.msra.mxu0 %v9001_v12  ;;  %v9047_v12 = vld [vmem:[%s9910_s15 + $0x330] sm:$0xff]  }
  0xa4   : > { %8038 = vmatpush3.bf16.msra.mxu1 %v9002_v15  ;;  %8017 = vmatprep.subr.bf16.mxu0 %v9003_v16  ;;  %v9050_v15 = vld [vmem:[%s9910_s15 + $0x3e8] sm:$0xff]  }
  0xa5   : > { %8039 = vmatprep.subr.bf16.mxu1 %v9004_v19  ;;  %v9051_v16 = vld [vmem:[%s9910_s15 + $0x328] sm:$0xff]   ;;  %v9054_v19 = vld [vmem:[%s9910_s15 + $0x3e0] sm:$0xff]  }
  0xa7   : > { %8018 = vmatpush3.bf16.msra.mxu0 %v9005_v20  ;;  %v9055_v20 = vld [vmem:[%s9910_s15 + $0x320] sm:$0xff]  }
  0xa8   : > { %8040 = vmatpush3.bf16.msra.mxu1 %v9006_v23  ;;  %8047 = vmatprep.subr.bf16.mxu0 %v9008_v25  ;;  %v9058_v23 = vld [vmem:[%s9910_s15 + $0x3d8] sm:$0xff]  }
  0xa9   : > { %8069 = vmatprep.subr.bf16.mxu1 %v9009_v26  ;;  %v9060_v25 = vld [vmem:[%s9910_s15 + $0x398] sm:$0xff]   ;;  %v9061_v26 = vld [vmem:[%s9910_s15 + $0x350] sm:$0xff]  }
  0xaa   : > { %5731 = vmatmul.mubr.bf16.vlgmr.msra.gmra.mxu0 %v747_v28  ;;  %v9063_v28 = vld [vmem:[%s9910_s15 + $0x310] sm:$0xff]  }
  0xab   : > { %5771 = vmatmul.mubr.bf16.vlgmr.msra.gmra.mxu1 %v749_v29  ;;  %8048 = vmatpush3.bf16.msra.mxu0 %v9010_v27  ;;  %v9062_v27 = vld [vmem:[%s9910_s15 + $0x3d0] sm:$0xff]  }
  0xac   : > { %8070 = vmatpush3.bf16.msra.mxu1 %v9011_v30  ;;  %8049 = vmatprep.subr.bf16.mxu0 %v9012_v31  ;;  %v9064_v29 = vld [vmem:[%s9910_s15 + $0x390] sm:$0xff]   ;;  %v9065_v30 = vld [vmem:[%s9910_s15 + $0x348] sm:$0xff]  }
  0xad   : > { %8071 = vmatprep.subr.bf16.mxu1 %v9013_v32  ;;  %5810 = vmatprep.mubr.bf16.mxu0 %v752_v0  ;;  %v9066_v31 = vld [vmem:[%s9910_s15 + $0x3c8] sm:$0xff]   ;;  %v9089_v0 = vld [vmem:[%s9910_s15 + $0x4a0] sm:$0xff]  }
  0xae   : > { %5850 = vmatprep.mubr.bf16.mxu1 %v754_v3  ;;  %v9067_v32 = vld [vmem:[%s9910_s15 + $0x308] sm:$0xff]   ;;  %v9092_v3 = vld [vmem:[%s9910_s15 + $0x418] sm:$0xff]  }
  0xaf   : > { %8050 = vmatpush3.bf16.msra.mxu0 %v9014_v33  ;;  %v311_v33 = vld [vmem:[%s9928_s13 + $0x18] sm:$0xff] }
  0xb0   : > { %8072 = vmatpush3.bf16.msra.mxu1 %v9015_v34  ;;  %8051 = vmatprep.subr.bf16.mxu0 %v9016_v35  ;;  %v9068_v34 = vld [vmem:[%s9910_s15 + $0x388] sm:$0xff]   ;;  %v404_v35 = vrot.slane %v311_v33, %v9967_v42 }
  0xb1   : > { %8073 = vmatprep.subr.bf16.mxu1 %v9017_v36  ;;  %v397_v36 = vcombine.high %v311_v33, %v311_v33  ;;  %v9113_v33 = vld [vmem:[%s9910_s15 + $0x530] sm:$0xff]  }
  0xb3   : > { %8052 = vmatpush3.bf16.msra.mxu0 %v9018_v37  ;;  %v9069_v37 = vld [vmem:[%s9910_s15 + $0x340] sm:$0xff]  }
  0xb4   : > { %8074 = vmatpush3.bf16.msra.mxu1 %v9019_v38  ;;  %8053 = vmatprep.subr.bf16.mxu0 %v9020_v39  ;;  %v9070_v38 = vld [vmem:[%s9910_s15 + $0x3c0] sm:$0xff]   ;;  %v412_v39 = vcombine.high %v404_v35, %v404_v35 }
  0xb5   : > { %8075 = vmatprep.subr.bf16.mxu1 %v9021_v40  ;;  %v411_v40 = vrot.slane %v397_v36, %v9967_v42  ;;  %v9116_v36 = vld [vmem:[%s9910_s15 + $0x5e8] sm:$0xff]  }
  0xb7   : > { %8054 = vmatpush3.bf16.msra.mxu0 %v9022_v41  ;;  %v9071_v41 = vld [vmem:[%s9910_s15 + $0x300] sm:$0xff]  }
  0xb8   : > { %8076 = vmatpush3.bf16.msra.mxu1 %v9023_v43  ;;  %8055 = vmatprep.subr.bf16.mxu0 %v9024_v44  ;;  %v9072_v43 = vld [vmem:[%s9910_s15 + $0x380] sm:$0xff]   ;;  %v756_v44 = vpack.c.bf16 %v412_v39, %v412_v39 }
  0xb9   : > { %8077 = vmatprep.subr.bf16.mxu1 %v9025_v45  ;;  %v413_v45 = vcombine.high %v411_v40, %v411_v40  ;;  %v9119_v39 = vld [vmem:[%s9910_s15 + $0x560] sm:$0xff]  }
  0xbb   : > { %8056 = vmatpush3.bf16.msra.mxu0 %v9026_v46  ;;  %v9074_v46 = vld [vmem:[%s9910_s15 + $0x478] sm:$0xff]  }
  0xbc   : > { %8078 = vmatpush3.bf16.msra.mxu1 %v9027_v47  ;;  %8057 = vmatprep.subr.bf16.mxu0 %v9028_v48  ;;  %v758_v47 = vpack.c.bf16 %v413_v45, %v413_v45  ;;  %v9075_v48 = vld [vmem:[%s9910_s15 + $0x4f8] sm:$0xff]  }
  0xbd   : > { %8079 = vmatprep.subr.bf16.mxu1 %v9029_v49  ;;  %v9076_v49 = vld [vmem:[%s9910_s15 + $0x438] sm:$0xff]  }
  0xbe   : > { %v9124_v45 = vld [vmem:[%s9910_s15 + $0x5d8] sm:$0xff]  }
  0xbf   : > { %8058 = vmatpush3.bf16.msra.mxu0 %v9030_v50  ;;  %v755_v50 = vpack.c.bf16 %v404_v35, %v404_v35  ;;  %v9115_v35 = vld [vmem:[%s9910_s15 + $0x568] sm:$0xff]  }
  0xc0   : > { %8080 = vmatpush3.bf16.msra.mxu1 %v9031_v51  ;;  %8059 = vmatprep.subr.bf16.mxu0 %v9032_v52  ;;  %v757_v51 = vpack.c.bf16 %v411_v40, %v411_v40  ;;  %v9077_v52 = vld [vmem:[%s9910_s15 + $0x4b8] sm:$0xff]   ;;  %v9120_v40 = vld [vmem:[%s9910_s15 + $0x5e0] sm:$0xff]  }
  0xc1   : > { %8081 = vmatprep.subr.bf16.mxu1 %v9033_v53  ;;  %v9078_v53 = vld [vmem:[%s9910_s15 + $0x470] sm:$0xff]  }
  0xc3   : > { %8060 = vmatpush3.bf16.msra.mxu0 %v9034_v55  ;;  %v9080_v55 = vld [vmem:[%s9910_s15 + $0x430] sm:$0xff]  }
  0xc4   : > { %8082 = vmatpush3.bf16.msra.mxu1 %v9035_v58  ;;  %8061 = vmatprep.subr.bf16.mxu0 %v9036_v59  ;;  %v9083_v58 = vld [vmem:[%s9910_s15 + $0x4e8] sm:$0xff]  }
  0xc5   : > { %8083 = vmatprep.subr.bf16.mxu1 %v9037_v62  ;;  %v9084_v59 = vld [vmem:[%s9910_s15 + $0x428] sm:$0xff]   ;;  %v9087_v62 = vld [vmem:[%s9910_s15 + $0x4e0] sm:$0xff]  }
  0xc7   : > { %8062 = vmatpush3.bf16.msra.mxu0 %v9038_v63  ;;  %v9088_v63 = vld [vmem:[%s9910_s15 + $0x420] sm:$0xff]  }
  0xc8   : > { %8084 = vmatpush3.bf16.msra.mxu1 %v9039_v2  ;;  %8091 = vmatprep.subr.bf16.mxu0 %v9041_v4  ;;  %v9091_v2 = vld [vmem:[%s9910_s15 + $0x4d8] sm:$0xff]  }
  0xc9   : > { %8113 = vmatprep.subr.bf16.mxu1 %v9042_v5  ;;  %v9093_v4 = vld [vmem:[%s9910_s15 + $0x498] sm:$0xff]   ;;  %v9094_v5 = vld [vmem:[%s9910_s15 + $0x450] sm:$0xff]  }
  0xca   : > { %5811 = vmatmul.mubr.bf16.vlgmr.msra.gmra.mxu0 %v751_v7  ;;  %v9096_v7 = vld [vmem:[%s9910_s15 + $0x410] sm:$0xff]  }
  0xcb   : > { %5851 = vmatmul.mubr.bf16.vlgmr.msra.gmra.mxu1 %v753_v8  ;;  %8092 = vmatpush3.bf16.msra.mxu0 %v9043_v6  ;;  %v9095_v6 = vld [vmem:[%s9910_s15 + $0x4d0] sm:$0xff]  }
  0xcc   : > { %8114 = vmatpush3.bf16.msra.mxu1 %v9044_v9  ;;  %8093 = vmatprep.subr.bf16.mxu0 %v9045_v10  ;;  %v9097_v8 = vld [vmem:[%s9910_s15 + $0x490] sm:$0xff]   ;;  %v9098_v9 = vld [vmem:[%s9910_s15 + $0x448] sm:$0xff]  }
  0xcd   : > { %8115 = vmatprep.subr.bf16.mxu1 %v9046_v11  ;;  %5890 = vmatprep.mubr.bf16.mxu0 %v756_v44  ;;  %v9099_v10 = vld [vmem:[%s9910_s15 + $0x4c8] sm:$0xff]   ;;  %v9123_v44 = vld [vmem:[%s9910_s15 + $0x558] sm:$0xff]  }
  0xce   : > { %5930 = vmatprep.mubr.bf16.mxu1 %v758_v47  ;;  %v9100_v11 = vld [vmem:[%s9910_s15 + $0x408] sm:$0xff]   ;;  %v9126_v47 = vld [vmem:[%s9910_s15 + $0x598] sm:$0xff]  }
  0xcf   : > { %8094 = vmatpush3.bf16.msra.mxu0 %v9047_v12  ;;  %v312_v12 = vld [vmem:[%s9928_s13 + $0x20] sm:$0xff] }
  0xd0   : > { %8116 = vmatpush3.bf16.msra.mxu1 %v9048_v13  ;;  %8095 = vmatprep.subr.bf16.mxu0 %v9049_v14  ;;  %v9101_v13 = vld [vmem:[%s9910_s15 + $0x488] sm:$0xff]   ;;  %v421_v14 = vrot.slane %v312_v12, %v9967_v42 }
  0xd1   : > { %8117 = vmatprep.subr.bf16.mxu1 %v9050_v15  ;;  %v414_v15 = vcombine.high %v312_v12, %v312_v12  ;;  %v9146_v12 = vld [vmem:[%s9910_s15 + $0x630] sm:$0xff]  }
  0xd3   : > { %8096 = vmatpush3.bf16.msra.mxu0 %v9051_v16  ;;  %v9102_v16 = vld [vmem:[%s9910_s15 + $0x440] sm:$0xff]  }
  0xd4   : > { %8118 = vmatpush3.bf16.msra.mxu1 %v9052_v17  ;;  %8097 = vmatprep.subr.bf16.mxu0 %v9053_v18  ;;  %v9103_v17 = vld [vmem:[%s9910_s15 + $0x4c0] sm:$0xff]   ;;  %v429_v18 = vcombine.high %v421_v14, %v421_v14 }
  0xd5   : > { %8119 = vmatprep.subr.bf16.mxu1 %v9054_v19  ;;  %v428_v19 = vrot.slane %v414_v15, %v9967_v42  ;;  %v9149_v15 = vld [vmem:[%s9910_s15 + $0x6e8] sm:$0xff]  }
  0xd7   : > { %8098 = vmatpush3.bf16.msra.mxu0 %v9055_v20  ;;  %v9104_v20 = vld [vmem:[%s9910_s15 + $0x400] sm:$0xff]  }
  0xd8   : > { %8120 = vmatpush3.bf16.msra.mxu1 %v9056_v21  ;;  %8099 = vmatprep.subr.bf16.mxu0 %v9057_v22  ;;  %v9105_v21 = vld [vmem:[%s9910_s15 + $0x480] sm:$0xff]   ;;  %v760_v22 = vpack.c.bf16 %v429_v18, %v429_v18 }
  0xd9   : > { %8121 = vmatprep.subr.bf16.mxu1 %v9058_v23  ;;  %v430_v23 = vcombine.high %v428_v19, %v428_v19  ;;  %v9152_v18 = vld [vmem:[%s9910_s15 + $0x660] sm:$0xff]  }
  0xdb   : > { %8100 = vmatpush3.bf16.msra.mxu0 %v9059_v24  ;;  %v9107_v24 = vld [vmem:[%s9910_s15 + $0x578] sm:$0xff]  }
  0xdc   : > { %8122 = vmatpush3.bf16.msra.mxu1 %v9060_v25  ;;  %8101 = vmatprep.subr.bf16.mxu0 %v9061_v26  ;;  %v762_v25 = vpack.c.bf16 %v430_v23, %v430_v23  ;;  %v9108_v26 = vld [vmem:[%s9910_s15 + $0x5f8] sm:$0xff]  }
  0xdd   : > { %8123 = vmatprep.subr.bf16.mxu1 %v9062_v27  ;;  %v9109_v27 = vld [vmem:[%s9910_s15 + $0x538] sm:$0xff]  }
  0xde   : > { %v9157_v23 = vld [vmem:[%s9910_s15 + $0x6d8] sm:$0xff]  }
  0xdf   : > { %8102 = vmatpush3.bf16.msra.mxu0 %v9063_v28  ;;  %v759_v28 = vpack.c.bf16 %v421_v14, %v421_v14  ;;  %v9148_v14 = vld [vmem:[%s9910_s15 + $0x668] sm:$0xff]  }
  0xe0   : > { %8124 = vmatpush3.bf16.msra.mxu1 %v9064_v29  ;;  %8103 = vmatprep.subr.bf16.mxu0 %v9065_v30  ;;  %v761_v29 = vpack.c.bf16 %v428_v19, %v428_v19  ;;  %v9110_v30 = vld [vmem:[%s9910_s15 + $0x5b8] sm:$0xff]   ;;  %v9153_v19 = vld [vmem:[%s9910_s15 + $0x6e0] sm:$0xff]  }
  0xe1   : > { %8125 = vmatprep.subr.bf16.mxu1 %v9066_v31  ;;  %v9111_v31 = vld [vmem:[%s9910_s15 + $0x570] sm:$0xff]  }
  0xe3   : > { %8104 = vmatpush3.bf16.msra.mxu0 %v9067_v32  ;;  %v9112_v32 = vld [vmem:[%s9910_s15 + $0x5f0] sm:$0xff]  }
  0xe4   : > { %8126 = vmatpush3.bf16.msra.mxu1 %v9068_v34  ;;  %8105 = vmatprep.subr.bf16.mxu0 %v9069_v37  ;;  %v9114_v34 = vld [vmem:[%s9910_s15 + $0x5b0] sm:$0xff]   ;;  %v9117_v37 = vld [vmem:[%s9910_s15 + $0x528] sm:$0xff]  }
  0xe5   : > { %8127 = vmatprep.subr.bf16.mxu1 %v9070_v38  ;;  %v9118_v38 = vld [vmem:[%s9910_s15 + $0x5a8] sm:$0xff]  }
  0xe7   : > { %8106 = vmatpush3.bf16.msra.mxu0 %v9071_v41  ;;  %v9121_v41 = vld [vmem:[%s9910_s15 + $0x520] sm:$0xff]  }
  0xe8   : > { %8128 = vmatpush3.bf16.msra.mxu1 %v9072_v43  ;;  %8135 = vmatprep.subr.bf16.mxu0 %v9074_v46  ;;  %v9122_v43 = vld [vmem:[%s9910_s15 + $0x5a0] sm:$0xff]   ;;  %v9125_v46 = vld [vmem:[%s9910_s15 + $0x518] sm:$0xff]  }
  0xe9   : > { %8157 = vmatprep.subr.bf16.mxu1 %v9075_v48  ;;  %v9127_v48 = vld [vmem:[%s9910_s15 + $0x550] sm:$0xff]  }
  0xea   : > { %5891 = vmatmul.mubr.bf16.vlgmr.msra.gmra.mxu0 %v755_v50  ;;  %v9129_v50 = vld [vmem:[%s9910_s15 + $0x510] sm:$0xff]  }
  0xeb   : > { %5931 = vmatmul.mubr.bf16.vlgmr.msra.gmra.mxu1 %v757_v51  ;;  %8136 = vmatpush3.bf16.msra.mxu0 %v9076_v49  ;;  %v9128_v49 = vld [vmem:[%s9910_s15 + $0x5d0] sm:$0xff]  }
  0xec   : > { %8158 = vmatpush3.bf16.msra.mxu1 %v9077_v52  ;;  %8137 = vmatprep.subr.bf16.mxu0 %v9078_v53  ;;  %v9130_v51 = vld [vmem:[%s9910_s15 + $0x590] sm:$0xff]   ;;  %v9131_v52 = vld [vmem:[%s9910_s15 + $0x548] sm:$0xff]  }
  0xed   : > { %8159 = vmatprep.subr.bf16.mxu1 %v9079_v54  ;;  %5970 = vmatprep.mubr.bf16.mxu0 %v760_v22  ;;  %v9132_v53 = vld [vmem:[%s9910_s15 + $0x5c8] sm:$0xff]   ;;  %v9156_v22 = vld [vmem:[%s9910_s15 + $0x658] sm:$0xff]  }
  0xee   : > { %6010 = vmatprep.mubr.bf16.mxu1 %v762_v25  ;;  %v9133_v54 = vld [vmem:[%s9910_s15 + $0x508] sm:$0xff]   ;;  %v9159_v25 = vld [vmem:[%s9910_s15 + $0x698] sm:$0xff]  }
  0xef   : > { %8138 = vmatpush3.bf16.msra.mxu0 %v9080_v55  ;;  %v313_v55 = vld [vmem:[%s9928_s13 + $0x28] sm:$0xff] }
  0xf0   : > { %8160 = vmatpush3.bf16.msra.mxu1 %v9081_v56  ;;  %8139 = vmatprep.subr.bf16.mxu0 %v9082_v57  ;;  %v9134_v56 = vld [vmem:[%s9910_s15 + $0x588] sm:$0xff]   ;;  %v438_v57 = vrot.slane %v313_v55, %v9967_v42 }
  0xf1   : > { %8161 = vmatprep.subr.bf16.mxu1 %v9083_v58  ;;  %v431_v58 = vcombine.high %v313_v55, %v313_v55  ;;  %v9179_v55 = vld [vmem:[%s9910_s15 + $0x730] sm:$0xff]  }
  0xf3   : > { %8140 = vmatpush3.bf16.msra.mxu0 %v9084_v59  ;;  %v9135_v59 = vld [vmem:[%s9910_s15 + $0x540] sm:$0xff]  }
  0xf4   : > { %8162 = vmatpush3.bf16.msra.mxu1 %v9085_v60  ;;  %8141 = vmatprep.subr.bf16.mxu0 %v9086_v61  ;;  %v9136_v60 = vld [vmem:[%s9910_s15 + $0x5c0] sm:$0xff]   ;;  %v446_v61 = vcombine.high %v438_v57, %v438_v57 }
  0xf5   : > { %8163 = vmatprep.subr.bf16.mxu1 %v9087_v62  ;;  %v445_v62 = vrot.slane %v431_v58, %v9967_v42  ;;  %v9180_v58 = vld [vmem:[%s9910_s15 + $0x7b0] sm:$0xff]  }
  0xf7   : > { %8142 = vmatpush3.bf16.msra.mxu0 %v9088_v63  ;;  %v9137_v63 = vld [vmem:[%s9910_s15 + $0x500] sm:$0xff]  }
  0xf8   : > { %8164 = vmatpush3.bf16.msra.mxu1 %v9089_v0  ;;  %8143 = vmatprep.subr.bf16.mxu0 %v9090_v1  ;;  %v9138_v0 = vld [vmem:[%s9910_s15 + $0x580] sm:$0xff]   ;;  %v764_v1 = vpack.c.bf16 %v446_v61, %v446_v61 }
  0xf9   : > { %8165 = vmatprep.subr.bf16.mxu1 %v9091_v2  ;;  %v447_v2 = vcombine.high %v445_v62, %v445_v62 }
  0xfb   : > { %8144 = vmatpush3.bf16.msra.mxu0 %v9092_v3  ;;  %v9140_v3 = vld [vmem:[%s9910_s15 + $0x678] sm:$0xff]  }
  0xfc   : > { %8166 = vmatpush3.bf16.msra.mxu1 %v9093_v4  ;;  %8145 = vmatprep.subr.bf16.mxu0 %v9094_v5  ;;  %v766_v4 = vpack.c.bf16 %v447_v2, %v447_v2  ;;  %v9141_v5 = vld [vmem:[%s9910_s15 + $0x6f8] sm:$0xff]  }
  0xfd   : > { %8167 = vmatprep.subr.bf16.mxu1 %v9095_v6  ;;  %v9142_v6 = vld [vmem:[%s9910_s15 + $0x638] sm:$0xff]  }
  0xff   : > { %8146 = vmatpush3.bf16.msra.mxu0 %v9096_v7  ;;  %v763_v7 = vpack.c.bf16 %v438_v57, %v438_v57 }
 0x100   : > { %8168 = vmatpush3.bf16.msra.mxu1 %v9097_v8  ;;  %8147 = vmatprep.subr.bf16.mxu0 %v9098_v9  ;;  %v765_v8 = vpack.c.bf16 %v445_v62, %v445_v62  ;;  %v9143_v9 = vld [vmem:[%s9910_s15 + $0x6b8] sm:$0xff]   ;;  %v9182_v62 = vld [vmem:[%s9910_s15 + $0x7e8] sm:$0xff]  }
 0x101   : > { %8169 = vmatprep.subr.bf16.mxu1 %v9099_v10  ;;  %v9144_v10 = vld [vmem:[%s9910_s15 + $0x670] sm:$0xff]  }
 0x103   : > { %8148 = vmatpush3.bf16.msra.mxu0 %v9100_v11  ;;  %v9145_v11 = vld [vmem:[%s9910_s15 + $0x6f0] sm:$0xff]  }
 0x104   : > { %8170 = vmatpush3.bf16.msra.mxu1 %v9101_v13  ;;  %8149 = vmatprep.subr.bf16.mxu0 %v9102_v16  ;;  %v9147_v13 = vld [vmem:[%s9910_s15 + $0x6b0] sm:$0xff]   ;;  %v9150_v16 = vld [vmem:[%s9910_s15 + $0x628] sm:$0xff]  }
 0x105   : > { %8171 = vmatprep.subr.bf16.mxu1 %v9103_v17  ;;  %v9151_v17 = vld [vmem:[%s9910_s15 + $0x6a8] sm:$0xff]  }
 0x107   : > { %8150 = vmatpush3.bf16.msra.mxu0 %v9104_v20  ;;  %v9154_v20 = vld [vmem:[%s9910_s15 + $0x620] sm:$0xff]  }
 0x108   : > { %8172 = vmatpush3.bf16.msra.mxu1 %v9105_v21  ;;  %8179 = vmatprep.subr.bf16.mxu0 %v9107_v24  ;;  %v9155_v21 = vld [vmem:[%s9910_s15 + $0x6a0] sm:$0xff]   ;;  %v9158_v24 = vld [vmem:[%s9910_s15 + $0x618] sm:$0xff]  }
 0x109   : > { %8201 = vmatprep.subr.bf16.mxu1 %v9108_v26  ;;  %v9160_v26 = vld [vmem:[%s9910_s15 + $0x650] sm:$0xff]  }
 0x10a   : > { %5971 = vmatmul.mubr.bf16.vlgmr.msra.gmra.mxu0 %v759_v28  ;;  %v9162_v28 = vld [vmem:[%s9910_s15 + $0x610] sm:$0xff]  }
 0x10b   : > { %6011 = vmatmul.mubr.bf16.vlgmr.msra.gmra.mxu1 %v761_v29  ;;  %8180 = vmatpush3.bf16.msra.mxu0 %v9109_v27  ;;  %v9161_v27 = vld [vmem:[%s9910_s15 + $0x6d0] sm:$0xff]  }
 0x10c   : > { %8202 = vmatpush3.bf16.msra.mxu1 %v9110_v30  ;;  %8181 = vmatprep.subr.bf16.mxu0 %v9111_v31  ;;  %v9163_v29 = vld [vmem:[%s9910_s15 + $0x690] sm:$0xff]   ;;  %v9164_v30 = vld [vmem:[%s9910_s15 + $0x648] sm:$0xff]  }
 0x10d   : > { %8203 = vmatprep.subr.bf16.mxu1 %v9112_v32  ;;  %6050 = vmatprep.mubr.bf16.mxu0 %v764_v1  ;;  %v9165_v31 = vld [vmem:[%s9910_s15 + $0x6c8] sm:$0xff]  }
 0x10e   : > { %6090 = vmatprep.mubr.bf16.mxu1 %v766_v4  ;;  %v9166_v32 = vld [vmem:[%s9910_s15 + $0x608] sm:$0xff]  }
 0x10f   : > { %8182 = vmatpush3.bf16.msra.mxu0 %v9113_v33  ;;  %v9167_v33 = vld [vmem:[%s9910_s15 + $0x688] sm:$0xff]  }
 0x110   : > { %8204 = vmatpush3.bf16.msra.mxu1 %v9114_v34  ;;  %8183 = vmatprep.subr.bf16.mxu0 %v9115_v35  ;;  %v314_v34 = vld [vmem:[%s9928_s13 + $0x30] sm:$0xff]  ;;  %v9168_v35 = vld [vmem:[%s9910_s15 + $0x640] sm:$0xff]  }
 0x111   : > { %8205 = vmatprep.subr.bf16.mxu1 %v9116_v36  ;;  %v455_v36 = vrot.slane %v314_v34, %v9967_v42  ;;  %v9183_v1 = vld [vmem:[%s9910_s15 + $0x728] sm:$0xff]  }
 0x112   : > { %v9184_v4 = vld [vmem:[%s9910_s15 + $0x7a8] sm:$0xff]  }
 0x113   : > { %8184 = vmatpush3.bf16.msra.mxu0 %v9117_v37  ;;  %v448_v37 = vcombine.high %v314_v34, %v314_v34 }
 0x114   : > { %8206 = vmatpush3.bf16.msra.mxu1 %v9118_v38  ;;  %8185 = vmatprep.subr.bf16.mxu0 %v9119_v39  ;;  %v9169_v38 = vld [vmem:[%s9910_s15 + $0x6c0] sm:$0xff]  }
 0x115   : > { %8207 = vmatprep.subr.bf16.mxu1 %v9120_v40  ;;  %v9170_v39 = vld [vmem:[%s9910_s15 + $0x600] sm:$0xff]   ;;  %v463_v40 = vcombine.high %v455_v36, %v455_v36 }
 0x117   : > { %8186 = vmatpush3.bf16.msra.mxu0 %v9121_v41  ;;  %v462_v41 = vrot.slane %v448_v37, %v9967_v42 }
 0x118   : > { %8208 = vmatpush3.bf16.msra.mxu1 %v9122_v43  ;;  %8187 = vmatprep.subr.bf16.mxu0 %v9123_v44  ;;  %v9171_v43 = vld [vmem:[%s9910_s15 + $0x680] sm:$0xff]   ;;  %v768_v44 = vpack.c.bf16 %v463_v40, %v463_v40 }
 0x119   : > { %8209 = vmatprep.subr.bf16.mxu1 %v9124_v45  ;;  %v464_v45 = vcombine.high %v462_v41, %v462_v41 }
 0x11b   : > { %8188 = vmatpush3.bf16.msra.mxu0 %v9125_v46  ;;  %v9173_v46 = vld [vmem:[%s9910_s15 + $0x778] sm:$0xff]  }
 0x11c   : > { %8210 = vmatpush3.bf16.msra.mxu1 %v9126_v47  ;;  %8189 = vmatprep.subr.bf16.mxu0 %v9127_v48  ;;  %v9174_v47 = vld [vmem:[%s9910_s15 + $0x7f8] sm:$0xff]   ;;  %v770_v48 = vpack.c.bf16 %v464_v45, %v464_v45  ;;  %v9212_v45 = vld [vmem:[%s9910_s15 + $0x830] sm:$0xff]  }
 0x11d   : > { %8211 = vmatprep.subr.bf16.mxu1 %v9128_v49  ;;  %v9175_v49 = vld [vmem:[%s9910_s15 + $0x738] sm:$0xff]  }
 0x11f   : > { %8190 = vmatpush3.bf16.msra.mxu0 %v9129_v50  ;;  %v767_v50 = vpack.c.bf16 %v455_v36, %v455_v36  ;;  %v9207_v36 = vld [vmem:[%s9910_s15 + $0x8f8] sm:$0xff]  }
 0x120   : > { %8212 = vmatpush3.bf16.msra.mxu1 %v9130_v51  ;;  %8191 = vmatprep.subr.bf16.mxu0 %v9131_v52  ;;  %v769_v51 = vpack.c.bf16 %v462_v41, %v462_v41  ;;  %v9176_v52 = vld [vmem:[%s9910_s15 + $0x7b8] sm:$0xff]  }
 0x121   : > { %8213 = vmatprep.subr.bf16.mxu1 %v9132_v53  ;;  %v9177_v53 = vld [vmem:[%s9910_s15 + $0x770] sm:$0xff]   ;;  %v9209_v41 = vld [vmem:[%s9910_s15 + $0x8b8] sm:$0xff]  }
 0x123   : > { %8192 = vmatpush3.bf16.msra.mxu0 %v9133_v54  ;;  %v9178_v54 = vld [vmem:[%s9910_s15 + $0x7f0] sm:$0xff]  }
 0x124   : > { %8214 = vmatpush3.bf16.msra.mxu1 %v9134_v56  ;;  %8193 = vmatprep.subr.bf16.mxu0 %v9135_v59  ;;  %v9181_v59 = vld [vmem:[%s9910_s15 + $0x768] sm:$0xff]  }
 0x125   : > { %8215 = vmatprep.subr.bf16.mxu1 %v9136_v60 }
 0x127   : > { %8194 = vmatpush3.bf16.msra.mxu0 %v9137_v63 }
 0x128   : > { %8216 = vmatpush3.bf16.msra.mxu1 %v9138_v0  ;;  %8223 = vmatprep.subr.bf16.mxu0 %v9140_v3 }
 0x129   : > { %8245 = vmatprep.subr.bf16.mxu1 %v9141_v5 }
 0x12a   : > { %6051 = vmatmul.mubr.bf16.vlgmr.msra.gmra.mxu0 %v763_v7 }
 0x12b   : > { %6091 = vmatmul.mubr.bf16.vlgmr.msra.gmra.mxu1 %v765_v8  ;;  %8224 = vmatpush3.bf16.msra.mxu0 %v9142_v6  ;;  %v9185_v6 = vld [vmem:[%s9910_s15 + $0x760] sm:$0xff]  }
 0x12c   : > { %8246 = vmatpush3.bf16.msra.mxu1 %v9143_v9  ;;  %8225 = vmatprep.subr.bf16.mxu0 %v9144_v10  ;;  %v9186_v9 = vld [vmem:[%s9910_s15 + $0x7e0] sm:$0xff]  }
 0x12d   : > { %8247 = vmatprep.subr.bf16.mxu1 %v9145_v11  ;;  %6130 = vmatprep.mubr.bf16.mxu0 %v768_v44  ;;  %v9187_v10 = vld [vmem:[%s9910_s15 + $0x720] sm:$0xff]   ;;  %v9211_v44 = vld [vmem:[%s9910_s15 + $0x8f0] sm:$0xff]  }
 0x12e   : > { %6170 = vmatprep.mubr.bf16.mxu1 %v770_v48  ;;  %v9188_v11 = vld [vmem:[%s9910_s15 + $0x7a0] sm:$0xff]   ;;  %v9213_v48 = vld [vmem:[%s9910_s15 + $0x8b0] sm:$0xff]  }
 0x12f   : > { %8226 = vmatpush3.bf16.msra.mxu0 %v9146_v12  ;;  %v9189_v12 = vld [vmem:[%s9910_s15 + $0x758] sm:$0xff]  }
 0x130   : > { %8248 = vmatpush3.bf16.msra.mxu1 %v9147_v13  ;;  %8227 = vmatprep.subr.bf16.mxu0 %v9148_v14  ;;  %v9190_v13 = vld [vmem:[%s9910_s15 + $0x7d8] sm:$0xff]  }
 0x131   : > { %8249 = vmatprep.subr.bf16.mxu1 %v9149_v15  ;;  %v9191_v14 = vld [vmem:[%s9910_s15 + $0x718] sm:$0xff]  }
 0x132   : > { %v9192_v15 = vld [vmem:[%s9910_s15 + $0x798] sm:$0xff]  }
 0x133   : > { %8228 = vmatpush3.bf16.msra.mxu0 %v9150_v16  ;;  %v9193_v16 = vld [vmem:[%s9910_s15 + $0x750] sm:$0xff]  }
 0x134   : > { %8250 = vmatpush3.bf16.msra.mxu1 %v9151_v17  ;;  %8229 = vmatprep.subr.bf16.mxu0 %v9152_v18  ;;  %v9194_v17 = vld [vmem:[%s9910_s15 + $0x7d0] sm:$0xff]  }
 0x135   : > { %8251 = vmatprep.subr.bf16.mxu1 %v9153_v19  ;;  %v9195_v18 = vld [vmem:[%s9910_s15 + $0x710] sm:$0xff]  }
 0x136   : > { %v9196_v19 = vld [vmem:[%s9910_s15 + $0x790] sm:$0xff]  }
 0x137   : > { %8230 = vmatpush3.bf16.msra.mxu0 %v9154_v20  ;;  %v9197_v20 = vld [vmem:[%s9910_s15 + $0x748] sm:$0xff]  }
 0x138   : > { %8252 = vmatpush3.bf16.msra.mxu1 %v9155_v21  ;;  %8231 = vmatprep.subr.bf16.mxu0 %v9156_v22  ;;  %v9198_v21 = vld [vmem:[%s9910_s15 + $0x7c8] sm:$0xff]  }
 0x139   : > { %8253 = vmatprep.subr.bf16.mxu1 %v9157_v23  ;;  %v9199_v22 = vld [vmem:[%s9910_s15 + $0x708] sm:$0xff]  }
 0x13a   : > { %v9200_v23 = vld [vmem:[%s9910_s15 + $0x788] sm:$0xff]  }
 0x13b   : > { %8232 = vmatpush3.bf16.msra.mxu0 %v9158_v24  ;;  %v315_v24 = vld [vmem:[%s9928_s13 + $0x38] sm:$0xff] }
 0x13c   : > { %8254 = vmatpush3.bf16.msra.mxu1 %v9159_v25  ;;  %8233 = vmatprep.subr.bf16.mxu0 %v9160_v26  ;;  %v9201_v25 = vld [vmem:[%s9910_s15 + $0x740] sm:$0xff]   ;;  %v472_v26 = vrot.slane %v315_v24, %v9967_v42 }
 0x13d   : > { %8255 = vmatprep.subr.bf16.mxu1 %v9161_v27  ;;  %v465_v27 = vcombine.high %v315_v24, %v315_v24 }
 0x13f   : > { %8234 = vmatpush3.bf16.msra.mxu0 %v9162_v28  ;;  %v9202_v28 = vld [vmem:[%s9910_s15 + $0x7c0] sm:$0xff]  }
 0x140   : > { %8256 = vmatpush3.bf16.msra.mxu1 %v9163_v29  ;;  %8235 = vmatprep.subr.bf16.mxu0 %v9164_v30  ;;  %v9203_v29 = vld [vmem:[%s9910_s15 + $0x700] sm:$0xff]   ;;  %v480_v30 = vcombine.high %v472_v26, %v472_v26 }
 0x141   : > { %8257 = vmatprep.subr.bf16.mxu1 %v9165_v31  ;;  %v479_v31 = vrot.slane %v465_v27, %v9967_v42  ;;  %v9240_v27 = vld [vmem:[%s9910_s15 + $0x9f8] sm:$0xff]  }
 0x143   : > { %8236 = vmatpush3.bf16.msra.mxu0 %v9166_v32  ;;  %v9204_v32 = vld [vmem:[%s9910_s15 + $0x780] sm:$0xff]   ;;  %v481_v34 = vcombine.high %v479_v31, %v479_v31  ;;  %v773_v40 = vpack.c.bf16 %v479_v31, %v479_v31 }
 0x144   : > { %8258 = vmatpush3.bf16.msra.mxu1 %v9167_v33  ;;  %8237 = vmatprep.subr.bf16.mxu0 %v9168_v35  ;;  %v772_v33 = vpack.c.bf16 %v480_v30, %v480_v30  ;;  %v9206_v35 = vld [vmem:[%s9910_s15 + $0x878] sm:$0xff]  }
 0x145   : > { %8259 = vmatprep.subr.bf16.mxu1 %v9169_v38  ;;  %v774_v37 = vpack.c.bf16 %v481_v34, %v481_v34  ;;  %v9208_v38 = vld [vmem:[%s9910_s15 + $0x838] sm:$0xff]   ;;  %v9244_v34 = vld [vmem:[%s9910_s15 + $0x9f0] sm:$0xff]  }
 0x147   : > { %8238 = vmatpush3.bf16.msra.mxu0 %v9170_v39  ;;  %v771_v39 = vpack.c.bf16 %v472_v26, %v472_v26  ;;  %v9239_v26 = vld [vmem:[%s9910_s15 + $0x978] sm:$0xff]  }
 0x148   : > { %8260 = vmatpush3.bf16.msra.mxu1 %v9171_v43  ;;  %8267 = vmatprep.subr.bf16.mxu0 %v9173_v46  ;;  %v9210_v43 = vld [vmem:[%s9910_s15 + $0x870] sm:$0xff]  }
 0x149   : > { %8289 = vmatprep.subr.bf16.mxu1 %v9174_v47 }
 0x14a   : > { %v7975_v56 = vpop.f32.mrf.mxu0  ;;  %6131 = vmatmul.mubr.bf16.vlgmr.msra.gmra.mxu0 %v767_v50 }
 0x14b   : > { %v7997_v57 = vpop.f32.mrf.mxu1  ;;  %6171 = vmatmul.mubr.bf16.vlgmr.msra.gmra.mxu1 %v769_v51  ;;  %8268 = vmatpush3.bf16.msra.mxu0 %v9175_v49  ;;  %v9214_v49 = vld [vmem:[%s9910_s15 + $0x868] sm:$0xff]  }
 0x14c   : > { %8290 = vmatpush3.bf16.msra.mxu1 %v9176_v52  ;;  %v7976_v60 = vpop.f32.mrf.mxu0  ;;  %8269 = vmatprep.subr.bf16.mxu0 %v9177_v53  ;;  %v9215_v52 = vld [vmem:[%s9910_s15 + $0x8e8] sm:$0xff]  }
 0x14d   : > { %v7998_v61 = vpop.f32.mrf.mxu1  ;;  %8291 = vmatprep.subr.bf16.mxu1 %v9178_v54  ;;  %v7977_v63 = vadd.f32 %v7976_v60, %v7975_v56  ;;  %6210 = vmatprep.mubr.bf16.mxu0 %v772_v33  ;;  %v9218_v60 = vld [vmem:[%s9910_s15 + $0x860] sm:$0xff]   ;;  %v9243_v33 = vld [vmem:[%s9910_s15 + $0x970] sm:$0xff]  }
 0x14e   : > { %v7999_v0 = vadd.f32 %v7998_v61, %v7997_v57  ;;  %v7978_v2 = vpop.f32.mrf.mxu0  ;;  %6250 = vmatprep.mubr.bf16.mxu1 %v774_v37 }
 0x14f   : > { %v8000_v3 = vpop.f32.mrf.mxu1  ;;  %8270 = vmatpush3.bf16.msra.mxu0 %v9179_v55  ;;  %v9216_v55 = vld [vmem:[%s9910_s15 + $0x828] sm:$0xff]   ;;  %v9221_v2 = vld [vmem:[%s9910_s15 + $0x8a0] sm:$0xff]  }
 0x150   : > { %v10191_v5 = vadd.f32 %v7999_v0, %v7977_v63  ;;  %8292 = vmatpush3.bf16.msra.mxu1 %v9180_v58  ;;  %v7979_v7 = vpop.f32.mrf.mxu0  ;;  %8271 = vmatprep.subr.bf16.mxu0 %v9181_v59  ;;  %v9217_v58 = vld [vmem:[%s9910_s15 + $0x8a8] sm:$0xff]   ;;  %v9219_v63 = vld [vmem:[%s9910_s15 + $0x8e0] sm:$0xff]   ;;  %v9222_v3 = vld [vmem:[%s9910_s15 + $0x858] sm:$0xff]  }
 0x151   : > { %v8001_v8 = vpop.f32.mrf.mxu1  ;;  %8293 = vmatprep.subr.bf16.mxu1 %v9182_v62  ;;  %v9226_v7 = vld [vmem:[%s9910_s15 + $0x850] sm:$0xff]  }
 0x152   : > { %v9227_v8 = vld [vmem:[%s9910_s15 + $0x8d0] sm:$0xff]  }
 0x153   : > { %8272 = vmatpush3.bf16.msra.mxu0 %v9183_v1  ;;  %v9220_v1 = vld [vmem:[%s9910_s15 + $0x820] sm:$0xff]  }
 0x154   : > { %8294 = vmatpush3.bf16.msra.mxu1 %v9184_v4  ;;  %8273 = vmatprep.subr.bf16.mxu0 %v9185_v6  ;;  %v9223_v4 = vld [vmem:[%s9910_s15 + $0x8d8] sm:$0xff]  }
 0x155   : > { %8295 = vmatprep.subr.bf16.mxu1 %v9186_v9  ;;  %v9225_v6 = vld [vmem:[%s9910_s15 + $0x898] sm:$0xff]   ;;  %v9228_v9 = vld [vmem:[%s9910_s15 + $0x810] sm:$0xff]  }
 0x157   : > { %8274 = vmatpush3.bf16.msra.mxu0 %v9187_v10  ;;  %v9229_v10 = vld [vmem:[%s9910_s15 + $0x890] sm:$0xff]  }
 0x158   : > { %8296 = vmatpush3.bf16.msra.mxu1 %v9188_v11  ;;  %8275 = vmatprep.subr.bf16.mxu0 %v9189_v12  ;;  %v9230_v11 = vld [vmem:[%s9910_s15 + $0x848] sm:$0xff]  }
 0x159   : > { %8297 = vmatprep.subr.bf16.mxu1 %v9190_v13  ;;  %v9231_v12 = vld [vmem:[%s9910_s15 + $0x8c8] sm:$0xff]  }
 0x15a   : > { %v9232_v13 = vld [vmem:[%s9910_s15 + $0x808] sm:$0xff]  }
 0x15b   : > { %8276 = vmatpush3.bf16.msra.mxu0 %v9191_v14  ;;  %v9233_v14 = vld [vmem:[%s9910_s15 + $0x888] sm:$0xff]  }
 0x15c   : > { %8298 = vmatpush3.bf16.msra.mxu1 %v9192_v15  ;;  %8277 = vmatprep.subr.bf16.mxu0 %v9193_v16  ;;  %v316_v15 = vld [vmem:[%s9928_s13 + $0x40] sm:$0xff] }
 0x15d   : > { %8299 = vmatprep.subr.bf16.mxu1 %v9194_v17  ;;  %v9234_v16 = vld [vmem:[%s9910_s15 + $0x840] sm:$0xff]   ;;  %v489_v17 = vrot.slane %v316_v15, %v9967_v42 }
 0x15f   : > { %8278 = vmatpush3.bf16.msra.mxu0 %v9195_v18  ;;  %v482_v18 = vcombine.high %v316_v15, %v316_v15  ;;  %v775_v30 = vpack.c.bf16 %v489_v17, %v489_v17  ;;  %v9272_v15 = vld [vmem:[%s9910_s15 + $0xa78] sm:$0xff]  }
 0x160   : > { %8300 = vmatpush3.bf16.msra.mxu1 %v9196_v19  ;;  %8279 = vmatprep.subr.bf16.mxu0 %v9197_v20  ;;  %v9235_v19 = vld [vmem:[%s9910_s15 + $0x8c0] sm:$0xff]  }
 0x161   : > { %8301 = vmatprep.subr.bf16.mxu1 %v9198_v21  ;;  %v9236_v20 = vld [vmem:[%s9910_s15 + $0x800] sm:$0xff]   ;;  %v497_v21 = vcombine.high %v489_v17, %v489_v17 }
 0x163   : > { %8280 = vmatpush3.bf16.msra.mxu0 %v9199_v22  ;;  %v496_v22 = vrot.slane %v482_v18, %v9967_v42  ;;  %v776_v24 = vpack.c.bf16 %v497_v21, %v497_v21  ;;  %v9273_v18 = vld [vmem:[%s9910_s15 + $0xaf8] sm:$0xff]  }
 0x164   : > { %8302 = vmatpush3.bf16.msra.mxu1 %v9200_v23  ;;  %8281 = vmatprep.subr.bf16.mxu0 %v9201_v25  ;;  %v9237_v23 = vld [vmem:[%s9910_s15 + $0x880] sm:$0xff]  }
 0x165   : > { %8303 = vmatprep.subr.bf16.mxu1 %v9202_v28  ;;  %v498_v25 = vcombine.high %v496_v22, %v496_v22  ;;  %v777_v31 = vpack.c.bf16 %v496_v22, %v496_v22 }
 0x167   : > { %8282 = vmatpush3.bf16.msra.mxu0 %v9203_v29  ;;  %v778_v28 = vpack.c.bf16 %v498_v25, %v498_v25  ;;  %v9241_v29 = vld [vmem:[%s9910_s15 + $0x938] sm:$0xff]   ;;  %v9277_v25 = vld [vmem:[%s9910_s15 + $0xaf0] sm:$0xff]  }
 0x168   : > { %8304 = vmatpush3.bf16.msra.mxu1 %v9204_v32  ;;  %8311 = vmatprep.subr.bf16.mxu0 %v9206_v35  ;;  %v9242_v32 = vld [vmem:[%s9910_s15 + $0x9b8] sm:$0xff]   ;;  %v9245_v35 = vld [vmem:[%s9910_s15 + $0x930] sm:$0xff]  }
 0x169   : > { %8333 = vmatprep.subr.bf16.mxu1 %v9207_v36 }
 0x16a   : > { %v8019_v46 = vpop.f32.mrf.mxu0  ;;  %6211 = vmatmul.mubr.bf16.vlgmr.msra.gmra.mxu0 %v771_v39  ;;  %v9247_v39 = vld [vmem:[%s9910_s15 + $0x968] sm:$0xff]  }
 0x16b   : > { %v8041_v47 = vpop.f32.mrf.mxu1  ;;  %6251 = vmatmul.mubr.bf16.vlgmr.msra.gmra.mxu1 %v773_v40  ;;  %8312 = vmatpush3.bf16.msra.mxu0 %v9208_v38  ;;  %v9246_v38 = vld [vmem:[%s9910_s15 + $0x9b0] sm:$0xff]  }
 0x16c   : > { %8334 = vmatpush3.bf16.msra.mxu1 %v9209_v41  ;;  %v8020_v50 = vpop.f32.mrf.mxu0  ;;  %8313 = vmatprep.subr.bf16.mxu0 %v9210_v43  ;;  %v9248_v43 = vld [vmem:[%s9910_s15 + $0x9e8] sm:$0xff]  }
 0x16d   : > { %v8042_v51 = vpop.f32.mrf.mxu1  ;;  %8335 = vmatprep.subr.bf16.mxu1 %v9211_v44  ;;  %v8021_v53 = vadd.f32 %v8020_v50, %v8019_v46  ;;  %6290 = vmatprep.mubr.bf16.mxu0 %v776_v24  ;;  %v9249_v46 = vld [vmem:[%s9910_s15 + $0x928] sm:$0xff]   ;;  %v9276_v24 = vld [vmem:[%s9910_s15 + $0xa70] sm:$0xff]  }
 0x16e   : > { %v8043_v54 = vadd.f32 %v8042_v51, %v8041_v47  ;;  %v8022_v56 = vpop.f32.mrf.mxu0  ;;  %6330 = vmatprep.mubr.bf16.mxu1 %v778_v28  ;;  %v9251_v51 = vld [vmem:[%s9910_s15 + $0x960] sm:$0xff]  }
 0x16f   : > { %v8044_v57 = vpop.f32.mrf.mxu1  ;;  %v5733_v59 = vadd.f32 %v8021_v53, %v10191_v5  ;;  %8314 = vmatpush3.bf16.msra.mxu0 %v9212_v45  ;;  %v9224_v5 = vld [vmem:[%s9910_s15 + $0x818] sm:$0xff]   ;;  %v9253_v56 = vld [vmem:[%s9910_s15 + $0x920] sm:$0xff]  }
 0x170   : > { %8336 = vmatpush3.bf16.msra.mxu1 %v9213_v48  ;;  %v8023_v61 = vpop.f32.mrf.mxu0  ;;  %8315 = vmatprep.subr.bf16.mxu0 %v9214_v49  ;;  %v9250_v49 = vld [vmem:[%s9910_s15 + $0x9a8] sm:$0xff]   ;;  %v9254_v57 = vld [vmem:[%s9910_s15 + $0x9a0] sm:$0xff]  }
 0x171   : > { %v8045_v62 = vpop.f32.mrf.mxu1  ;;  %8337 = vmatprep.subr.bf16.mxu1 %v9215_v52  ;;  %v10231_v0 = vadd.f32 %v8043_v54, %v5733_v59  ;;  %v9252_v54 = vld [vmem:[%s9910_s15 + $0x9e0] sm:$0xff]   ;;  %v9256_v59 = vld [vmem:[%s9910_s15 + $0x9d8] sm:$0xff]  }
 0x172   : > { %v9258_v61 = vld [vmem:[%s9910_s15 + $0x998] sm:$0xff]   ;;  %v9259_v62 = vld [vmem:[%s9910_s15 + $0x950] sm:$0xff]  }
 0x173   : > { %8316 = vmatpush3.bf16.msra.mxu0 %v9216_v55 }
 0x174   : > { %8338 = vmatpush3.bf16.msra.mxu1 %v9217_v58  ;;  %8317 = vmatprep.subr.bf16.mxu0 %v9218_v60  ;;  %v9255_v58 = vld [vmem:[%s9910_s15 + $0x958] sm:$0xff]  }
 0x175   : > { %8339 = vmatprep.subr.bf16.mxu1 %v9219_v63  ;;  %v9257_v60 = vld [vmem:[%s9910_s15 + $0x918] sm:$0xff]   ;;  %v9260_v63 = vld [vmem:[%s9910_s15 + $0x9d0] sm:$0xff]  }
 0x177   : > { %8318 = vmatpush3.bf16.msra.mxu0 %v9220_v1  ;;  %v9262_v1 = vld [vmem:[%s9910_s15 + $0x990] sm:$0xff]  }
 0x178   : > { %8340 = vmatpush3.bf16.msra.mxu1 %v9221_v2  ;;  %8319 = vmatprep.subr.bf16.mxu0 %v9222_v3  ;;  %v9263_v2 = vld [vmem:[%s9910_s15 + $0x948] sm:$0xff]  }
 0x179   : > { %8341 = vmatprep.subr.bf16.mxu1 %v9223_v4  ;;  %v9264_v3 = vld [vmem:[%s9910_s15 + $0x9c8] sm:$0xff]  }
 0x17a   : > { %v9265_v4 = vld [vmem:[%s9910_s15 + $0x908] sm:$0xff]  }
 0x17b   : > { %8320 = vmatpush3.bf16.msra.mxu0 %v9224_v5  ;;  %v9266_v5 = vld [vmem:[%s9910_s15 + $0x988] sm:$0xff]  }
 0x17c   : > { %8342 = vmatpush3.bf16.msra.mxu1 %v9225_v6  ;;  %8321 = vmatprep.subr.bf16.mxu0 %v9226_v7  ;;  %v9267_v6 = vld [vmem:[%s9910_s15 + $0x940] sm:$0xff]  }
 0x17d   : > { %8343 = vmatprep.subr.bf16.mxu1 %v9227_v8  ;;  %v317_v7 = vld [vmem:[%s9928_s13 + $0x48] sm:$0xff] }
 0x17e   : > { %v9268_v8 = vld [vmem:[%s9910_s15 + $0x9c0] sm:$0xff]  }
 0x17f   : > { %8322 = vmatpush3.bf16.msra.mxu0 %v9228_v9  ;;  %v506_v9 = vrot.slane %v317_v7, %v9967_v42 }
 0x180   : > { %8344 = vmatpush3.bf16.msra.mxu1 %v9229_v10  ;;  %8323 = vmatprep.subr.bf16.mxu0 %v9230_v11  ;;  %v499_v10 = vcombine.high %v317_v7, %v317_v7  ;;  %v9269_v11 = vld [vmem:[%s9910_s15 + $0x900] sm:$0xff]  }
 0x181   : > { %8345 = vmatprep.subr.bf16.mxu1 %v9231_v12  ;;  %v9270_v12 = vld [vmem:[%s9910_s15 + $0x980] sm:$0xff]   ;;  %v779_v21 = vpack.c.bf16 %v506_v9, %v506_v9 }
 0x183   : > { %8324 = vmatpush3.bf16.msra.mxu0 %v9232_v13  ;;  %v514_v13 = vcombine.high %v506_v9, %v506_v9  ;;  %v9306_v9 = vld [vmem:[%s9910_s15 + $0xbf8] sm:$0xff]  }
 0x184   : > { %8346 = vmatpush3.bf16.msra.mxu1 %v9233_v14  ;;  %8325 = vmatprep.subr.bf16.mxu0 %v9234_v16  ;;  %v513_v14 = vrot.slane %v499_v10, %v9967_v42  ;;  %v9307_v10 = vld [vmem:[%s9910_s15 + $0xb38] sm:$0xff]  }
 0x185   : > { %8347 = vmatprep.subr.bf16.mxu1 %v9235_v19  ;;  %v780_v16 = vpack.c.bf16 %v514_v13, %v514_v13  ;;  %v9274_v19 = vld [vmem:[%s9910_s15 + $0xa38] sm:$0xff]  }
 0x186   : > { %v515_v17 = vcombine.high %v513_v14, %v513_v14  ;;  %v781_v22 = vpack.c.bf16 %v513_v14, %v513_v14  ;;  %v9308_v14 = vld [vmem:[%s9910_s15 + $0xbb8] sm:$0xff]  }
 0x187   : > { %8326 = vmatpush3.bf16.msra.mxu0 %v9236_v20 }
 0x188   : > { %8348 = vmatpush3.bf16.msra.mxu1 %v9237_v23  ;;  %8355 = vmatprep.subr.bf16.mxu0 %v9239_v26  ;;  %v782_v20 = vpack.c.bf16 %v515_v17, %v515_v17  ;;  %v9275_v23 = vld [vmem:[%s9910_s15 + $0xab8] sm:$0xff]   ;;  %v9278_v26 = vld [vmem:[%s9910_s15 + $0xa30] sm:$0xff]  }
 0x189   : > { %8377 = vmatprep.subr.bf16.mxu1 %v9240_v27  ;;  %v9311_v17 = vld [vmem:[%s9910_s15 + $0xb30] sm:$0xff]  }
 0x18a   : > { %v8063_v36 = vpop.f32.mrf.mxu0  ;;  %6291 = vmatmul.mubr.bf16.vlgmr.msra.gmra.mxu0 %v775_v30  ;;  %v9280_v30 = vld [vmem:[%s9910_s15 + $0xa68] sm:$0xff]  }
 0x18b   : > { %v8085_v37 = vpop.f32.mrf.mxu1  ;;  %6331 = vmatmul.mubr.bf16.vlgmr.msra.gmra.mxu1 %v777_v31  ;;  %8356 = vmatpush3.bf16.msra.mxu0 %v9241_v29  ;;  %v9279_v29 = vld [vmem:[%s9910_s15 + $0xab0] sm:$0xff]  }
 0x18c   : > { %8378 = vmatpush3.bf16.msra.mxu1 %v9242_v32  ;;  %v8064_v40 = vpop.f32.mrf.mxu0  ;;  %8357 = vmatprep.subr.bf16.mxu0 %v9243_v33  ;;  %v9281_v33 = vld [vmem:[%s9910_s15 + $0xae8] sm:$0xff]  }
 0x18d   : > { %v8086_v41 = vpop.f32.mrf.mxu1  ;;  %8379 = vmatprep.subr.bf16.mxu1 %v9244_v34  ;;  %v8065_v44 = vadd.f32 %v8064_v40, %v8063_v36  ;;  %6370 = vmatprep.mubr.bf16.mxu0 %v780_v16  ;;  %v9282_v36 = vld [vmem:[%s9910_s15 + $0xa28] sm:$0xff]   ;;  %v9310_v16 = vld [vmem:[%s9910_s15 + $0xbf0] sm:$0xff]  }
 0x18e   : > { %v8087_v45 = vadd.f32 %v8086_v41, %v8085_v37  ;;  %v8066_v47 = vpop.f32.mrf.mxu0  ;;  %6410 = vmatprep.mubr.bf16.mxu1 %v782_v20  ;;  %v9284_v41 = vld [vmem:[%s9910_s15 + $0xa60] sm:$0xff]   ;;  %v9312_v20 = vld [vmem:[%s9910_s15 + $0xbb0] sm:$0xff]  }
 0x18f   : > { %v8088_v48 = vpop.f32.mrf.mxu1  ;;  %v5813_v50 = vadd.f32 %v8065_v44, %v10231_v0  ;;  %8358 = vmatpush3.bf16.msra.mxu0 %v9245_v35  ;;  %v9261_v0 = vld [vmem:[%s9910_s15 + $0x910] sm:$0xff]   ;;  %v9286_v47 = vld [vmem:[%s9910_s15 + $0xa20] sm:$0xff]  }
 0x190   : > { %8380 = vmatpush3.bf16.msra.mxu1 %v9246_v38  ;;  %v8067_v52 = vpop.f32.mrf.mxu0  ;;  %8359 = vmatprep.subr.bf16.mxu0 %v9247_v39  ;;  %v9283_v39 = vld [vmem:[%s9910_s15 + $0xaa8] sm:$0xff]   ;;  %v9287_v48 = vld [vmem:[%s9910_s15 + $0xaa0] sm:$0xff]  }
 0x191   : > { %v8089_v53 = vpop.f32.mrf.mxu1  ;;  %8381 = vmatprep.subr.bf16.mxu1 %v9248_v43  ;;  %v10269_v55 = vadd.f32 %v8087_v45, %v5813_v50  ;;  %v9285_v45 = vld [vmem:[%s9910_s15 + $0xae0] sm:$0xff]   ;;  %v9289_v50 = vld [vmem:[%s9910_s15 + $0xad8] sm:$0xff]  }
 0x192   : > { %v9291_v52 = vld [vmem:[%s9910_s15 + $0xa98] sm:$0xff]   ;;  %v9292_v53 = vld [vmem:[%s9910_s15 + $0xa50] sm:$0xff]  }
 0x193   : > { %8360 = vmatpush3.bf16.msra.mxu0 %v9249_v46 }
 0x194   : > { %8382 = vmatpush3.bf16.msra.mxu1 %v9250_v49  ;;  %8361 = vmatprep.subr.bf16.mxu0 %v9251_v51  ;;  %v9288_v49 = vld [vmem:[%s9910_s15 + $0xa58] sm:$0xff]  }
 0x195   : > { %8383 = vmatprep.subr.bf16.mxu1 %v9252_v54  ;;  %v9290_v51 = vld [vmem:[%s9910_s15 + $0xa18] sm:$0xff]   ;;  %v9293_v54 = vld [vmem:[%s9910_s15 + $0xad0] sm:$0xff]  }
 0x197   : > { %8362 = vmatpush3.bf16.msra.mxu0 %v9253_v56  ;;  %v9295_v56 = vld [vmem:[%s9910_s15 + $0xa90] sm:$0xff]  }
 0x198   : > { %8384 = vmatpush3.bf16.msra.mxu1 %v9254_v57  ;;  %8363 = vmatprep.subr.bf16.mxu0 %v9255_v58  ;;  %v9296_v57 = vld [vmem:[%s9910_s15 + $0xa48] sm:$0xff]  }
 0x199   : > { %8385 = vmatprep.subr.bf16.mxu1 %v9256_v59  ;;  %v9297_v58 = vld [vmem:[%s9910_s15 + $0xac8] sm:$0xff]  }
 0x19a   : > { %v9298_v59 = vld [vmem:[%s9910_s15 + $0xa08] sm:$0xff]  }
 0x19b   : > { %8364 = vmatpush3.bf16.msra.mxu0 %v9257_v60  ;;  %v9299_v60 = vld [vmem:[%s9910_s15 + $0xa88] sm:$0xff]  }
 0x19c   : > { %8386 = vmatpush3.bf16.msra.mxu1 %v9258_v61  ;;  %8365 = vmatprep.subr.bf16.mxu0 %v9259_v62  ;;  %v9300_v61 = vld [vmem:[%s9910_s15 + $0xa40] sm:$0xff]   ;;  %v318_v62 = vld [vmem:[%s9928_s13 + $0x50] sm:$0xff] }
 0x19d   : > { %8387 = vmatprep.subr.bf16.mxu1 %v9260_v63  ;;  %v9301_v63 = vld [vmem:[%s9910_s15 + $0xac0] sm:$0xff]  }
 0x19f   : > { %8366 = vmatpush3.bf16.msra.mxu0 %v9261_v0  ;;  %v523_v0 = vrot.slane %v318_v62, %v9967_v42 }
 0x1a0   : > { %8388 = vmatpush3.bf16.msra.mxu1 %v9262_v1  ;;  %8367 = vmatprep.subr.bf16.mxu0 %v9263_v2  ;;  %v516_v1 = vcombine.high %v318_v62, %v318_v62  ;;  %v9302_v2 = vld [vmem:[%s9910_s15 + $0xa00] sm:$0xff]  }
 0x1a1   : > { %8389 = vmatprep.subr.bf16.mxu1 %v9264_v3  ;;  %v9303_v3 = vld [vmem:[%s9910_s15 + $0xa80] sm:$0xff]  }
 0x1a3   : > { %8368 = vmatpush3.bf16.msra.mxu0 %v9265_v4  ;;  %v531_v4 = vcombine.high %v523_v0, %v523_v0 }
 0x1a4   : > { %8390 = vmatpush3.bf16.msra.mxu1 %v9266_v5  ;;  %8369 = vmatprep.subr.bf16.mxu0 %v9267_v6  ;;  %v530_v5 = vrot.slane %v516_v1, %v9967_v42  ;;  %v9305_v6 = vld [vmem:[%s9910_s15 + $0xb78] sm:$0xff]  }
 0x1a5   : > { %8391 = vmatprep.subr.bf16.mxu1 %v9268_v8  ;;  %v784_v7 = vpack.c.bf16 %v531_v4, %v531_v4  ;;  %v9340_v1 = vld [vmem:[%s9910_s15 + $0xc38] sm:$0xff]  }
 0x1a6   : > { %v532_v8 = vcombine.high %v530_v5, %v530_v5  ;;  %v785_v13 = vpack.c.bf16 %v530_v5, %v530_v5  ;;  %v9341_v5 = vld [vmem:[%s9910_s15 + $0xcb8] sm:$0xff]  }
 0x1a7   : > { %8370 = vmatpush3.bf16.msra.mxu0 %v9269_v11 }
 0x1a8   : > { %8392 = vmatpush3.bf16.msra.mxu1 %v9270_v12  ;;  %8399 = vmatprep.subr.bf16.mxu0 %v9272_v15  ;;  %v786_v11 = vpack.c.bf16 %v532_v8, %v532_v8  ;;  %v783_v12 = vpack.c.bf16 %v523_v0, %v523_v0  ;;  %v9309_v15 = vld [vmem:[%s9910_s15 + $0xb70] sm:$0xff]   ;;  %v9339_v0 = vld [vmem:[%s9910_s15 + $0xcf8] sm:$0xff]  }
 0x1a9   : > { %8421 = vmatprep.subr.bf16.mxu1 %v9273_v18  ;;  %v9344_v8 = vld [vmem:[%s9910_s15 + $0xc30] sm:$0xff]  }
 0x1aa   : > { %v8107_v27 = vpop.f32.mrf.mxu0  ;;  %6371 = vmatmul.mubr.bf16.vlgmr.msra.gmra.mxu0 %v779_v21  ;;  %v9313_v21 = vld [vmem:[%s9910_s15 + $0xb68] sm:$0xff]  }
 0x1ab   : > { %v8129_v28 = vpop.f32.mrf.mxu1  ;;  %6411 = vmatmul.mubr.bf16.vlgmr.msra.gmra.mxu1 %v781_v22  ;;  %8400 = vmatpush3.bf16.msra.mxu0 %v9274_v19 }
 0x1ac   : > { %8422 = vmatpush3.bf16.msra.mxu1 %v9275_v23  ;;  %v8108_v31 = vpop.f32.mrf.mxu0  ;;  %8401 = vmatprep.subr.bf16.mxu0 %v9276_v24  ;;  %v9314_v24 = vld [vmem:[%s9910_s15 + $0xbe8] sm:$0xff]  }
 0x1ad   : > { %v8130_v32 = vpop.f32.mrf.mxu1  ;;  %8423 = vmatprep.subr.bf16.mxu1 %v9277_v25  ;;  %v8109_v34 = vadd.f32 %v8108_v31, %v8107_v27  ;;  %6450 = vmatprep.mubr.bf16.mxu0 %v784_v7  ;;  %v9315_v27 = vld [vmem:[%s9910_s15 + $0xb28] sm:$0xff]   ;;  %v9343_v7 = vld [vmem:[%s9910_s15 + $0xcf0] sm:$0xff]  }
 0x1ae   : > { %v8131_v35 = vadd.f32 %v8130_v32, %v8129_v28  ;;  %v8110_v37 = vpop.f32.mrf.mxu0  ;;  %6490 = vmatprep.mubr.bf16.mxu1 %v786_v11  ;;  %v9317_v32 = vld [vmem:[%s9910_s15 + $0xb60] sm:$0xff]   ;;  %v9345_v11 = vld [vmem:[%s9910_s15 + $0xcb0] sm:$0xff]  }
 0x1af   : > { %v8132_v38 = vpop.f32.mrf.mxu1  ;;  %v5893_v40 = vadd.f32 %v8109_v34, %v10269_v55  ;;  %8402 = vmatpush3.bf16.msra.mxu0 %v9278_v26  ;;  %v9294_v55 = vld [vmem:[%s9910_s15 + $0xa10] sm:$0xff]   ;;  %v9319_v37 = vld [vmem:[%s9910_s15 + $0xb20] sm:$0xff]  }
 0x1b0   : > { %8424 = vmatpush3.bf16.msra.mxu1 %v9279_v29  ;;  %v8111_v43 = vpop.f32.mrf.mxu0  ;;  %8403 = vmatprep.subr.bf16.mxu0 %v9280_v30  ;;  %v9316_v30 = vld [vmem:[%s9910_s15 + $0xba8] sm:$0xff]   ;;  %v9320_v38 = vld [vmem:[%s9910_s15 + $0xba0] sm:$0xff]  }
 0x1b1   : > { %v8133_v44 = vpop.f32.mrf.mxu1  ;;  %8425 = vmatprep.subr.bf16.mxu1 %v9281_v33  ;;  %v10307_v46 = vadd.f32 %v8131_v35, %v5893_v40  ;;  %v9318_v35 = vld [vmem:[%s9910_s15 + $0xbe0] sm:$0xff]   ;;  %v9322_v40 = vld [vmem:[%s9910_s15 + $0xbd8] sm:$0xff]  }
 0x1b2   : > { %v9324_v43 = vld [vmem:[%s9910_s15 + $0xb98] sm:$0xff]   ;;  %v9325_v44 = vld [vmem:[%s9910_s15 + $0xb50] sm:$0xff]  }
 0x1b3   : > { %8404 = vmatpush3.bf16.msra.mxu0 %v9282_v36 }
 0x1b4   : > { %8426 = vmatpush3.bf16.msra.mxu1 %v9283_v39  ;;  %8405 = vmatprep.subr.bf16.mxu0 %v9284_v41  ;;  %v9321_v39 = vld [vmem:[%s9910_s15 + $0xb58] sm:$0xff]  }
 0x1b5   : > { %8427 = vmatprep.subr.bf16.mxu1 %v9285_v45  ;;  %v9323_v41 = vld [vmem:[%s9910_s15 + $0xb18] sm:$0xff]   ;;  %v9326_v45 = vld [vmem:[%s9910_s15 + $0xbd0] sm:$0xff]  }
 0x1b7   : > { %8406 = vmatpush3.bf16.msra.mxu0 %v9286_v47  ;;  %v9328_v47 = vld [vmem:[%s9910_s15 + $0xb90] sm:$0xff]  }
 0x1b8   : > { %8428 = vmatpush3.bf16.msra.mxu1 %v9287_v48  ;;  %8407 = vmatprep.subr.bf16.mxu0 %v9288_v49  ;;  %v9329_v48 = vld [vmem:[%s9910_s15 + $0xb48] sm:$0xff]  }
 0x1b9   : > { %8429 = vmatprep.subr.bf16.mxu1 %v9289_v50  ;;  %v9330_v49 = vld [vmem:[%s9910_s15 + $0xbc8] sm:$0xff]  }
 0x1ba   : > { %v9331_v50 = vld [vmem:[%s9910_s15 + $0xb08] sm:$0xff]  }
 0x1bb   : > { %8408 = vmatpush3.bf16.msra.mxu0 %v9290_v51  ;;  %v9332_v51 = vld [vmem:[%s9910_s15 + $0xb88] sm:$0xff]  }
 0x1bc   : > { %8430 = vmatpush3.bf16.msra.mxu1 %v9291_v52  ;;  %8409 = vmatprep.subr.bf16.mxu0 %v9292_v53  ;;  %v9333_v52 = vld [vmem:[%s9910_s15 + $0xb40] sm:$0xff]   ;;  %v319_v53 = vld [vmem:[%s9928_s13 + $0x58] sm:$0xff] }
 0x1bd   : > { %8431 = vmatprep.subr.bf16.mxu1 %v9293_v54  ;;  %v9334_v54 = vld [vmem:[%s9910_s15 + $0xbc0] sm:$0xff]  }
 0x1bf   : > { %8410 = vmatpush3.bf16.msra.mxu0 %v9294_v55  ;;  %v540_v55 = vrot.slane %v319_v53, %v9967_v42 }
 0x1c0   : > { %8432 = vmatpush3.bf16.msra.mxu1 %v9295_v56  ;;  %8411 = vmatprep.subr.bf16.mxu0 %v9296_v57  ;;  %v533_v56 = vcombine.high %v319_v53, %v319_v53  ;;  %v9335_v57 = vld [vmem:[%s9910_s15 + $0xb00] sm:$0xff]   ;;  %v9372_v53 = vld [vmem:[%s9910_s15 + $0xdf8] sm:$0xff]  }
 0x1c1   : > { %8433 = vmatprep.subr.bf16.mxu1 %v9297_v58  ;;  %v9336_v58 = vld [vmem:[%s9910_s15 + $0xb80] sm:$0xff]  }
 0x1c3   : > { %8412 = vmatpush3.bf16.msra.mxu0 %v9298_v59  ;;  %v548_v59 = vcombine.high %v540_v55, %v540_v55 }
 0x1c4   : > { %8434 = vmatpush3.bf16.msra.mxu1 %v9299_v60  ;;  %8413 = vmatprep.subr.bf16.mxu0 %v9300_v61  ;;  %v547_v60 = vrot.slane %v533_v56, %v9967_v42  ;;  %v9338_v61 = vld [vmem:[%s9910_s15 + $0xc78] sm:$0xff]  }
 0x1c5   : > { %8435 = vmatprep.subr.bf16.mxu1 %v9301_v63  ;;  %v788_v62 = vpack.c.bf16 %v548_v59, %v548_v59  ;;  %v9373_v56 = vld [vmem:[%s9910_s15 + $0xd38] sm:$0xff]  }
 0x1c6   : > { %v549_v63 = vcombine.high %v547_v60, %v547_v60  ;;  %v789_v4 = vpack.c.bf16 %v547_v60, %v547_v60  ;;  %v9374_v59 = vld [vmem:[%s9910_s15 + $0xdb8] sm:$0xff]  }
 0x1c7   : > { %8414 = vmatpush3.bf16.msra.mxu0 %v9302_v2 }
 0x1c8   : > { %8436 = vmatpush3.bf16.msra.mxu1 %v9303_v3  ;;  %8443 = vmatprep.subr.bf16.mxu0 %v9305_v6  ;;  %v790_v2 = vpack.c.bf16 %v549_v63, %v549_v63  ;;  %v787_v3 = vpack.c.bf16 %v540_v55, %v540_v55  ;;  %v9342_v6 = vld [vmem:[%s9910_s15 + $0xc70] sm:$0xff]  }
 0x1c9   : > { %8465 = vmatprep.subr.bf16.mxu1 %v9306_v9  ;;  %v9377_v63 = vld [vmem:[%s9910_s15 + $0xd30] sm:$0xff]  }
 0x1ca   : > { %v8151_v18 = vpop.f32.mrf.mxu0  ;;  %6451 = vmatmul.mubr.bf16.vlgmr.msra.gmra.mxu0 %v783_v12  ;;  %v9346_v12 = vld [vmem:[%s9910_s15 + $0xc68] sm:$0xff]  }
 0x1cb   : > { %v8173_v19 = vpop.f32.mrf.mxu1  ;;  %6491 = vmatmul.mubr.bf16.vlgmr.msra.gmra.mxu1 %v785_v13  ;;  %8444 = vmatpush3.bf16.msra.mxu0 %v9307_v10 }
 0x1cc   : > { %8466 = vmatpush3.bf16.msra.mxu1 %v9308_v14  ;;  %v8152_v22 = vpop.f32.mrf.mxu0  ;;  %8445 = vmatprep.subr.bf16.mxu0 %v9309_v15  ;;  %v9347_v15 = vld [vmem:[%s9910_s15 + $0xce8] sm:$0xff]  }
 0x1cd   : > { %v8174_v23 = vpop.f32.mrf.mxu1  ;;  %8467 = vmatprep.subr.bf16.mxu1 %v9310_v16  ;;  %v8153_v25 = vadd.f32 %v8152_v22, %v8151_v18  ;;  %6530 = vmatprep.mubr.bf16.mxu0 %v788_v62  ;;  %v9348_v18 = vld [vmem:[%s9910_s15 + $0xc28] sm:$0xff]   ;;  %v9376_v62 = vld [vmem:[%s9910_s15 + $0xdf0] sm:$0xff]  }
 0x1ce   : > { %v8175_v26 = vadd.f32 %v8174_v23, %v8173_v19  ;;  %v8154_v28 = vpop.f32.mrf.mxu0  ;;  %6570 = vmatprep.mubr.bf16.mxu1 %v790_v2  ;;  %v9350_v23 = vld [vmem:[%s9910_s15 + $0xc60] sm:$0xff]   ;;  %v9378_v2 = vld [vmem:[%s9910_s15 + $0xdb0] sm:$0xff]  }
 0x1cf   : > { %v8176_v29 = vpop.f32.mrf.mxu1  ;;  %v5973_v31 = vadd.f32 %v8153_v25, %v10307_v46  ;;  %8446 = vmatpush3.bf16.msra.mxu0 %v9311_v17  ;;  %v9327_v46 = vld [vmem:[%s9910_s15 + $0xb10] sm:$0xff]   ;;  %v9352_v28 = vld [vmem:[%s9910_s15 + $0xc20] sm:$0xff]  }
 0x1d0   : > { %8468 = vmatpush3.bf16.msra.mxu1 %v9312_v20  ;;  %v8155_v33 = vpop.f32.mrf.mxu0  ;;  %8447 = vmatprep.subr.bf16.mxu0 %v9313_v21  ;;  %v9349_v21 = vld [vmem:[%s9910_s15 + $0xca8] sm:$0xff]   ;;  %v9353_v29 = vld [vmem:[%s9910_s15 + $0xca0] sm:$0xff]  }
 0x1d1   : > { %v8177_v34 = vpop.f32.mrf.mxu1  ;;  %8469 = vmatprep.subr.bf16.mxu1 %v9314_v24  ;;  %v10345_v36 = vadd.f32 %v8175_v26, %v5973_v31  ;;  %v9351_v26 = vld [vmem:[%s9910_s15 + $0xce0] sm:$0xff]   ;;  %v9355_v31 = vld [vmem:[%s9910_s15 + $0xcd8] sm:$0xff]  }
 0x1d2   : > { %v9357_v33 = vld [vmem:[%s9910_s15 + $0xc98] sm:$0xff]   ;;  %v9358_v34 = vld [vmem:[%s9910_s15 + $0xc50] sm:$0xff]  }
 0x1d3   : > { %8448 = vmatpush3.bf16.msra.mxu0 %v9315_v27 }
 0x1d4   : > { %8470 = vmatpush3.bf16.msra.mxu1 %v9316_v30  ;;  %8449 = vmatprep.subr.bf16.mxu0 %v9317_v32  ;;  %v9354_v30 = vld [vmem:[%s9910_s15 + $0xc58] sm:$0xff]  }
 0x1d5   : > { %8471 = vmatprep.subr.bf16.mxu1 %v9318_v35  ;;  %v9356_v32 = vld [vmem:[%s9910_s15 + $0xc18] sm:$0xff]   ;;  %v9359_v35 = vld [vmem:[%s9910_s15 + $0xcd0] sm:$0xff]  }
 0x1d7   : > { %8450 = vmatpush3.bf16.msra.mxu0 %v9319_v37  ;;  %v9361_v37 = vld [vmem:[%s9910_s15 + $0xc90] sm:$0xff]  }
 0x1d8   : > { %8472 = vmatpush3.bf16.msra.mxu1 %v9320_v38  ;;  %8451 = vmatprep.subr.bf16.mxu0 %v9321_v39  ;;  %v9362_v38 = vld [vmem:[%s9910_s15 + $0xc48] sm:$0xff]  }
 0x1d9   : > { %8473 = vmatprep.subr.bf16.mxu1 %v9322_v40  ;;  %v9363_v39 = vld [vmem:[%s9910_s15 + $0xcc8] sm:$0xff]  }
 0x1da   : > { %v9364_v40 = vld [vmem:[%s9910_s15 + $0xc08] sm:$0xff]  }
 0x1db   : > { %8452 = vmatpush3.bf16.msra.mxu0 %v9323_v41  ;;  %v9365_v41 = vld [vmem:[%s9910_s15 + $0xc88] sm:$0xff]  }
 0x1dc   : > { %8474 = vmatpush3.bf16.msra.mxu1 %v9324_v43  ;;  %8453 = vmatprep.subr.bf16.mxu0 %v9325_v44  ;;  %v9366_v43 = vld [vmem:[%s9910_s15 + $0xc40] sm:$0xff]  }
 0x1dd   : > { %8475 = vmatprep.subr.bf16.mxu1 %v9326_v45  ;;  %v9367_v44 = vld [vmem:[%s9910_s15 + $0xcc0] sm:$0xff]  }
 0x1de   : > { %v320_v45 = vld [vmem:[%s9928_s13 + $0x60] sm:$0xff] }
 0x1df   : > { %8454 = vmatpush3.bf16.msra.mxu0 %v9327_v46  ;;  %v9368_v46 = vld [vmem:[%s9910_s15 + $0xc00] sm:$0xff]  }
 0x1e0   : > { %8476 = vmatpush3.bf16.msra.mxu1 %v9328_v47  ;;  %8455 = vmatprep.subr.bf16.mxu0 %v9329_v48  ;;  %v557_v47 = vrot.slane %v320_v45, %v9967_v42  ;;  %v550_v48 = vcombine.high %v320_v45, %v320_v45 }
 0x1e1   : > { %8477 = vmatprep.subr.bf16.mxu1 %v9330_v49  ;;  %v9369_v49 = vld [vmem:[%s9910_s15 + $0xc80] sm:$0xff]  }
 0x1e3   : > { %8456 = vmatpush3.bf16.msra.mxu0 %v9331_v50  ;;  %v565_v50 = vcombine.high %v557_v47, %v557_v47 }
 0x1e4   : > { %8478 = vmatpush3.bf16.msra.mxu1 %v9332_v51  ;;  %8457 = vmatprep.subr.bf16.mxu0 %v9333_v52  ;;  %v564_v51 = vrot.slane %v550_v48, %v9967_v42  ;;  %v9371_v52 = vld [vmem:[%s9910_s15 + $0xd78] sm:$0xff]  }
 0x1e5   : > { %8479 = vmatprep.subr.bf16.mxu1 %v9334_v54  ;;  %v792_v54 = vpack.c.bf16 %v565_v50, %v565_v50  ;;  %v9407_v50 = vld [vmem:[%s9910_s15 + $0xeb8] sm:$0xff]  }
 0x1e6   : > { %v566_v55 = vcombine.high %v564_v51, %v564_v51 }
 0x1e7   : > { %8458 = vmatpush3.bf16.msra.mxu0 %v9335_v57  ;;  %v791_v57 = vpack.c.bf16 %v557_v47, %v557_v47  ;;  %v9406_v47 = vld [vmem:[%s9910_s15 + $0xe38] sm:$0xff]  }
 0x1e8   : > { %8480 = vmatpush3.bf16.msra.mxu1 %v9336_v58  ;;  %8487 = vmatprep.subr.bf16.mxu0 %v9338_v61  ;;  %v793_v58 = vpack.c.bf16 %v564_v51, %v564_v51  ;;  %v794_v60 = vpack.c.bf16 %v566_v55, %v566_v55  ;;  %v9375_v61 = vld [vmem:[%s9910_s15 + $0xd70] sm:$0xff]  }
 0x1e9   : > { %8509 = vmatprep.subr.bf16.mxu1 %v9339_v0 }
 0x1ea   : > { %v8195_v9 = vpop.f32.mrf.mxu0  ;;  %6531 = vmatmul.mubr.bf16.vlgmr.msra.gmra.mxu0 %v787_v3  ;;  %v9379_v3 = vld [vmem:[%s9910_s15 + $0xd68] sm:$0xff]  }
 0x1eb   : > { %v8217_v10 = vpop.f32.mrf.mxu1  ;;  %6571 = vmatmul.mubr.bf16.vlgmr.msra.gmra.mxu1 %v789_v4  ;;  %8488 = vmatpush3.bf16.msra.mxu0 %v9340_v1 }
 0x1ec   : > { %8510 = vmatpush3.bf16.msra.mxu1 %v9341_v5  ;;  %v8196_v13 = vpop.f32.mrf.mxu0  ;;  %8489 = vmatprep.subr.bf16.mxu0 %v9342_v6  ;;  %v9380_v6 = vld [vmem:[%s9910_s15 + $0xde8] sm:$0xff]  }
 0x1ed   : > { %v8218_v14 = vpop.f32.mrf.mxu1  ;;  %8511 = vmatprep.subr.bf16.mxu1 %v9343_v7  ;;  %v8197_v16 = vadd.f32 %v8196_v13, %v8195_v9  ;;  %6610 = vmatprep.mubr.bf16.mxu0 %v792_v54  ;;  %v9381_v9 = vld [vmem:[%s9910_s15 + $0xd28] sm:$0xff]   ;;  %v9410_v54 = vld [vmem:[%s9910_s15 + $0xe30] sm:$0xff]  }
 0x1ee   : > { %v8219_v17 = vadd.f32 %v8218_v14, %v8217_v10  ;;  %v8198_v19 = vpop.f32.mrf.mxu0  ;;  %6650 = vmatprep.mubr.bf16.mxu1 %v794_v60  ;;  %v9383_v14 = vld [vmem:[%s9910_s15 + $0xd60] sm:$0xff]  }
 0x1ef   : > { %v8220_v20 = vpop.f32.mrf.mxu1  ;;  %v6053_v22 = vadd.f32 %v8197_v16, %v10345_v36  ;;  %8490 = vmatpush3.bf16.msra.mxu0 %v9344_v8  ;;  %v9360_v36 = vld [vmem:[%s9910_s15 + $0xc10] sm:$0xff]   ;;  %v9385_v19 = vld [vmem:[%s9910_s15 + $0xd20] sm:$0xff]  }
 0x1f0   : > { %8512 = vmatpush3.bf16.msra.mxu1 %v9345_v11  ;;  %v8199_v24 = vpop.f32.mrf.mxu0  ;;  %8491 = vmatprep.subr.bf16.mxu0 %v9346_v12  ;;  %v9382_v12 = vld [vmem:[%s9910_s15 + $0xda8] sm:$0xff]   ;;  %v9386_v20 = vld [vmem:[%s9910_s15 + $0xda0] sm:$0xff]  }
 0x1f1   : > { %v8221_v25 = vpop.f32.mrf.mxu1  ;;  %8513 = vmatprep.subr.bf16.mxu1 %v9347_v15  ;;  %v10383_v27 = vadd.f32 %v8219_v17, %v6053_v22  ;;  %v9384_v17 = vld [vmem:[%s9910_s15 + $0xde0] sm:$0xff]   ;;  %v9388_v22 = vld [vmem:[%s9910_s15 + $0xdd8] sm:$0xff]  }
 0x1f2   : > { %v9390_v24 = vld [vmem:[%s9910_s15 + $0xd98] sm:$0xff]   ;;  %v9391_v25 = vld [vmem:[%s9910_s15 + $0xd50] sm:$0xff]  }
 0x1f3   : > { %8492 = vmatpush3.bf16.msra.mxu0 %v9348_v18 }
 0x1f4   : > { %8514 = vmatpush3.bf16.msra.mxu1 %v9349_v21  ;;  %8493 = vmatprep.subr.bf16.mxu0 %v9350_v23  ;;  %v9387_v21 = vld [vmem:[%s9910_s15 + $0xd58] sm:$0xff]  }
 0x1f5   : > { %8515 = vmatprep.subr.bf16.mxu1 %v9351_v26  ;;  %v9389_v23 = vld [vmem:[%s9910_s15 + $0xd18] sm:$0xff]   ;;  %v9392_v26 = vld [vmem:[%s9910_s15 + $0xdd0] sm:$0xff]  }
 0x1f7   : > { %8494 = vmatpush3.bf16.msra.mxu0 %v9352_v28  ;;  %v9394_v28 = vld [vmem:[%s9910_s15 + $0xd90] sm:$0xff]  }
 0x1f8   : > { %8516 = vmatpush3.bf16.msra.mxu1 %v9353_v29  ;;  %8495 = vmatprep.subr.bf16.mxu0 %v9354_v30  ;;  %v9395_v29 = vld [vmem:[%s9910_s15 + $0xd48] sm:$0xff]  }
 0x1f9   : > { %8517 = vmatprep.subr.bf16.mxu1 %v9355_v31  ;;  %v9396_v30 = vld [vmem:[%s9910_s15 + $0xdc8] sm:$0xff]  }
 0x1fa   : > { %v9397_v31 = vld [vmem:[%s9910_s15 + $0xd08] sm:$0xff]  }
 0x1fb   : > { %8496 = vmatpush3.bf16.msra.mxu0 %v9356_v32  ;;  %v9398_v32 = vld [vmem:[%s9910_s15 + $0xd88] sm:$0xff]  }
 0x1fc   : > { %8518 = vmatpush3.bf16.msra.mxu1 %v9357_v33  ;;  %8497 = vmatprep.subr.bf16.mxu0 %v9358_v34  ;;  %v9399_v33 = vld [vmem:[%s9910_s15 + $0xd40] sm:$0xff]  }
 0x1fd   : > { %8519 = vmatprep.subr.bf16.mxu1 %v9359_v35  ;;  %v9400_v34 = vld [vmem:[%s9910_s15 + $0xdc0] sm:$0xff]  }
 0x1fe   : > { %v321_v35 = vld [vmem:[%s9928_s13 + $0x68] sm:$0xff] }
 0x1ff   : > { %8498 = vmatpush3.bf16.msra.mxu0 %v9360_v36  ;;  %v9401_v36 = vld [vmem:[%s9910_s15 + $0xd00] sm:$0xff]  }
 0x200   : > { %8520 = vmatpush3.bf16.msra.mxu1 %v9361_v37  ;;  %8499 = vmatprep.subr.bf16.mxu0 %v9362_v38  ;;  %v574_v37 = vrot.slane %v321_v35, %v9967_v42  ;;  %v567_v38 = vcombine.high %v321_v35, %v321_v35 }
 0x201   : > { %8521 = vmatprep.subr.bf16.mxu1 %v9363_v39  ;;  %v9402_v39 = vld [vmem:[%s9910_s15 + $0xd80] sm:$0xff]  }
 0x202   : > { %v795_v48 = vpack.c.bf16 %v574_v37, %v574_v37 }
 0x203   : > { %8500 = vmatpush3.bf16.msra.mxu0 %v9364_v40  ;;  %v582_v40 = vcombine.high %v574_v37, %v574_v37  ;;  %v9439_v37 = vld [vmem:[%s9910_s15 + $0xf38] sm:$0xff]  }
 0x204   : > { %8522 = vmatpush3.bf16.msra.mxu1 %v9365_v41  ;;  %8501 = vmatprep.subr.bf16.mxu0 %v9366_v43  ;;  %v581_v41 = vrot.slane %v567_v38, %v9967_v42  ;;  %v9404_v43 = vld [vmem:[%s9910_s15 + $0xe78] sm:$0xff]  }
 0x205   : > { %8523 = vmatprep.subr.bf16.mxu1 %v9367_v44  ;;  %v9405_v44 = vld [vmem:[%s9910_s15 + $0xef8] sm:$0xff]   ;;  %v796_v45 = vpack.c.bf16 %v582_v40, %v582_v40 }
 0x206   : > { %v9440_v40 = vld [vmem:[%s9910_s15 + $0xfb8] sm:$0xff]  }
 0x207   : > { %8502 = vmatpush3.bf16.msra.mxu0 %v9368_v46  ;;  %v583_v46 = vcombine.high %v581_v41, %v581_v41 }
 0x208   : > { %8524 = vmatpush3.bf16.msra.mxu1 %v9369_v49  ;;  %8531 = vmatprep.subr.bf16.mxu0 %v9371_v52  ;;  %v797_v49 = vpack.c.bf16 %v581_v41, %v581_v41  ;;  %v9408_v52 = vld [vmem:[%s9910_s15 + $0xe70] sm:$0xff]  }
 0x209   : > { %8553 = vmatprep.subr.bf16.mxu1 %v9372_v53  ;;  %v798_v51 = vpack.c.bf16 %v583_v46, %v583_v46  ;;  %v9409_v53 = vld [vmem:[%s9910_s15 + $0xef0] sm:$0xff]  }
 0x20a   : > { %v8239_v0 = vpop.f32.mrf.mxu0  ;;  %6611 = vmatmul.mubr.bf16.vlgmr.msra.gmra.mxu0 %v791_v57  ;;  %v9411_v57 = vld [vmem:[%s9910_s15 + $0xeb0] sm:$0xff]  }
 0x20b   : > { %v8261_v1 = vpop.f32.mrf.mxu1  ;;  %6651 = vmatmul.mubr.bf16.vlgmr.msra.gmra.mxu1 %v793_v58  ;;  %8532 = vmatpush3.bf16.msra.mxu0 %v9373_v56  ;;  %v9412_v58 = vld [vmem:[%s9910_s15 + $0xe68] sm:$0xff]  }
 0x20c   : > { %8554 = vmatpush3.bf16.msra.mxu1 %v9374_v59  ;;  %v8240_v4 = vpop.f32.mrf.mxu0  ;;  %8533 = vmatprep.subr.bf16.mxu0 %v9375_v61  ;;  %v9413_v61 = vld [vmem:[%s9910_s15 + $0xee8] sm:$0xff]  }
 0x20d   : > { %v8262_v5 = vpop.f32.mrf.mxu1  ;;  %8555 = vmatprep.subr.bf16.mxu1 %v9376_v62  ;;  %v8241_v7 = vadd.f32 %v8240_v4, %v8239_v0  ;;  %6690 = vmatprep.mubr.bf16.mxu0 %v796_v45  ;;  %v9414_v0 = vld [vmem:[%s9910_s15 + $0xe28] sm:$0xff]   ;;  %v9443_v45 = vld [vmem:[%s9910_s15 + $0xf30] sm:$0xff]  }
 0x20e   : > { %v8263_v8 = vadd.f32 %v8262_v5, %v8261_v1  ;;  %v8242_v10 = vpop.f32.mrf.mxu0  ;;  %6730 = vmatprep.mubr.bf16.mxu1 %v798_v51  ;;  %v9416_v5 = vld [vmem:[%s9910_s15 + $0xe60] sm:$0xff]  }
 0x20f   : > { %v8264_v11 = vpop.f32.mrf.mxu1  ;;  %v6133_v13 = vadd.f32 %v8241_v7, %v10383_v27  ;;  %8534 = vmatpush3.bf16.msra.mxu0 %v9377_v63  ;;  %v9393_v27 = vld [vmem:[%s9910_s15 + $0xd10] sm:$0xff]   ;;  %v9418_v10 = vld [vmem:[%s9910_s15 + $0xe20] sm:$0xff]  }
 0x210   : > { %8556 = vmatpush3.bf16.msra.mxu1 %v9378_v2  ;;  %v8243_v15 = vpop.f32.mrf.mxu0  ;;  %8535 = vmatprep.subr.bf16.mxu0 %v9379_v3  ;;  %v9415_v3 = vld [vmem:[%s9910_s15 + $0xea8] sm:$0xff]   ;;  %v9419_v11 = vld [vmem:[%s9910_s15 + $0xea0] sm:$0xff]  }
 0x211   : > { %v8265_v16 = vpop.f32.mrf.mxu1  ;;  %8557 = vmatprep.subr.bf16.mxu1 %v9380_v6  ;;  %v10421_v18 = vadd.f32 %v8263_v8, %v6133_v13  ;;  %v9417_v8 = vld [vmem:[%s9910_s15 + $0xee0] sm:$0xff]   ;;  %v9421_v13 = vld [vmem:[%s9910_s15 + $0xed8] sm:$0xff]  }
 0x212   : > { %v9423_v15 = vld [vmem:[%s9910_s15 + $0xe98] sm:$0xff]   ;;  %v9424_v16 = vld [vmem:[%s9910_s15 + $0xe50] sm:$0xff]  }
 0x213   : > { %8536 = vmatpush3.bf16.msra.mxu0 %v9381_v9 }
 0x214   : > { %8558 = vmatpush3.bf16.msra.mxu1 %v9382_v12  ;;  %8537 = vmatprep.subr.bf16.mxu0 %v9383_v14  ;;  %v9420_v12 = vld [vmem:[%s9910_s15 + $0xe58] sm:$0xff]  }
 0x215   : > { %8559 = vmatprep.subr.bf16.mxu1 %v9384_v17  ;;  %v9422_v14 = vld [vmem:[%s9910_s15 + $0xe18] sm:$0xff]   ;;  %v9425_v17 = vld [vmem:[%s9910_s15 + $0xed0] sm:$0xff]  }
 0x217   : > { %8538 = vmatpush3.bf16.msra.mxu0 %v9385_v19  ;;  %v9427_v19 = vld [vmem:[%s9910_s15 + $0xe90] sm:$0xff]  }
 0x218   : > { %8560 = vmatpush3.bf16.msra.mxu1 %v9386_v20  ;;  %8539 = vmatprep.subr.bf16.mxu0 %v9387_v21  ;;  %v9428_v20 = vld [vmem:[%s9910_s15 + $0xe48] sm:$0xff]  }
 0x219   : > { %8561 = vmatprep.subr.bf16.mxu1 %v9388_v22  ;;  %v9429_v21 = vld [vmem:[%s9910_s15 + $0xec8] sm:$0xff]  }
 0x21a   : > { %v9430_v22 = vld [vmem:[%s9910_s15 + $0xe08] sm:$0xff]  }
 0x21b   : > { %8540 = vmatpush3.bf16.msra.mxu0 %v9389_v23  ;;  %v9431_v23 = vld [vmem:[%s9910_s15 + $0xe88] sm:$0xff]  }
 0x21c   : > { %8562 = vmatpush3.bf16.msra.mxu1 %v9390_v24  ;;  %8541 = vmatprep.subr.bf16.mxu0 %v9391_v25  ;;  %v9432_v24 = vld [vmem:[%s9910_s15 + $0xe40] sm:$0xff]  }
 0x21d   : > { %8563 = vmatprep.subr.bf16.mxu1 %v9392_v26  ;;  %v9433_v25 = vld [vmem:[%s9910_s15 + $0xec0] sm:$0xff]   ;;  %v322_v26 = vld [vmem:[%s9928_s13 + $0x70] sm:$0xff] }
 0x21f   : > { %8542 = vmatpush3.bf16.msra.mxu0 %v9393_v27  ;;  %v9434_v27 = vld [vmem:[%s9910_s15 + $0xe00] sm:$0xff]  }
 0x220   : > { %8564 = vmatpush3.bf16.msra.mxu1 %v9394_v28  ;;  %8543 = vmatprep.subr.bf16.mxu0 %v9395_v29  ;;  %v591_v28 = vrot.slane %v322_v26, %v9967_v42  ;;  %v584_v29 = vcombine.high %v322_v26, %v322_v26 }
 0x221   : > { %8565 = vmatprep.subr.bf16.mxu1 %v9396_v30  ;;  %v9435_v30 = vld [vmem:[%s9910_s15 + $0xe80] sm:$0xff]  }
 0x222   : > { %v799_v38 = vpack.c.bf16 %v591_v28, %v591_v28 }
 0x223   : > { %8544 = vmatpush3.bf16.msra.mxu0 %v9397_v31  ;;  %v599_v31 = vcombine.high %v591_v28, %v591_v28 }
 0x224   : > { %8566 = vmatpush3.bf16.msra.mxu1 %v9398_v32  ;;  %8545 = vmatprep.subr.bf16.mxu0 %v9399_v33  ;;  %v598_v32 = vrot.slane %v584_v29, %v9967_v42  ;;  %v9437_v33 = vld [vmem:[%s9910_s15 + $0xf78] sm:$0xff]  }
 0x225   : > { %8567 = vmatprep.subr.bf16.mxu1 %v9400_v34  ;;  %v9438_v34 = vld [vmem:[%s9910_s15 + $0xff8] sm:$0xff]   ;;  %v800_v35 = vpack.c.bf16 %v599_v31, %v599_v31 }
 0x226   : > { %v9472_v29 = vld [vmem:[%s9910_s15 + $0x1038] sm:$0xff]  }
 0x227   : > { %8546 = vmatpush3.bf16.msra.mxu0 %v9401_v36  ;;  %v600_v36 = vcombine.high %v598_v32, %v598_v32  ;;  %v9473_v31 = vld [vmem:[%s9910_s15 + $0x10b8] sm:$0xff]  }
 0x228   : > { %8568 = vmatpush3.bf16.msra.mxu1 %v9402_v39  ;;  %8575 = vmatprep.subr.bf16.mxu0 %v9404_v43  ;;  %v801_v39 = vpack.c.bf16 %v598_v32, %v598_v32  ;;  %v9441_v43 = vld [vmem:[%s9910_s15 + $0xf70] sm:$0xff]  }
 0x229   : > { %8597 = vmatprep.subr.bf16.mxu1 %v9405_v44  ;;  %v802_v41 = vpack.c.bf16 %v600_v36, %v600_v36  ;;  %v9442_v44 = vld [vmem:[%s9910_s15 + $0xff0] sm:$0xff]  }
 0x22a   : > { %v8283_v55 = vpop.f32.mrf.mxu0  ;;  %6691 = vmatmul.mubr.bf16.vlgmr.msra.gmra.mxu0 %v795_v48  ;;  %v9444_v48 = vld [vmem:[%s9910_s15 + $0xfb0] sm:$0xff]  }
 0x22b   : > { %v8305_v56 = vpop.f32.mrf.mxu1  ;;  %6731 = vmatmul.mubr.bf16.vlgmr.msra.gmra.mxu1 %v797_v49  ;;  %8576 = vmatpush3.bf16.msra.mxu0 %v9406_v47  ;;  %v9445_v49 = vld [vmem:[%s9910_s15 + $0xf68] sm:$0xff]  }
 0x22c   : > { %8598 = vmatpush3.bf16.msra.mxu1 %v9407_v50  ;;  %v8284_v59 = vpop.f32.mrf.mxu0  ;;  %8577 = vmatprep.subr.bf16.mxu0 %v9408_v52  ;;  %v9446_v52 = vld [vmem:[%s9910_s15 + $0xfe8] sm:$0xff]  }
 0x22d   : > { %v8306_v60 = vpop.f32.mrf.mxu1  ;;  %8599 = vmatprep.subr.bf16.mxu1 %v9409_v53  ;;  %v8285_v62 = vadd.f32 %v8284_v59, %v8283_v55  ;;  %6770 = vmatprep.mubr.bf16.mxu0 %v800_v35  ;;  %v9447_v55 = vld [vmem:[%s9910_s15 + $0xf28] sm:$0xff]  }
 0x22e   : > { %v8307_v63 = vadd.f32 %v8306_v60, %v8305_v56  ;;  %v8286_v1 = vpop.f32.mrf.mxu0  ;;  %6810 = vmatprep.mubr.bf16.mxu1 %v802_v41  ;;  %v9449_v60 = vld [vmem:[%s9910_s15 + $0xf60] sm:$0xff]   ;;  %v9478_v41 = vld [vmem:[%s9910_s15 + $0x1068] sm:$0xff]  }
 0x22f   : > { %v8308_v2 = vpop.f32.mrf.mxu1  ;;  %v6213_v4 = vadd.f32 %v8285_v62, %v10421_v18  ;;  %8578 = vmatpush3.bf16.msra.mxu0 %v9410_v54  ;;  %v9426_v18 = vld [vmem:[%s9910_s15 + $0xe10] sm:$0xff]   ;;  %v9451_v1 = vld [vmem:[%s9910_s15 + $0xf20] sm:$0xff]  }
 0x230   : > { %8600 = vmatpush3.bf16.msra.mxu1 %v9411_v57  ;;  %v8287_v6 = vpop.f32.mrf.mxu0  ;;  %8579 = vmatprep.subr.bf16.mxu0 %v9412_v58  ;;  %v9448_v58 = vld [vmem:[%s9910_s15 + $0xfa8] sm:$0xff]   ;;  %v9452_v2 = vld [vmem:[%s9910_s15 + $0xfa0] sm:$0xff]  }
 0x231   : > { %v8309_v7 = vpop.f32.mrf.mxu1  ;;  %8601 = vmatprep.subr.bf16.mxu1 %v9413_v61  ;;  %v10459_v9 = vadd.f32 %v8307_v63, %v6213_v4  ;;  %v9450_v63 = vld [vmem:[%s9910_s15 + $0xfe0] sm:$0xff]   ;;  %v9454_v4 = vld [vmem:[%s9910_s15 + $0xfd8] sm:$0xff]  }
 0x232   : > { %v9456_v6 = vld [vmem:[%s9910_s15 + $0xf98] sm:$0xff]   ;;  %v9457_v7 = vld [vmem:[%s9910_s15 + $0xf50] sm:$0xff]  }
 0x233   : > { %8580 = vmatpush3.bf16.msra.mxu0 %v9414_v0 }
 0x234   : > { %8602 = vmatpush3.bf16.msra.mxu1 %v9415_v3  ;;  %8581 = vmatprep.subr.bf16.mxu0 %v9416_v5  ;;  %v9453_v3 = vld [vmem:[%s9910_s15 + $0xf58] sm:$0xff]  }
 0x235   : > { %8603 = vmatprep.subr.bf16.mxu1 %v9417_v8  ;;  %v9455_v5 = vld [vmem:[%s9910_s15 + $0xf18] sm:$0xff]   ;;  %v9458_v8 = vld [vmem:[%s9910_s15 + $0xfd0] sm:$0xff]  }
 0x237   : > { %8582 = vmatpush3.bf16.msra.mxu0 %v9418_v10  ;;  %v9460_v10 = vld [vmem:[%s9910_s15 + $0xf90] sm:$0xff]  }
 0x238   : > { %8604 = vmatpush3.bf16.msra.mxu1 %v9419_v11  ;;  %8583 = vmatprep.subr.bf16.mxu0 %v9420_v12  ;;  %v9461_v11 = vld [vmem:[%s9910_s15 + $0xf48] sm:$0xff]  }
 0x239   : > { %8605 = vmatprep.subr.bf16.mxu1 %v9421_v13  ;;  %v9462_v12 = vld [vmem:[%s9910_s15 + $0xfc8] sm:$0xff]  }
 0x23a   : > { %v9463_v13 = vld [vmem:[%s9910_s15 + $0xf08] sm:$0xff]  }
 0x23b   : > { %8584 = vmatpush3.bf16.msra.mxu0 %v9422_v14  ;;  %v9464_v14 = vld [vmem:[%s9910_s15 + $0xf88] sm:$0xff]  }
 0x23c   : > { %8606 = vmatpush3.bf16.msra.mxu1 %v9423_v15  ;;  %8585 = vmatprep.subr.bf16.mxu0 %v9424_v16  ;;  %v9465_v15 = vld [vmem:[%s9910_s15 + $0xf40] sm:$0xff]  }
 0x23d   : > { %8607 = vmatprep.subr.bf16.mxu1 %v9425_v17  ;;  %v9466_v16 = vld [vmem:[%s9910_s15 + $0xfc0] sm:$0xff]   ;;  %v323_v17 = vld [vmem:[%s9928_s13 + $0x78] sm:$0xff] }
 0x23f   : > { %8586 = vmatpush3.bf16.msra.mxu0 %v9426_v18  ;;  %v9467_v18 = vld [vmem:[%s9910_s15 + $0xf00] sm:$0xff]  }
 0x240   : > { %8608 = vmatpush3.bf16.msra.mxu1 %v9427_v19  ;;  %8587 = vmatprep.subr.bf16.mxu0 %v9428_v20  ;;  %v608_v19 = vrot.slane %v323_v17, %v9967_v42  ;;  %v601_v20 = vcombine.high %v323_v17, %v323_v17 }
 0x241   : > { %8609 = vmatprep.subr.bf16.mxu1 %v9429_v21  ;;  %v9468_v21 = vld [vmem:[%s9910_s15 + $0xf80] sm:$0xff]  }
 0x242   : > { %v803_v28 = vpack.c.bf16 %v608_v19, %v608_v19 }
 0x243   : > { %8588 = vmatpush3.bf16.msra.mxu0 %v9430_v22  ;;  %v616_v22 = vcombine.high %v608_v19, %v608_v19 }
 0x244   : > { %8610 = vmatpush3.bf16.msra.mxu1 %v9431_v23  ;;  %8589 = vmatprep.subr.bf16.mxu0 %v9432_v24  ;;  %v615_v23 = vrot.slane %v601_v20, %v9967_v42  ;;  %v9470_v24 = vld [vmem:[%s9910_s15 + $0x1078] sm:$0xff]  }
 0x245   : > { %8611 = vmatprep.subr.bf16.mxu1 %v9433_v25  ;;  %v9471_v25 = vld [vmem:[%s9910_s15 + $0x10f8] sm:$0xff]   ;;  %v804_v26 = vpack.c.bf16 %v616_v22, %v616_v22 }
 0x246   : > { %v9505_v20 = vld [vmem:[%s9910_s15 + $0x1138] sm:$0xff]  }
 0x247   : > { %8590 = vmatpush3.bf16.msra.mxu0 %v9434_v27  ;;  %v617_v27 = vcombine.high %v615_v23, %v615_v23  ;;  %v9506_v22 = vld [vmem:[%s9910_s15 + $0x11b8] sm:$0xff]  }
 0x248   : > { %8612 = vmatpush3.bf16.msra.mxu1 %v9435_v30  ;;  %8619 = vmatprep.subr.bf16.mxu0 %v9437_v33  ;;  %v805_v30 = vpack.c.bf16 %v615_v23, %v615_v23  ;;  %v9474_v33 = vld [vmem:[%s9910_s15 + $0x1070] sm:$0xff]  }
 0x249   : > { %8641 = vmatprep.subr.bf16.mxu1 %v9438_v34  ;;  %v806_v32 = vpack.c.bf16 %v617_v27, %v617_v27  ;;  %v9475_v34 = vld [vmem:[%s9910_s15 + $0x10f0] sm:$0xff]  }
 0x24a   : > { %v8327_v46 = vpop.f32.mrf.mxu0  ;;  %6771 = vmatmul.mubr.bf16.vlgmr.msra.gmra.mxu0 %v799_v38  ;;  %v9477_v38 = vld [vmem:[%s9910_s15 + $0x10b0] sm:$0xff]  }
 0x24b   : > { %v8349_v47 = vpop.f32.mrf.mxu1  ;;  %6811 = vmatmul.mubr.bf16.vlgmr.msra.gmra.mxu1 %v801_v39  ;;  %8620 = vmatpush3.bf16.msra.mxu0 %v9439_v37  ;;  %v9476_v37 = vld [vmem:[%s9910_s15 + $0x1030] sm:$0xff]  }
 0x24c   : > { %8642 = vmatpush3.bf16.msra.mxu1 %v9440_v40  ;;  %v8328_v50 = vpop.f32.mrf.mxu0  ;;  %8621 = vmatprep.subr.bf16.mxu0 %v9441_v43 }
 0x24d   : > { %v8350_v51 = vpop.f32.mrf.mxu1  ;;  %8643 = vmatprep.subr.bf16.mxu1 %v9442_v44  ;;  %v8329_v53 = vadd.f32 %v8328_v50, %v8327_v46  ;;  %6850 = vmatprep.mubr.bf16.mxu0 %v804_v26  ;;  %v9481_v50 = vld [vmem:[%s9910_s15 + $0x10a8] sm:$0xff]  }
 0x24e   : > { %v8351_v54 = vadd.f32 %v8350_v51, %v8349_v47  ;;  %v8330_v56 = vpop.f32.mrf.mxu0  ;;  %6890 = vmatprep.mubr.bf16.mxu1 %v806_v32  ;;  %v9511_v32 = vld [vmem:[%s9910_s15 + $0x1168] sm:$0xff]  }
 0x24f   : > { %v8352_v57 = vpop.f32.mrf.mxu1  ;;  %v6293_v59 = vadd.f32 %v8329_v53, %v10459_v9  ;;  %8622 = vmatpush3.bf16.msra.mxu0 %v9443_v45  ;;  %v9459_v9 = vld [vmem:[%s9910_s15 + $0xf10] sm:$0xff]   ;;  %v9479_v45 = vld [vmem:[%s9910_s15 + $0x10e8] sm:$0xff]   ;;  %v9482_v53 = vld [vmem:[%s9910_s15 + $0x1060] sm:$0xff]  }
 0x250   : > { %8644 = vmatpush3.bf16.msra.mxu1 %v9444_v48  ;;  %v8331_v61 = vpop.f32.mrf.mxu0  ;;  %8623 = vmatprep.subr.bf16.mxu0 %v9445_v49  ;;  %v9480_v48 = vld [vmem:[%s9910_s15 + $0x1028] sm:$0xff]   ;;  %v9484_v56 = vld [vmem:[%s9910_s15 + $0x1020] sm:$0xff]  }
 0x251   : > { %v8353_v62 = vpop.f32.mrf.mxu1  ;;  %8645 = vmatprep.subr.bf16.mxu1 %v9446_v52  ;;  %v10497_v0 = vadd.f32 %v8351_v54, %v6293_v59  ;;  %v9485_v57 = vld [vmem:[%s9910_s15 + $0x10a0] sm:$0xff]   ;;  %v9487_v59 = vld [vmem:[%s9910_s15 + $0x10d8] sm:$0xff]  }
 0x252   : > { %v9489_v61 = vld [vmem:[%s9910_s15 + $0x1098] sm:$0xff]   ;;  %v9490_v62 = vld [vmem:[%s9910_s15 + $0x1050] sm:$0xff]  }
 0x253   : > { %8624 = vmatpush3.bf16.msra.mxu0 %v9447_v55  ;;  %v9483_v55 = vld [vmem:[%s9910_s15 + $0x10e0] sm:$0xff]  }
 0x254   : > { %8646 = vmatpush3.bf16.msra.mxu1 %v9448_v58  ;;  %8625 = vmatprep.subr.bf16.mxu0 %v9449_v60  ;;  %v9486_v58 = vld [vmem:[%s9910_s15 + $0x1058] sm:$0xff]  }
 0x255   : > { %8647 = vmatprep.subr.bf16.mxu1 %v9450_v63  ;;  %v9488_v60 = vld [vmem:[%s9910_s15 + $0x1018] sm:$0xff]   ;;  %v9491_v63 = vld [vmem:[%s9910_s15 + $0x10d0] sm:$0xff]  }
 0x257   : > { %8626 = vmatpush3.bf16.msra.mxu0 %v9451_v1  ;;  %v9493_v1 = vld [vmem:[%s9910_s15 + $0x1090] sm:$0xff]  }
 0x258   : > { %8648 = vmatpush3.bf16.msra.mxu1 %v9452_v2  ;;  %8627 = vmatprep.subr.bf16.mxu0 %v9453_v3  ;;  %v9494_v2 = vld [vmem:[%s9910_s15 + $0x1048] sm:$0xff]  }
 0x259   : > { %8649 = vmatprep.subr.bf16.mxu1 %v9454_v4  ;;  %v9495_v3 = vld [vmem:[%s9910_s15 + $0x10c8] sm:$0xff]  }
 0x25a   : > { %v9496_v4 = vld [vmem:[%s9910_s15 + $0x1008] sm:$0xff]  }
 0x25b   : > { %8628 = vmatpush3.bf16.msra.mxu0 %v9455_v5  ;;  %v9497_v5 = vld [vmem:[%s9910_s15 + $0x1088] sm:$0xff]  }
 0x25c   : > { %8650 = vmatpush3.bf16.msra.mxu1 %v9456_v6  ;;  %8629 = vmatprep.subr.bf16.mxu0 %v9457_v7  ;;  %v9498_v6 = vld [vmem:[%s9910_s15 + $0x1040] sm:$0xff]  }
 0x25d   : > { %8651 = vmatprep.subr.bf16.mxu1 %v9458_v8  ;;  %v9499_v7 = vld [vmem:[%s9910_s15 + $0x10c0] sm:$0xff]  }
 0x25e   : > { %v324_v8 = vld [vmem:[%s9928_s13 + $0x80] sm:$0xff] }
 0x25f   : > { %8630 = vmatpush3.bf16.msra.mxu0 %v9459_v9  ;;  %v9500_v9 = vld [vmem:[%s9910_s15 + $0x1000] sm:$0xff]  }
 0x260   : > { %8652 = vmatpush3.bf16.msra.mxu1 %v9460_v10  ;;  %8631 = vmatprep.subr.bf16.mxu0 %v9461_v11  ;;  %v625_v10 = vrot.slane %v324_v8, %v9967_v42  ;;  %v618_v11 = vcombine.high %v324_v8, %v324_v8 }
 0x261   : > { %8653 = vmatprep.subr.bf16.mxu1 %v9462_v12  ;;  %v9501_v12 = vld [vmem:[%s9910_s15 + $0x1080] sm:$0xff]  }
 0x262   : > { %v807_v19 = vpack.c.bf16 %v625_v10, %v625_v10 }
 0x263   : > { %8632 = vmatpush3.bf16.msra.mxu0 %v9463_v13  ;;  %v633_v13 = vcombine.high %v625_v10, %v625_v10  ;;  %v9537_v10 = vld [vmem:[%s9910_s15 + $0x1238] sm:$0xff]  }
 0x264   : > { %8654 = vmatpush3.bf16.msra.mxu1 %v9464_v14  ;;  %8633 = vmatprep.subr.bf16.mxu0 %v9465_v15  ;;  %v632_v14 = vrot.slane %v618_v11, %v9967_v42  ;;  %v9503_v15 = vld [vmem:[%s9910_s15 + $0x1178] sm:$0xff]  }
 0x265   : > { %8655 = vmatprep.subr.bf16.mxu1 %v9466_v16  ;;  %v9504_v16 = vld [vmem:[%s9910_s15 + $0x11f8] sm:$0xff]   ;;  %v808_v17 = vpack.c.bf16 %v633_v13, %v633_v13 }
 0x267   : > { %8634 = vmatpush3.bf16.msra.mxu0 %v9467_v18  ;;  %v634_v18 = vcombine.high %v632_v14, %v632_v14 }
 0x268   : > { %8656 = vmatpush3.bf16.msra.mxu1 %v9468_v21  ;;  %8663 = vmatprep.subr.bf16.mxu0 %v9470_v24  ;;  %v809_v21 = vpack.c.bf16 %v632_v14, %v632_v14  ;;  %v9507_v24 = vld [vmem:[%s9910_s15 + $0x1170] sm:$0xff]  }
 0x269   : > { %8685 = vmatprep.subr.bf16.mxu1 %v9471_v25  ;;  %v810_v23 = vpack.c.bf16 %v634_v18, %v634_v18  ;;  %v9508_v25 = vld [vmem:[%s9910_s15 + $0x11f0] sm:$0xff]  }
 0x26a   : > { %v8371_v35 = vpop.f32.mrf.mxu0  ;;  %6851 = vmatmul.mubr.bf16.vlgmr.msra.gmra.mxu0 %v803_v28  ;;  %v9509_v28 = vld [vmem:[%s9910_s15 + $0x1130] sm:$0xff]  }
 0x26b   : > { %v8393_v36 = vpop.f32.mrf.mxu1  ;;  %6891 = vmatmul.mubr.bf16.vlgmr.msra.gmra.mxu1 %v805_v30  ;;  %8664 = vmatpush3.bf16.msra.mxu0 %v9472_v29  ;;  %v9510_v29 = vld [vmem:[%s9910_s15 + $0x11b0] sm:$0xff]  }
 0x26c   : > { %8686 = vmatpush3.bf16.msra.mxu1 %v9473_v31  ;;  %v8372_v39 = vpop.f32.mrf.mxu0  ;;  %8665 = vmatprep.subr.bf16.mxu0 %v9474_v33  ;;  %v9539_v14 = vld [vmem:[%s9910_s15 + $0x1270] sm:$0xff]  }
 0x26d   : > { %v8394_v40 = vpop.f32.mrf.mxu1  ;;  %v8373_v43 = vadd.f32 %v8372_v39, %v8371_v35  ;;  %8687 = vmatprep.subr.bf16.mxu1 %v9475_v34  ;;  %6930 = vmatprep.mubr.bf16.mxu0 %v808_v17  ;;  %v9512_v35 = vld [vmem:[%s9910_s15 + $0x11e8] sm:$0xff]   ;;  %v9540_v18 = vld [vmem:[%s9910_s15 + $0x1230] sm:$0xff]  }
 0x26e   : > { %v8395_v44 = vadd.f32 %v8394_v40, %v8393_v36  ;;  %v8374_v46 = vpop.f32.mrf.mxu0  ;;  %6970 = vmatprep.mubr.bf16.mxu1 %v810_v23  ;;  %v9514_v40 = vld [vmem:[%s9910_s15 + $0x11a8] sm:$0xff]  }
 0x26f   : > { %v8396_v47 = vpop.f32.mrf.mxu1  ;;  %v6373_v49 = vadd.f32 %v8373_v43, %v10497_v0  ;;  %8666 = vmatpush3.bf16.msra.mxu0 %v9476_v37  ;;  %v9492_v0 = vld [vmem:[%s9910_s15 + $0x1010] sm:$0xff]   ;;  %v9516_v46 = vld [vmem:[%s9910_s15 + $0x11e0] sm:$0xff]  }
 0x270   : > { %8688 = vmatpush3.bf16.msra.mxu1 %v9477_v38  ;;  %v8375_v51 = vpop.f32.mrf.mxu0  ;;  %8667 = vmatprep.subr.bf16.mxu0 %v9478_v41  ;;  %v9513_v38 = vld [vmem:[%s9910_s15 + $0x1128] sm:$0xff]   ;;  %v9517_v47 = vld [vmem:[%s9910_s15 + $0x1120] sm:$0xff]  }
 0x271   : > { %v8397_v52 = vpop.f32.mrf.mxu1  ;;  %v10534_v54 = vadd.f32 %v8395_v44, %v6373_v49  ;;  %8689 = vmatprep.subr.bf16.mxu1 %v9479_v45  ;;  %v9515_v44 = vld [vmem:[%s9910_s15 + $0x1160] sm:$0xff]   ;;  %v9519_v49 = vld [vmem:[%s9910_s15 + $0x1158] sm:$0xff]  }
 0x272   : > { %v9521_v51 = vld [vmem:[%s9910_s15 + $0x1118] sm:$0xff]  }
 0x273   : > { %8668 = vmatpush3.bf16.msra.mxu0 %v9480_v48  ;;  %v9518_v48 = vld [vmem:[%s9910_s15 + $0x11a0] sm:$0xff]   ;;  %v9522_v52 = vld [vmem:[%s9910_s15 + $0x1198] sm:$0xff]  }
 0x274   : > { %8690 = vmatpush3.bf16.msra.mxu1 %v9481_v50  ;;  %8669 = vmatprep.subr.bf16.mxu0 %v9482_v53  ;;  %v9520_v50 = vld [vmem:[%s9910_s15 + $0x11d8] sm:$0xff]   ;;  %v9523_v53 = vld [vmem:[%s9910_s15 + $0x1150] sm:$0xff]  }
 0x275   : > { %8691 = vmatprep.subr.bf16.mxu1 %v9483_v55  ;;  %v9525_v55 = vld [vmem:[%s9910_s15 + $0x1110] sm:$0xff]  }
 0x277   : > { %8670 = vmatpush3.bf16.msra.mxu0 %v9484_v56  ;;  %v9526_v56 = vld [vmem:[%s9910_s15 + $0x1190] sm:$0xff]  }
 0x278   : > { %8692 = vmatpush3.bf16.msra.mxu1 %v9485_v57  ;;  %8671 = vmatprep.subr.bf16.mxu0 %v9486_v58  ;;  %v9527_v57 = vld [vmem:[%s9910_s15 + $0x1148] sm:$0xff]  }
 0x279   : > { %8693 = vmatprep.subr.bf16.mxu1 %v9487_v59  ;;  %v9528_v58 = vld [vmem:[%s9910_s15 + $0x11c8] sm:$0xff]  }
 0x27a   : > { %v9529_v59 = vld [vmem:[%s9910_s15 + $0x1108] sm:$0xff]  }
 0x27b   : > { %8672 = vmatpush3.bf16.msra.mxu0 %v9488_v60  ;;  %v9530_v60 = vld [vmem:[%s9910_s15 + $0x1188] sm:$0xff]  }
 0x27c   : > { %8694 = vmatpush3.bf16.msra.mxu1 %v9489_v61  ;;  %8673 = vmatprep.subr.bf16.mxu0 %v9490_v62  ;;  %v9531_v61 = vld [vmem:[%s9910_s15 + $0x1140] sm:$0xff]  }
 0x27d   : > { %8695 = vmatprep.subr.bf16.mxu1 %v9491_v63  ;;  %v9532_v62 = vld [vmem:[%s9910_s15 + $0x11c0] sm:$0xff]  }
 0x27e   : > { %v325_v63 = vld [vmem:[%s9928_s13 + $0x88] sm:$0xff] }
 0x27f   : > { %8674 = vmatpush3.bf16.msra.mxu0 %v9492_v0  ;;  %v642_v0 = vrot.slane %v325_v63, %v9967_v42 }
 0x280   : > { %8696 = vmatpush3.bf16.msra.mxu1 %v9493_v1  ;;  %8675 = vmatprep.subr.bf16.mxu0 %v9494_v2  ;;  %v635_v1 = vcombine.high %v325_v63, %v325_v63  ;;  %v9533_v2 = vld [vmem:[%s9910_s15 + $0x1100] sm:$0xff]  }
 0x281   : > { %8697 = vmatprep.subr.bf16.mxu1 %v9495_v3  ;;  %v9534_v3 = vld [vmem:[%s9910_s15 + $0x1180] sm:$0xff]  }
 0x283   : > { %8676 = vmatpush3.bf16.msra.mxu0 %v9496_v4  ;;  %v650_v4 = vcombine.high %v642_v0, %v642_v0 }
 0x284   : > { %8698 = vmatpush3.bf16.msra.mxu1 %v9497_v5  ;;  %8677 = vmatprep.subr.bf16.mxu0 %v9498_v6  ;;  %v649_v5 = vrot.slane %v635_v1, %v9967_v42  ;;  %v9536_v6 = vld [vmem:[%s9910_s15 + $0x1278] sm:$0xff]  }
 0x285   : > { %8699 = vmatprep.subr.bf16.mxu1 %v9499_v7  ;;  %v812_v7 = vpack.c.bf16 %v650_v4, %v650_v4 }
 0x286   : > { %v651_v8 = vcombine.high %v649_v5, %v649_v5  ;;  %v813_v11 = vpack.c.bf16 %v649_v5, %v649_v5 }
 0x287   : > { %8678 = vmatpush3.bf16.msra.mxu0 %v9500_v9  ;;  %v811_v9 = vpack.c.bf16 %v642_v0, %v642_v0 }
 0x288   : > { %8700 = vmatpush3.bf16.msra.mxu1 %v9501_v12  ;;  %8707 = vmatprep.subr.bf16.mxu0 %v9503_v15  ;;  %v9538_v12 = vld [vmem:[%s9910_s15 + $0x12b8] sm:$0xff]   ;;  %v814_v13 = vpack.c.bf16 %v651_v8, %v651_v8  ;;  %v9748_v15 = vmov 0.0  }
 0x289   : > { %8729 = vmatprep.subr.bf16.mxu1 %v9504_v16 }
 0x28a   : > { %v8415_v26 = vpop.f32.mrf.mxu0  ;;  %6931 = vmatmul.mubr.bf16.vlgmr.msra.gmra.mxu0 %v807_v19  ;;  %v9541_v19 = vld [vmem:[%s9910_s15 + $0x12b0] sm:$0xff]  }
 0x28b   : > { %v8437_v27 = vpop.f32.mrf.mxu1  ;;  %6971 = vmatmul.mubr.bf16.vlgmr.msra.gmra.mxu1 %v809_v21  ;;  %8708 = vmatpush3.bf16.msra.mxu0 %v9505_v20 }
 0x28c   : > { %8730 = vmatpush3.bf16.msra.mxu1 %v9506_v22  ;;  %v8416_v30 = vpop.f32.mrf.mxu0  ;;  %8709 = vmatprep.subr.bf16.mxu0 %v9507_v24  ;;  %v9542_v22 = vld [vmem:[%s9910_s15 + $0x1268] sm:$0xff]  }
 0x28d   : > { %v8438_v31 = vpop.f32.mrf.mxu1  ;;  %v8417_v33 = vadd.f32 %v8416_v30, %v8415_v26  ;;  %8731 = vmatprep.subr.bf16.mxu1 %v9508_v25  ;;  %7010 = vmatprep.mubr.bf16.mxu0 %v812_v7 }
 0x28e   : > { %v8439_v34 = vadd.f32 %v8438_v31, %v8437_v27  ;;  %v8418_v36 = vpop.f32.mrf.mxu0  ;;  %7050 = vmatprep.mubr.bf16.mxu1 %v814_v13  ;;  %v9543_v27 = vld [vmem:[%s9910_s15 + $0x1228] sm:$0xff]  }
 0x28f   : > { %v8440_v37 = vpop.f32.mrf.mxu1  ;;  %v6453_v39 = vadd.f32 %v8417_v33, %v10534_v54  ;;  %8710 = vmatpush3.bf16.msra.mxu0 %v9509_v28  ;;  %v9524_v54 = vld [vmem:[%s9910_s15 + $0x11d0] sm:$0xff]   ;;  %v9548_v36 = vld [vmem:[%s9910_s15 + $0x1258] sm:$0xff]  }
 0x290   : > { %8732 = vmatpush3.bf16.msra.mxu1 %v9510_v29  ;;  %v8419_v41 = vpop.f32.mrf.mxu0  ;;  %8711 = vmatprep.subr.bf16.mxu0 %v9511_v32  ;;  %v9544_v29 = vld [vmem:[%s9910_s15 + $0x12a8] sm:$0xff]   ;;  %v9545_v32 = vld [vmem:[%s9910_s15 + $0x1260] sm:$0xff]   ;;  %v9549_v37 = vld [vmem:[%s9910_s15 + $0x1218] sm:$0xff]  }
 0x291   : > { %v8441_v43 = vpop.f32.mrf.mxu1  ;;  %v10572_v45 = vadd.f32 %v8439_v34, %v6453_v39  ;;  %8733 = vmatprep.subr.bf16.mxu1 %v9512_v35  ;;  %v9546_v34 = vld [vmem:[%s9910_s15 + $0x1220] sm:$0xff]   ;;  %v9551_v39 = vld [vmem:[%s9910_s15 + $0x1250] sm:$0xff]  }
 0x292   : > { %v9547_v35 = vld [vmem:[%s9910_s15 + $0x12a0] sm:$0xff]   ;;  %v9552_v41 = vld [vmem:[%s9910_s15 + $0x1210] sm:$0xff]  }
 0x293   : > { %8712 = vmatpush3.bf16.msra.mxu0 %v9513_v38  ;;  %v9550_v38 = vld [vmem:[%s9910_s15 + $0x1298] sm:$0xff]  }
 0x294   : > { %8734 = vmatpush3.bf16.msra.mxu1 %v9514_v40  ;;  %8713 = vmatprep.subr.bf16.mxu0 %v9515_v44  ;;  %v326_v40 = vld [vmem:[%s9928_s13 + $0x90] sm:$0x3f] }
 0x295   : > { %8735 = vmatprep.subr.bf16.mxu1 %v9516_v46  ;;  %v659_v43 = vrot.slane %v326_v40, %v9967_v42  ;;  %v9553_v44 = vld [vmem:[%s9910_s15 + $0x1290] sm:$0xff]  }
 0x297   : > { %8714 = vmatpush3.bf16.msra.mxu0 %v9517_v47  ;;  %v667_v46 = vcombine.high %v659_v43, %v659_v43  ;;  %v9555_v47 = vld [vmem:[%s9910_s15 + $0x1208] sm:$0xff]  }
 0x298   : > { %8736 = vmatpush3.bf16.msra.mxu1 %v9518_v48  ;;  %8715 = vmatprep.subr.bf16.mxu0 %v9519_v49  ;;  %v652_v48 = vcombine.high %v326_v40, %v326_v40 }
 0x299   : > { %8737 = vmatprep.subr.bf16.mxu1 %v9520_v50  ;;  %v816_v49 = vpack.c.bf16 %v667_v46, %v667_v46  ;;  %v9556_v50 = vld [vmem:[%s9910_s15 + $0x1288] sm:$0xff]  }
 0x29b   : > { %8716 = vmatpush3.bf16.msra.mxu0 %v9521_v51  ;;  %v9557_v51 = vld [vmem:[%s9910_s15 + $0x1240] sm:$0xff]  }
 0x29c   : > { %8738 = vmatpush3.bf16.msra.mxu1 %v9522_v52  ;;  %8717 = vmatprep.subr.bf16.mxu0 %v9523_v53  ;;  %v9558_v52 = vld [vmem:[%s9910_s15 + $0x1200] sm:$0xff]   ;;  %v666_v53 = vrot.slane %v652_v48, %v9967_v42 }
 0x29d   : > { %8739 = vmatprep.subr.bf16.mxu1 %v9524_v54  ;;  %v9559_v54 = vld [vmem:[%s9910_s15 + $0x1280] sm:$0xff]  }
 0x29f   : > { %8718 = vmatpush3.bf16.msra.mxu0 %v9525_v55  ;;  %v815_v55 = vpack.c.bf16 %v659_v43, %v659_v43 }
 0x2a0   : > { %8740 = vmatpush3.bf16.msra.mxu1 %v9526_v56  ;;  %8719 = vmatprep.subr.bf16.mxu0 %v9527_v57  ;;  %v817_v56 = vpack.c.bf16 %v666_v53, %v666_v53 }
 0x2a1   : > { %8741 = vmatprep.subr.bf16.mxu1 %v9528_v58 }
 0x2a3   : > { %8720 = vmatpush3.bf16.msra.mxu0 %v9529_v59 }
 0x2a4   : > { %8742 = vmatpush3.bf16.msra.mxu1 %v9530_v60  ;;  %8721 = vmatprep.subr.bf16.mxu0 %v9531_v61 }
 0x2a5   : > { %8743 = vmatprep.subr.bf16.mxu1 %v9532_v62 }
 0x2a7   : > { %8722 = vmatpush3.bf16.msra.mxu0 %v9533_v2 }
 0x2a8   : > { %8744 = vmatpush3.bf16.msra.mxu1 %v9534_v3  ;;  %8751 = vmatprep.subr.bf16.mxu0 %v9536_v6 }
 0x2a9   : > { %8799 = vmatprep.subr.bf16.mxu1 %v9748_v15 }
 0x2aa   : > { %v8459_v16 = vpop.f32.mrf.mxu0  ;;  %7011 = vmatmul.mubr.bf16.vlgmr.msra.gmra.mxu0 %v811_v9 }
 0x2ab   : > { %v8481_v17 = vpop.f32.mrf.mxu1  ;;  %7051 = vmatmul.mubr.bf16.vlgmr.msra.gmra.mxu1 %v813_v11  ;;  %8752 = vmatpush3.bf16.msra.mxu0 %v9537_v10 }
 0x2ac   : > { %8800 = vmatpush3.bf16.msra.mxu1 %v9538_v12  ;;  %v8460_v20 = vpop.f32.mrf.mxu0  ;;  %8753 = vmatprep.subr.bf16.mxu0 %v9539_v14 }
 0x2ad   : > { %v8482_v21 = vpop.f32.mrf.mxu1  ;;  %v8461_v23 = vadd.f32 %v8460_v20, %v8459_v16  ;;  %8801 = vmatprep.subr.bf16.mxu1 %v9748_v15  ;;  %8815 = vmatprep.mubr.msk.bf16.mxu1 %vm9749_vm0, %v9748_v15 }
 0x2ae   : > { %v8483_v24 = vadd.f32 %v8482_v21, %v8481_v17  ;;  %v8462_v25 = vpop.f32.mrf.mxu0  ;;  %7090 = vmatprep.mubr.bf16.mxu0 %v816_v49 }
 0x2af   : > { %v8484_v26 = vpop.f32.mrf.mxu1  ;;  %v6533_v28 = vadd.f32 %v8461_v23, %v10572_v45  ;;  %8754 = vmatpush3.bf16.msra.mxu0 %v9540_v18  ;;  %v9554_v45 = vld [vmem:[%s9910_s15 + $0x1248] sm:$0xff]  }
 0x2b0   : > { %8802 = vmatpush3.bf16.msra.mxu1 %v9541_v19  ;;  %v8463_v30 = vpop.f32.mrf.mxu0  ;;  %8755 = vmatprep.subr.bf16.mxu0 %v9542_v22 }
 0x2b1   : > { %v8485_v31 = vpop.f32.mrf.mxu1  ;;  %v6573_v33 = vadd.f32 %v8483_v24, %v6533_v28  ;;  %8803 = vmatprep.subr.bf16.mxu1 %v9748_v15 }
 0x2b3   : > { %8756 = vmatpush3.bf16.msra.mxu0 %v9543_v27 }
 0x2b4   : > { %8804 = vmatpush3.bf16.msra.mxu1 %v9544_v29  ;;  %8757 = vmatprep.subr.bf16.mxu0 %v9545_v32 }
 0x2b5   : > { %8805 = vmatprep.subr.bf16.mxu1 %v9748_v15 }
 0x2b7   : > { %8758 = vmatpush3.bf16.msra.mxu0 %v9546_v34 }
 0x2b8   : > { %8806 = vmatpush3.bf16.msra.mxu1 %v9547_v35  ;;  %8759 = vmatprep.subr.bf16.mxu0 %v9548_v36 }
 0x2b9   : > { %8807 = vmatprep.subr.bf16.mxu1 %v9748_v15 }
 0x2bb   : > { %8760 = vmatpush3.bf16.msra.mxu0 %v9549_v37 }
 0x2bc   : > { %8808 = vmatpush3.bf16.msra.mxu1 %v9550_v38  ;;  %8761 = vmatprep.subr.bf16.mxu0 %v9551_v39 }
 0x2bd   : > { %8809 = vmatprep.subr.bf16.mxu1 %v9748_v15 }
 0x2bf   : > { %8762 = vmatpush3.bf16.msra.mxu0 %v9552_v41 }
 0x2c0   : > { %8810 = vmatpush3.bf16.msra.mxu1 %v9553_v44  ;;  %8763 = vmatprep.subr.bf16.mxu0 %v9554_v45 }
 0x2c1   : > { %8811 = vmatprep.subr.bf16.mxu1 %v9748_v15 }
 0x2c3   : > { %8764 = vmatpush3.bf16.msra.mxu0 %v9555_v47 }
 0x2c4   : > { %8812 = vmatpush3.bf16.msra.mxu1 %v9556_v50  ;;  %8765 = vmatprep.subr.bf16.mxu0 %v9557_v51 }
 0x2c5   : > { %8813 = vmatprep.subr.bf16.mxu1 %v9748_v15 }
 0x2c7   : > { %8766 = vmatpush3.bf16.msra.mxu0 %v9558_v52 }
 0x2c8   : > { %8814 = vmatpush3.bf16.msra.mxu1 %v9559_v54 }
 0x2ca   : > { %v8503_v57 = vpop.f32.mrf.mxu0  ;;  %7091 = vmatmul.mubr.bf16.vlgmr.msra.gmra.mxu0 %v815_v55 }
 0x2cb   : > { %v8525_v58 = vpop.f32.mrf.mxu1  ;;  %8816 = vmatmul.mubr.bf16.vlgmr.msra.gmra.mxu1 %v817_v56 }
 0x2cc   : > { %v8504_v59 = vpop.f32.mrf.mxu0 }
 0x2cd   : > { %v8526_v60 = vpop.f32.mrf.mxu1  ;;  %v8505_v61 = vadd.f32 %v8504_v59, %v8503_v57 }
 0x2ce   : > { %v8527_v62 = vadd.f32 %v8526_v60, %v8525_v58  ;;  %v8506_v63 = vpop.f32.mrf.mxu0 }
 0x2cf   : > { %v8528_v0 = vpop.f32.mrf.mxu1  ;;  %v6613_v42 = vadd.f32 %v8505_v61, %v6573_v33 }
 0x2d0   : > { %v8507_v1 = vpop.f32.mrf.mxu0 }
 0x2d1   : > { %v8529_v2 = vpop.f32.mrf.mxu1  ;;  %v6653_v3 = vadd.f32 %v8527_v62, %v6613_v42 }
 0x2ea   : > { %v8547_v4 = vpop.f32.mrf.mxu0 }
 0x2eb   : > { %v8569_v5 = vpop.f32.mrf.mxu1 }
 0x2ec   : > { %v8548_v6 = vpop.f32.mrf.mxu0 }
 0x2ed   : > { %v8570_v7 = vpop.f32.mrf.mxu1  ;;  %v8549_v8 = vadd.f32 %v8548_v6, %v8547_v4 }
 0x2ee   : > { %v8571_v9 = vadd.f32 %v8570_v7, %v8569_v5  ;;  %v8550_v10 = vpop.f32.mrf.mxu0 }
 0x2ef   : > { %v8572_v11 = vpop.f32.mrf.mxu1  ;;  %v6693_v12 = vadd.f32 %v8549_v8, %v6653_v3  ;;  %v307_v8 = vld [vmem:[#allocation2] sm:$0x3] }
 0x2f0   : > { %v8551_v13 = vpop.f32.mrf.mxu0 }
 0x2f1   : > { %v8573_v14 = vpop.f32.mrf.mxu1  ;;  %v6733_v15 = vadd.f32 %v8571_v9, %v6693_v12 }
 0x30a   : > { %v8591_v16 = vpop.f32.mrf.mxu0 }
 0x30b   : > { %v8613_v17 = vpop.f32.mrf.mxu1 }
 0x30c   : > { %v8592_v18 = vpop.f32.mrf.mxu0 }
 0x30d   : > { %v8614_v19 = vpop.f32.mrf.mxu1  ;;  %v8593_v20 = vadd.f32 %v8592_v18, %v8591_v16 }
 0x30e   : > { %v8615_v21 = vadd.f32 %v8614_v19, %v8613_v17  ;;  %v8594_v22 = vpop.f32.mrf.mxu0 }
 0x30f   : > { %v8616_v23 = vpop.f32.mrf.mxu1  ;;  %v6773_v24 = vadd.f32 %v8593_v20, %v6733_v15 }
 0x310   : > { %v8595_v25 = vpop.f32.mrf.mxu0 }
 0x311   : > { %v8617_v26 = vpop.f32.mrf.mxu1  ;;  %v6813_v27 = vadd.f32 %v8615_v21, %v6773_v24 }
 0x32a   : > { %v8635_v28 = vpop.f32.mrf.mxu0 }
 0x32b   : > { %v8657_v29 = vpop.f32.mrf.mxu1 }
 0x32c   : > { %v8636_v30 = vpop.f32.mrf.mxu0 }
 0x32d   : > { %v8637_v31 = vadd.f32 %v8636_v30, %v8635_v28  ;;  %v8658_v32 = vpop.f32.mrf.mxu1 }
 0x32e   : > { %v8659_v33 = vadd.f32 %v8658_v32, %v8657_v29  ;;  %v8638_v34 = vpop.f32.mrf.mxu0 }
 0x32f   : > { %v6853_v35 = vadd.f32 %v8637_v31, %v6813_v27  ;;  %v8660_v36 = vpop.f32.mrf.mxu1 }
 0x330   : > { %v8639_v37 = vpop.f32.mrf.mxu0 }
 0x331   : > { %v6893_v38 = vadd.f32 %v8659_v33, %v6853_v35  ;;  %v8661_v39 = vpop.f32.mrf.mxu1 }
 0x34a   : > { %v8679_v40 = vpop.f32.mrf.mxu0 }
 0x34b   : > { %v8701_v41 = vpop.f32.mrf.mxu1 }
 0x34c   : > { %v8680_v43 = vpop.f32.mrf.mxu0 }
 0x34d   : > { %v8702_v44 = vpop.f32.mrf.mxu1  ;;  %v8681_v57 = vadd.f32 %v8680_v43, %v8679_v40 }
 0x34e   : > { %v8682_v45 = vpop.f32.mrf.mxu0  ;;  %v8703_v59 = vadd.f32 %v8702_v44, %v8701_v41 }
 0x34f   : > { %v8704_v46 = vpop.f32.mrf.mxu1  ;;  %v6933_v58 = vadd.f32 %v8681_v57, %v6893_v38 }
 0x350   : > { %v8683_v47 = vpop.f32.mrf.mxu0 }
 0x351   : > { %v8705_v48 = vpop.f32.mrf.mxu1  ;;  %v6973_v61 = vadd.f32 %v8703_v59, %v6933_v58 }
 0x36a   : > { %v8723_v49 = vpop.f32.mrf.mxu0 }
 0x36b   : > { %v8745_v50 = vpop.f32.mrf.mxu1 }
 0x36c   : > { %v8724_v51 = vpop.f32.mrf.mxu0 }
 0x36d   : > { %v8746_v52 = vpop.f32.mrf.mxu1  ;;  %v8725_v60 = vadd.f32 %v8724_v51, %v8723_v49 }
 0x36e   : > { %v8726_v53 = vpop.f32.mrf.mxu0  ;;  %v8747_v63 = vadd.f32 %v8746_v52, %v8745_v50 }
 0x36f   : > { %v8748_v54 = vpop.f32.mrf.mxu1  ;;  %v7013_v62 = vadd.f32 %v8725_v60, %v6973_v61 }
 0x370   : > { %v8727_v55 = vpop.f32.mrf.mxu0 }
 0x371   : > { %v8749_v56 = vpop.f32.mrf.mxu1  ;;  %v7053_v2 = vadd.f32 %v8747_v63, %v7013_v62 }
 0x38a   : > { %v8767_v0 = vpop.f32.mrf.mxu0 }
 0x38b   : > { %v7132_v42 = vpop.f32.mrf.mxu1 }
 0x38c   : > { %v8768_v1 = vpop.f32.mrf.mxu0 }
 0x38d   : > { %v8769_v3 = vadd.f32 %v8768_v1, %v8767_v0  ;;  %v8817_v4 = vpop.f32.mrf.mxu1 }
 0x38e   : > { %v8770_v5 = vpop.f32.mrf.mxu0 }
 0x38f   : > { %v7093_v6 = vadd.f32 %v8769_v3, %v7053_v2  ;;  %v7135_v7 = vpop.f32.mrf.mxu1 }
 0x390   : > { %v8771_v9 = vpop.f32.mrf.mxu0 }
 0x391   : > { %v7133_v10 = vadd.f32 %v7132_v42, %v7093_v6  ;;  %v8818_v11 = vpop.f32.mrf.mxu1  ;;  %7143 = sbr.rel (%p7952_p2) target bundleno = 1147 (0x47b), region = 64 }
 0x393   : > { %v7138_v12 = vadd.f32 %v7133_v10, %v307_v8 }
 0x395   : > { %7139 = vst [vmem:[#allocation2] sm:$0x3] %v7138_v12 }
 0x396   : > { %v7161_v13 = vld [vmem:[#allocation8 + $0x78] sm:$0xff]  ;;  %v9750_v14 = vmov 0.0   ;;  %v7160_v15 = vld [vmem:[#allocation8 + $0x70] sm:$0xff]  ;;  %vm9751_vm1 = vmmov 0   ;;  %v7159_v16 = vld [vmem:[#allocation8 + $0x68] sm:$0xff] }
 0x397   : > { %8819 = vmatprep.subr.mxu0 %v9750_v14  ;;  %8851 = vmatprep.mubr.msk.f32.mxu0 %vm9751_vm1, %v9750_v14  ;;  %v7158_v17 = vld [vmem:[#allocation8 + $0x60] sm:$0xff]  ;;  %v7157_v18 = vld [vmem:[#allocation8 + $0x58] sm:$0xff]  ;;  %v7156_v19 = vld [vmem:[#allocation8 + $0x50] sm:$0xff] }
 0x398   : > { %8820 = vmatpush3.msra.mxu0 %v7161_v13  ;;  %v7155_v20 = vld [vmem:[#allocation8 + $0x48] sm:$0xff]  ;;  %v7154_v21 = vld [vmem:[#allocation8 + $0x40] sm:$0xff]  ;;  %v7153_v22 = vld [vmem:[#allocation8 + $0x38] sm:$0xff] }
 0x399   : > { %8821 = vmatprep.subr.mxu0 %v9750_v14  ;;  %v7152_v23 = vld [vmem:[#allocation8 + $0x30] sm:$0xff]  ;;  %v7151_v24 = vld [vmem:[#allocation8 + $0x28] sm:$0xff]  ;;  %v7150_v25 = vld [vmem:[#allocation8 + $0x20] sm:$0xff] }
 0x39a   : > { %8822 = vmatpush3.msra.mxu0 %v7160_v15  ;;  %v7149_v26 = vld [vmem:[#allocation8 + $0x18] sm:$0xff]  ;;  %v7148_v27 = vld [vmem:[#allocation8 + $0x10] sm:$0xff]  ;;  %v7147_v29 = vld [vmem:[#allocation8 + $0x8] sm:$0xff] }
 0x39b   : > { %8823 = vmatprep.subr.mxu0 %v9750_v14  ;;  %v7146_v30 = vld [vmem:[#allocation8] sm:$0xff] }
 0x39c   : > { %8824 = vmatpush3.msra.mxu0 %v7159_v16  ;;  %v7144_v28 = vld [vmem:[#allocation2] sm:$0x3]  ;;  %v7953_v32 = vld [vmem:[#allocation9] ss:$0 sm:$0xff] }
 0x39d   : > { %8825 = vmatprep.subr.mxu0 %v9750_v14  ;;  %v7145_v31 = vmax.f32 %v7144_v28, 0.0 }
 0x39e   : > { %8826 = vmatpush3.msra.mxu0 %v7158_v17 }
 0x39f   : > { %8827 = vmatprep.subr.mxu0 %v9750_v14 }
 0x3a0   : > { %8828 = vmatpush3.msra.mxu0 %v7157_v18 }
 0x3a1   : > { %8829 = vmatprep.subr.mxu0 %v9750_v14 }
 0x3a2   : > { %8830 = vmatpush3.msra.mxu0 %v7156_v19 }
 0x3a3   : > { %8831 = vmatprep.subr.mxu0 %v9750_v14 }
 0x3a4   : > { %8832 = vmatpush3.msra.mxu0 %v7155_v20 }
 0x3a5   : > { %8833 = vmatprep.subr.mxu0 %v9750_v14 }
 0x3a6   : > { %8834 = vmatpush3.msra.mxu0 %v7154_v21 }
 0x3a7   : > { %8835 = vmatprep.subr.mxu0 %v9750_v14 }
 0x3a8   : > { %8836 = vmatpush3.msra.mxu0 %v7153_v22 }
 0x3a9   : > { %8837 = vmatprep.subr.mxu0 %v9750_v14 }
 0x3aa   : > { %8838 = vmatpush3.msra.mxu0 %v7152_v23 }
 0x3ab   : > { %8839 = vmatprep.subr.mxu0 %v9750_v14 }
 0x3ac   : > { %8840 = vmatpush3.msra.mxu0 %v7151_v24 }
 0x3ad   : > { %8841 = vmatprep.subr.mxu0 %v9750_v14 }
 0x3ae   : > { %8842 = vmatpush3.msra.mxu0 %v7150_v25 }
 0x3af   : > { %8843 = vmatprep.subr.mxu0 %v9750_v14 }
 0x3b0   : > { %8844 = vmatpush3.msra.mxu0 %v7149_v26 }
 0x3b1   : > { %8845 = vmatprep.subr.mxu0 %v9750_v14 }
 0x3b2   : > { %8846 = vmatpush3.msra.mxu0 %v7148_v27 }
 0x3b3   : > { %8847 = vmatprep.subr.mxu0 %v9750_v14 }
 0x3b4   : > { %8848 = vmatpush3.msra.mxu0 %v7147_v29 }
 0x3b5   : > { %8849 = vmatprep.subr.mxu0 %v9750_v14 }
 0x3b6   : > { %8850 = vmatpush3.msra.mxu0 %v7146_v30 }
 0x3b7   : > { %8852 = vmatmul.mubr.f32.vlgmr.msra.gmra.mxu0 %v7145_v31 }
 0x477   : > { %v7235_v33 = vpop.f32.mrf.mxu0 }
 0x478   : > { %v7236_v34 = vadd.f32 %v7953_v32, %v7235_v33 }
 0x479   : > { %v8853_v35 = vpop.f32.mrf.mxu0 }
 0x47a   : > { %7239 = vst [vmem:[#allocation11] sm:$0x3] %v7236_v34 }
 0x47b PF: > { %p8895_p3 = scmp.eq.s32.totalorder %s9802_s22, 1  ;;  %s9752_s14 = smov [#allocation11]  }
 0x47c   : > { %s7247_s16 = sshll.u32 %s9752_s14, 4  ;;  %s7248_s16 = int_to_ptr.vmem [resolvable:$true] %s7247_s16 }
 0x47d   : > { %s9667_s17 = scalar_lea.vmem %s7248_s16, 32  ;;  %p9674_p12 = scmp.lt.s32.totalorder %s7248_s16, %s7248_s16 }
 0x47e   : > { %p9668_p7 = scmp.ne.s32.totalorder %s7248_s16, %s9667_s17  ;;  %p9675_p13 = scmp.lt.s32.totalorder %s9667_s17, %s9667_s17 }
 0x480   : > { %p9669_p10 = pnand %p9668_p7, %p8895_p3  ;;  %p9676_p1 = por %p9675_p13, %p9674_p12 }
 0x482   : > { %p9670_p8 = pneg %p9669_p10 }
 0x484   : > { %p9677_p4 = pnand %p9676_p1, %p9670_p8 }
 0x486   : > { %9680 = shalt.err (!%p9677_p4)
}
 0x487   : > { %8871 = dma.vmem_to_hbm [thread:$0]  (%p8895_p3), %s7248_s16, 32, %s10664_s5, [#allocation5]  }
 0x488   : > { %9720 = dma.done.wait (%p8895_p3), [#allocation5], 32  }
 0x489   : > { %9722 = vsyncadd (%p8895_p3), [#allocation5], 4294967264 }
 0x48a PF: > { %p18_p5 = scmp.ge.s32.totalorder %s9861_s26, 4   ;;  %s10679_s18 = smov %s9729_s19 }
 0x48b   : > { %s10680_s19 = smov %s9733_s20  ;;  %s10681_s20 = smov %s9871_s29 }
 0x48c   : > { %s10682_s21 = smov %s9861_s26  ;;  %20 = sbr.rel (!%p18_p5) target bundleno = 6 (0x6), region = 100 }
 0x491   :  { %7260 = vsyncpa [#allocation4], 1 }
 0x492   :  { %7262 = vsyncpa [#allocation4 + $0x1], 1 }
 0x493   :  { %7263 = vsyncpa [#allocation7], 1 }
 0x494   :  { %7264 = vsyncpa [#allocation10], 1 }
 0x495   :  { %7265 = vsyncpa [#allocation5], 1 }
 0x496   :  { %7267 = vsyncpa [#allocation5 + $0x1], 1 }

</bundles_post_ra>
